<compile_context>
chip_gen: v7x
topology: tpu7x:2x2x1
jax: 0.10.0
libtpu: 0.0.40
codegen_flags: <defaults>
</compile_context>

<pallas_src>
import functools

import jax
import jax.numpy as jnp
from jax.experimental import pallas as pl
from jax.experimental.pallas import tpu as pltpu


# ----------------------------------------------------------------------------
# Pallas kernel: whole CAOM forward for B = b_tile batch elements per step.
# ----------------------------------------------------------------------------
def _caom_kernel(
    x_ref,                          # (B, H, W*C_op)  bf16, lane-dense
    w_fused_ref, b_fused_ref,       # fused [shortcut | squeeze1 | squeeze2]
    w_big_ref, b_big_ref,           # im2row conv + folded channel_adj (y+low)
    pw1_ref, b_att1_ref,            # GAP folded into attention conv #1 (f32)
    w_att2_ref, b_att2_ref,         # attention conv #2, lane-tiled (f32)
    n_scale_ref, n_bias_ref,        # final BatchNorm folded, lane-tiled (f32)
    o_ref,                          # (B, H, W*out_c) lane-dense
    im2row_ref,                     # VMEM scratch (B, H, 5*W*up_sq + W*low_sq)
    *, B, H, W, up_sq, low_sq, out_c,
):
    WS = W * up_sq
    WL = W * low_sq
    WO = W * out_c
    KT = 5 * WS + WL
    M = B * H

    # Merge only the leading (B, H) dims -> no lane relayout.
    xrows = x_ref[...].reshape(M, x_ref.shape[-1])        # (M, W*C_op) bf16

    # ---- one fused 1x1 matmul: [shortcut | squeeze1 | squeeze2] -------------
    fused = (jnp.dot(xrows, w_fused_ref[...],
                     preferred_element_type=jnp.float32)
             + b_fused_ref[...])                          # (M, WO+WS+WL) f32
    identity = fused[:, :WO]                              # (M, WO) f32
    sq = jnp.maximum(fused[:, WO:], 0.0)                  # ReLU (f32)
    up_s = sq[:, :WS].astype(jnp.bfloat16).reshape(B, H, WS)
    low_s = sq[:, WS:].astype(jnp.bfloat16).reshape(B, H, WL)

    # ---- H-only im2row into the lane-dense bf16 scratch ----------------------
    # Block dy of the scratch at output row r holds up_s row (r + dy - 2); the
    # last WL lanes hold the squeezed 'low' map.  Only the rows the shifted
    # copies cannot reach need zeroing; re-zeroed every step (cheap) so the
    # kernel stays correct when the "parallel" batch axis is sharded across
    # TensorCores (each core owns its own scratch).
    zrows = jnp.zeros((B, 2, KT), jnp.bfloat16)
    im2row_ref[:, 0:2, :] = zrows
    im2row_ref[:, H - 2:H, :] = zrows
    im2row_ref[:, 2:H, 0 * WS:1 * WS] = up_s[:, 0:H - 2, :]
    im2row_ref[:, 1:H, 1 * WS:2 * WS] = up_s[:, 0:H - 1, :]
    im2row_ref[:, 0:H, 2 * WS:3 * WS] = up_s
    im2row_ref[:, 0:H - 1, 3 * WS:4 * WS] = up_s[:, 1:H, :]
    im2row_ref[:, 0:H - 2, 4 * WS:5 * WS] = up_s[:, 2:H, :]
    im2row_ref[:, :, 5 * WS:] = low_s

    # ---- single banded matmul: GWC 3x3/5x5 + channel_adj (y + low) + bias ---
    conv = (jnp.dot(im2row_ref[...].reshape(M, KT), w_big_ref[...],
                    preferred_element_type=jnp.float32)
            + b_big_ref[...])                             # (M, WO) f32
    out3 = conv.reshape(B, H, WO)

    # ---- attention: GAP -> 1x1 -> ReLU -> 1x1 -> sigmoid ---------------------
    # GAP + conv #1 are one MXU dot (K = W*out_c = 128, GAP weights folded
    # host-side).  hidden = out_c // 8 is tiny, so conv #2 stays on the VPU
    # broadcast path (its weight is pre-tiled to W*out_c lanes).
    rowsum = jnp.sum(out3, axis=1)                        # (B, WO) f32
    a = jnp.maximum(
        jnp.dot(rowsum, pw1_ref[...], preferred_element_type=jnp.float32)
        + b_att1_ref[...], 0.0)                           # (B, hidden)
    att = jax.nn.sigmoid(
        jnp.sum(a[:, :, None] * w_att2_ref[...][None, :, :], axis=1)
        + b_att2_ref[...])                                # (B, WO)

    # ---- residual add + folded BatchNorm (inference) + ReLU -----------------
    res = out3 * att[:, None, :] + identity.reshape(B, H, WO)
    res = jnp.maximum(res * n_scale_ref[...] + n_bias_ref[...], 0.0)
    o_ref[...] = res.astype(o_ref.dtype)                  # lane-dense store


# ----------------------------------------------------------------------------
# Parameter construction (deterministic, torch-layout -> logical NHWC layout).
# ----------------------------------------------------------------------------
def init_caom_params(key, op_channel, out_channel=None, alpha=0.5,
                     squeeze_radio=2, group_size=2, eps=1e-5):
    out_channel = out_channel if out_channel is not None else op_channel
    up_c = int(alpha * op_channel)
    low_c = op_channel - up_c
    up_sq = up_c // squeeze_radio
    low_sq = low_c // squeeze_radio
    half = out_channel // 2
    att_hidden = out_channel // 8

    keys = jax.random.split(key, 32)
    kit = iter(keys)

    def rnd(shape, scale=0.2):
        return jax.random.normal(next(kit), shape, dtype=jnp.float32) * scale

    def fold_bn(w_oi, gamma, beta, mean, var):
        # 1x1 conv (no bias, torch layout (Cout, Cin)) followed by inference
        # BatchNorm, folded into matmul weight (Cin, Cout) + bias (1, Cout).
        s = gamma / jnp.sqrt(var + eps)
        return (w_oi * s[:, None]).T, (beta - mean * s)[None, :]

    w_sq1, b_sq1 = fold_bn(rnd((up_sq, up_c)),
                           1.0 + rnd((up_sq,), 0.1), rnd((up_sq,), 0.1),
                           rnd((up_sq,), 0.1),
                           1.0 + jnp.abs(rnd((up_sq,), 0.1)))
    w_sq2, b_sq2 = fold_bn(rnd((low_sq, low_c)),
                           1.0 + rnd((low_sq,), 0.1), rnd((low_sq,), 0.1),
                           rnd((low_sq,), 0.1),
                           1.0 + jnp.abs(rnd((low_sq,), 0.1)))

    def densify_grouped(w_t, groups):
        # torch grouped conv weight (Cout, Cin//g, kh, kw) -> dense HWIO
        # (kh, kw, Cin, Cout) with zeros in cross-group blocks.
        cout, cin_g, kh, kw = w_t.shape
        cin = cin_g * groups
        cout_g = cout // groups
        dense = jnp.zeros((kh, kw, cin, cout), jnp.float32)
        for g in range(groups):
            blk = jnp.transpose(w_t[g * cout_g:(g + 1) * cout_g], (2, 3, 1, 0))
            dense = dense.at[:, :, g * cin_g:(g + 1) * cin_g,
                             g * cout_g:(g + 1) * cout_g].set(blk)
        return dense

    w_g3 = densify_grouped(rnd((half, up_sq // group_size, 3, 3)), group_size)
    b_g3 = rnd((half,))[None, :]
    w_g5 = densify_grouped(rnd((half, up_sq // group_size, 5, 5)), group_size)
    b_g5 = rnd((half,))[None, :]

    w_short = rnd((out_channel, op_channel)).T
    b_short = rnd((out_channel,))[None, :]

    w_adj = rnd((out_channel, out_channel + low_sq)).T
    b_adj = rnd((out_channel,))[None, :]

    w_att1 = rnd((att_hidden, out_channel)).T          # (out_c, hidden)
    b_att1 = rnd((att_hidden,))[None, :]
    w_att2 = rnd((out_channel, att_hidden)).T          # (hidden, out_c)
    b_att2 = rnd((out_channel,))[None, :]

    g = 1.0 + rnd((out_channel,), 0.1)
    be = rnd((out_channel,), 0.1)
    m = rnd((out_channel,), 0.1)
    v = 1.0 + jnp.abs(rnd((out_channel,), 0.1))
    s = g / jnp.sqrt(v + eps)
    n_scale = s[None, :]
    n_bias = (be - m * s)[None, :]

    params = dict(w_short=w_short, b_short=b_short,
                  w_sq1=w_sq1, b_sq1=b_sq1, w_sq2=w_sq2, b_sq2=b_sq2,
                  w_g3=w_g3, b_g3=b_g3, w_g5=w_g5, b_g5=b_g5,
                  w_adj=w_adj, b_adj=b_adj,
                  w_att1=w_att1, b_att1=b_att1,
                  w_att2=w_att2, b_att2=b_att2,
                  n_scale=n_scale, n_bias=n_bias)
    cfg = dict(up_c=up_c, low_c=low_c, up_sq=up_sq, low_sq=low_sq,
               out_c=out_channel)
    return params, cfg


# ----------------------------------------------------------------------------
# Host-side weight preparation: block-diagonal 1x1 weights, merged 3x3/5x5 +
# folded channel_adj stacked into one banded (K, W*out_c) weight, GAP folded
# into attention conv #1, all biases/scales tiled to lane width.
# ----------------------------------------------------------------------------
def prepare_kernel_params(p, cfg, H, W):
    up_c, low_c = cfg['up_c'], cfg['low_c']
    S, Ls, O = cfg['up_sq'], cfg['low_sq'], cfg['out_c']
    half = O // 2
    eye_w = jnp.eye(W, dtype=jnp.float32)

    def bdiag(w):                       # (Cin, Cout) -> (W*Cin, W*Cout)
        return jnp.kron(eye_w, w)

    def tile_lanes(b):                  # (1, C) -> (1, W*C)
        return jnp.tile(b, (1, W))

    # ---- fused [shortcut | squeeze1 | squeeze2] block-diagonal weight -------
    w_sq1_full = jnp.concatenate(
        [p['w_sq1'], jnp.zeros((low_c, S), jnp.float32)], axis=0)
    w_sq2_full = jnp.concatenate(
        [jnp.zeros((up_c, Ls), jnp.float32), p['w_sq2']], axis=0)
    w_fused = jnp.concatenate(
        [bdiag(p['w_short']), bdiag(w_sq1_full), bdiag(w_sq2_full)], axis=1)
    b_fused = jnp.concatenate(
        [tile_lanes(p['b_short']), tile_lanes(p['b_sq1']),
         tile_lanes(p['b_sq2'])], axis=1)

    # ---- merge grouped 3x3 into 5x5 and fold channel_adj (y-part) -----------
    w_g35 = jnp.zeros((5, 5, S, O), jnp.float32)
    w_g35 = w_g35.at[1:4, 1:4, :, :half].set(p['w_g3'])
    w_g35 = w_g35.at[:, :, :, half:].set(p['w_g5'])
    b_g35 = jnp.concatenate([p['b_g3'], p['b_g5']], axis=1)        # (1, O)

    w_adj_y = p['w_adj'][:O]            # (O, O)
    w_adj_low = p['w_adj'][O:]          # (low_sq, O)
    wf = jnp.einsum('yxcm,mo->yxco', w_g35, w_adj_y)               # (5,5,S,O)
    b_convadj = b_g35 @ w_adj_y + p['b_adj']                       # (1, O)

    # Per-dy banded weights (W zero-padding = dropped taps), stacked along K,
    # with the block-diagonal low-path adj weight appended: (5*W*S+W*Ls, W*O).
    bands = []
    for dy in range(5):
        Z = jnp.zeros((W, W, S, O), jnp.float32)
        for dx in range(5):
            w_lo = max(0, 2 - dx)
            w_hi = min(W, W + 2 - dx)
            wi = jnp.arange(w_lo, w_hi)
            Z = Z.at[wi + dx - 2, wi].set(wf[dy, dx])
        bands.append(Z.transpose(0, 2, 1, 3).reshape(W * S, W * O))
    w_big = jnp.concatenate(bands + [bdiag(w_adj_low)], axis=0)
    b_big = tile_lanes(b_convadj)

    # ---- attention: fold GAP (mean over H*W) into conv #1 -------------------
    pw1 = jnp.tile(p['w_att1'], (W, 1)) * (1.0 / (H * W))          # (W*O, hid)
    w_att2_wide = jnp.tile(p['w_att2'], (1, W))                    # (hid, W*O)
    b_att2_wide = tile_lanes(p['b_att2'])

    return dict(
        w_fused=w_fused.astype(jnp.bfloat16), b_fused=b_fused,
        w_big=w_big.astype(jnp.bfloat16), b_big=b_big,
        pw1=pw1, b_att1=p['b_att1'],
        w_att2=w_att2_wide, b_att2=b_att2_wide,
        n_scale=tile_lanes(p['n_scale']), n_bias=tile_lanes(p['n_bias']))


KPARAM_ORDER = ('w_fused', 'b_fused', 'w_big', 'b_big',
                'pw1', 'b_att1', 'w_att2', 'b_att2', 'n_scale', 'n_bias')


# ----------------------------------------------------------------------------
# Pallas wrapper.
# ----------------------------------------------------------------------------
def caom_pallas(x_nhwc, kparams, cfg, *, b_tile=32, out_dtype=jnp.float32):
    N, H, W, C_op = x_nhwc.shape
    out_c, up_sq, low_sq = cfg['out_c'], cfg['up_sq'], cfg['low_sq']
    assert H >= 3, "H >= 3 required by the H-im2row construction"

    # Batch tile: as large as possible, but keep >= 2 grid blocks (when N >= 2)
    # so the "parallel" axis can shard across the two v7x TensorCores; the cap
    # is harmless on single-TC v5e/v6e.
    b_tile = max(1, min(b_tile, N))
    if N >= 2:
        b_tile = min(b_tile, -(-N // 2))
    n_blocks = pl.cdiv(N, b_tile)
    n_pad = n_blocks * b_tile

    # Lane-dense input: flatten (W, C) into the lane axis and cast to bf16.
    x_flat = x_nhwc.reshape(N, H, W * C_op)
    if n_pad != N:
        x_flat = jnp.pad(x_flat, ((0, n_pad - N), (0, 0), (0, 0)))
    x_flat = x_flat.astype(jnp.bfloat16)

    weights = [kparams[name] for name in KPARAM_ORDER]

    # ---- VMEM budget (banded weight grows as O(W^2); v7x has 64 MiB) --------
    k_tot = 5 * W * up_sq + W * low_sq
    out_isize = jnp.dtype(out_dtype).itemsize
    weight_bytes = sum(int(w.size) * w.dtype.itemsize for w in weights)
    block_bytes = (2 * b_tile * H * W * C_op * 2           # x, double-buffered
                   + 2 * b_tile * H * W * out_c * out_isize
                   + b_tile * H * k_tot * 2)                # im2row scratch
    vmem_est = 2 * weight_bytes + block_bytes
    assert vmem_est < 48 * 2**20, (
        "CAOM banded weights/blocks exceed the safe VMEM budget for this "
        "config; switch to spatial (row-tile + halo) tiling.")
    vmem_limit = int(min(56 * 2**20, max(32 * 2**20, 2 * vmem_est)))

    kernel = functools.partial(
        _caom_kernel, B=b_tile, H=H, W=W,
        up_sq=up_sq, low_sq=low_sq, out_c=out_c)

    in_specs = [pl.BlockSpec((b_tile, H, W * C_op), lambda b: (b, 0, 0))]
    for w in weights:
        in_specs.append(
            pl.BlockSpec(w.shape, lambda b, _nd=w.ndim: (0,) * _nd))

    out_flat = pl.pallas_call(
        kernel,
        out_shape=jax.ShapeDtypeStruct((n_pad, H, W * out_c), out_dtype),
        grid_spec=pltpu.PrefetchScalarGridSpec(
            num_scalar_prefetch=0,
            grid=(n_blocks,),
            in_specs=in_specs,
            out_specs=pl.BlockSpec((b_tile, H, W * out_c),
                                   lambda b: (b, 0, 0)),
            scratch_shapes=[pltpu.VMEM((b_tile, H, k_tot), jnp.bfloat16)]),
        compiler_params=pltpu.CompilerParams(
            dimension_semantics=("parallel",),
            vmem_limit_bytes=vmem_limit),
    )(x_flat, *weights)

    return out_flat[:N].reshape(N, H, W, out_c)


# ----------------------------------------------------------------------------
# Pure-JAX f32 NHWC reference (unfused / unfolded weights) for a sanity check.
# ----------------------------------------------------------------------------
def caom_reference(x, p, cfg):
    def conv1x1(t, w, b):
        return jnp.einsum('nhwc,cd->nhwd', t, w) + b.reshape(1, 1, 1, -1)

    identity = conv1x1(x, p['w_short'], p['b_short'])
    up = x[..., :cfg['up_c']]
    low = x[..., cfg['up_c']:]
    up_s = jax.nn.relu(conv1x1(up, p['w_sq1'], p['b_sq1']))
    low_s = jax.nn.relu(conv1x1(low, p['w_sq2'], p['b_sq2']))
    dn = ('NHWC', 'HWIO', 'NHWC')
    y3 = jax.lax.conv_general_dilated(up_s, p['w_g3'], (1, 1), 'SAME',
                                      dimension_numbers=dn) \
        + p['b_g3'].reshape(1, 1, 1, -1)
    y5 = jax.lax.conv_general_dilated(up_s, p['w_g5'], (1, 1), 'SAME',
                                      dimension_numbers=dn) \
        + p['b_g5'].reshape(1, 1, 1, -1)
    cat = jnp.concatenate([y3, y5, low_s], axis=-1)
    out = conv1x1(cat, p['w_adj'], p['b_adj'])
    pooled = out.mean(axis=(1, 2), keepdims=True)
    a = jax.nn.relu(conv1x1(pooled, p['w_att1'], p['b_att1']))
    att = jax.nn.sigmoid(conv1x1(a, p['w_att2'], p['b_att2']))
    out = out * att
    out = (out + identity) * p['n_scale'].reshape(1, 1, 1, -1) \
        + p['n_bias'].reshape(1, 1, 1, -1)
    return jax.nn.relu(out)


if __name__ == "__main__":
    key = jax.random.PRNGKey(0)
    k_param, k_x = jax.random.split(key)

    op_channel = 16          # -> up=8, low=8, squeezed 4/4, out_channel=16
    N, H, W = 64, 8, 8       # W*C_op = W*out_c = 128 -> lane-dense blocks
    B_TILE = 32              # 2 grid blocks -> both v7x TensorCores busy

    params, cfg = init_caom_params(k_param, op_channel)
    kparams = prepare_kernel_params(params, cfg, H, W)

    x = jax.random.normal(k_x, (N, H, W, op_channel), dtype=jnp.float32)

    out = caom_pallas(x, kparams, cfg, b_tile=B_TILE)
    out = jax.block_until_ready(out)
    assert out.shape == (N, H, W, cfg['out_c'])

    ref = caom_reference(x, params, cfg)
    max_err = float(jnp.max(jnp.abs(out - ref)))
    # Kernel uses bf16 MXU operands (f32 accumulation); reference is pure f32,
    # so allow bf16-scale error while still catching structural bugs.
    tol = 5e-2 * max(1.0, float(jnp.max(jnp.abs(ref))))
    if max_err > tol:
        raise AssertionError(
            f"Pallas/reference mismatch: max abs err {max_err} > tol {tol}")

    print("KERNEL_OK")
</pallas_src>

<mosaic_0001>
module attributes {stable_mosaic.version = 11 : i64} {
  func.func @_caom_kernel(%arg0: i32, %arg1: memref<32x8x128xbf16, #tpu.memory_space<vmem>>, %arg2: memref<128x192xbf16, #tpu.memory_space<vmem>>, %arg3: memref<1x192xf32, #tpu.memory_space<vmem>>, %arg4: memref<192x128xbf16, #tpu.memory_space<vmem>>, %arg5: memref<1x128xf32, #tpu.memory_space<vmem>>, %arg6: memref<128x2xf32, #tpu.memory_space<vmem>>, %arg7: memref<1x2xf32, #tpu.memory_space<vmem>>, %arg8: memref<2x128xf32, #tpu.memory_space<vmem>>, %arg9: memref<1x128xf32, #tpu.memory_space<vmem>>, %arg10: memref<1x128xf32, #tpu.memory_space<vmem>>, %arg11: memref<1x128xf32, #tpu.memory_space<vmem>>, %arg12: memref<32x8x128xf32, #tpu.memory_space<vmem>>, %arg13: memref<32x8x192xbf16, #tpu.memory_space<vmem>>) attributes {dimension_semantics = [#tpu.dimension_semantics<parallel>], iteration_bounds = array<i64: 2>, scalar_prefetch = 0 : i64, scratch_operands = 1 : i64, tpu.core_type = #tpu.core_type<tc>, window_params = [{transform_indices = @transform_0, window_bounds = array<i64: 32, 8, 128>}, {pipeline_mode = #tpu.pipeline_mode<synchronous>, transform_indices = @transform_1, window_bounds = array<i64: 128, 192>}, {pipeline_mode = #tpu.pipeline_mode<synchronous>, transform_indices = @transform_2, window_bounds = array<i64: 1, 192>}, {pipeline_mode = #tpu.pipeline_mode<synchronous>, transform_indices = @transform_3, window_bounds = array<i64: 192, 128>}, {pipeline_mode = #tpu.pipeline_mode<synchronous>, transform_indices = @transform_4, window_bounds = array<i64: 1, 128>}, {pipeline_mode = #tpu.pipeline_mode<synchronous>, transform_indices = @transform_5, window_bounds = array<i64: 128, 2>}, {pipeline_mode = #tpu.pipeline_mode<synchronous>, transform_indices = @transform_6, window_bounds = array<i64: 1, 2>}, {pipeline_mode = #tpu.pipeline_mode<synchronous>, transform_indices = @transform_7, window_bounds = array<i64: 2, 128>}, {pipeline_mode = #tpu.pipeline_mode<synchronous>, transform_indices = @transform_8, window_bounds = array<i64: 1, 128>}, {pipeline_mode = #tpu.pipeline_mode<synchronous>, transform_indices = @transform_9, window_bounds = array<i64: 1, 128>}, {pipeline_mode = #tpu.pipeline_mode<synchronous>, transform_indices = @transform_10, window_bounds = array<i64: 1, 128>}, {transform_indices = @transform_11, window_bounds = array<i64: 32, 8, 128>}]} {
    %c0 = arith.constant 0 : index
    %c0_0 = arith.constant 0 : index
    %c0_1 = arith.constant 0 : index
    %0 = vector.load %arg1[%c0, %c0_0, %c0_1] : memref<32x8x128xbf16, #tpu.memory_space<vmem>>, vector<32x8x128xbf16>
    %1 = vector.shape_cast %0 : vector<32x8x128xbf16> to vector<256x128xbf16>
    %c0_2 = arith.constant 0 : index
    %c0_3 = arith.constant 0 : index
    %2 = vector.load %arg2[%c0_2, %c0_3] : memref<128x192xbf16, #tpu.memory_space<vmem>>, vector<128x192xbf16>
    %cst = arith.constant dense<0.000000e+00> : vector<256x192xf32>
    %3 = tpu.matmul %1, %2, %cst {dimension_numbers = #tpu.dot_dimension_numbers<[1], [0], [0], [1], [0, 0, 1, 1], [], []>} : vector<256x128xbf16>, vector<128x192xbf16>, vector<256x192xf32> -> vector<256x192xf32>
    %c0_4 = arith.constant 0 : index
    %c0_5 = arith.constant 0 : index
    %4 = vector.load %arg3[%c0_4, %c0_5] : memref<1x192xf32, #tpu.memory_space<vmem>>, vector<1x192xf32>
    %5 = vector.broadcast %4 : vector<1x192xf32> to vector<256x192xf32>
    %6 = arith.addf %3, %5 : vector<256x192xf32>
    %7 = vector.extract_strided_slice %6 {offsets = [0, 0], sizes = [256, 128], strides = [1, 1]} : vector<256x192xf32> to vector<256x128xf32>
    %8 = vector.extract_strided_slice %6 {offsets = [0, 128], sizes = [256, 64], strides = [1, 1]} : vector<256x192xf32> to vector<256x64xf32>
    %cst_6 = arith.constant 0.000000e+00 : f32
    %9 = vector.broadcast %cst_6 : f32 to vector<256x64xf32>
    %10 = arith.maximumf %8, %9 : vector<256x64xf32>
    %11 = vector.extract_strided_slice %10 {offsets = [0, 0], sizes = [256, 32], strides = [1, 1]} : vector<256x64xf32> to vector<256x32xf32>
    %12 = arith.truncf %11 : vector<256x32xf32> to vector<256x32xbf16>
    %13 = vector.shape_cast %12 : vector<256x32xbf16> to vector<32x8x32xbf16>
    %14 = vector.extract_strided_slice %10 {offsets = [0, 32], sizes = [256, 32], strides = [1, 1]} : vector<256x64xf32> to vector<256x32xf32>
    %15 = arith.truncf %14 : vector<256x32xf32> to vector<256x32xbf16>
    %16 = vector.shape_cast %15 : vector<256x32xbf16> to vector<32x8x32xbf16>
    %cst_7 = arith.constant 0.000000e+00 : bf16
    %17 = vector.broadcast %cst_7 : bf16 to vector<32x2x192xbf16>
    %c0_8 = arith.constant 0 : index
    %c0_9 = arith.constant 0 : index
    %c0_10 = arith.constant 0 : index
    %18 = vector.load %arg13[%c0_8, %c0_9, %c0_10] : memref<32x8x192xbf16, #tpu.memory_space<vmem>>, vector<32x2x192xbf16>
    tpu.vector_store %arg13[%c0_8, %c0_9, %c0_10], %17 {strides = array<i32>} : memref<32x8x192xbf16, #tpu.memory_space<vmem>>, vector<32x2x192xbf16>,
    %c0_11 = arith.constant 0 : index
    %c6 = arith.constant 6 : index
    %c0_12 = arith.constant 0 : index
    %19 = vector.load %arg13[%c0_11, %c6, %c0_12] : memref<32x8x192xbf16, #tpu.memory_space<vmem>>, vector<32x2x192xbf16>
    tpu.vector_store %arg13[%c0_11, %c6, %c0_12], %17 {strides = array<i32>} : memref<32x8x192xbf16, #tpu.memory_space<vmem>>, vector<32x2x192xbf16>,
    %20 = vector.extract_strided_slice %13 {offsets = [0, 0, 0], sizes = [32, 6, 32], strides = [1, 1, 1]} : vector<32x8x32xbf16> to vector<32x6x32xbf16>
    %c0_13 = arith.constant 0 : index
    %c2 = arith.constant 2 : index
    %c0_14 = arith.constant 0 : index
    %21 = vector.load %arg13[%c0_13, %c2, %c0_14] : memref<32x8x192xbf16, #tpu.memory_space<vmem>>, vector<32x6x32xbf16>
    tpu.vector_store %arg13[%c0_13, %c2, %c0_14], %20 {strides = array<i32>} : memref<32x8x192xbf16, #tpu.memory_space<vmem>>, vector<32x6x32xbf16>,
    %22 = vector.extract_strided_slice %13 {offsets = [0, 0, 0], sizes = [32, 7, 32], strides = [1, 1, 1]} : vector<32x8x32xbf16> to vector<32x7x32xbf16>
    %c0_15 = arith.constant 0 : index
    %c1 = arith.constant 1 : index
    %c32 = arith.constant 32 : index
    %23 = vector.load %arg13[%c0_15, %c1, %c32] : memref<32x8x192xbf16, #tpu.memory_space<vmem>>, vector<32x7x32xbf16>
    tpu.vector_store %arg13[%c0_15, %c1, %c32], %22 {strides = array<i32>} : memref<32x8x192xbf16, #tpu.memory_space<vmem>>, vector<32x7x32xbf16>,
    %c0_16 = arith.constant 0 : index
    %c0_17 = arith.constant 0 : index
    %c64 = arith.constant 64 : index
    %24 = vector.load %arg13[%c0_16, %c0_17, %c64] : memref<32x8x192xbf16, #tpu.memory_space<vmem>>, vector<32x8x32xbf16>
    tpu.vector_store %arg13[%c0_16, %c0_17, %c64], %13 {strides = array<i32>} : memref<32x8x192xbf16, #tpu.memory_space<vmem>>, vector<32x8x32xbf16>,
    %25 = vector.extract_strided_slice %13 {offsets = [0, 1, 0], sizes = [32, 7, 32], strides = [1, 1, 1]} : vector<32x8x32xbf16> to vector<32x7x32xbf16>
    %c0_18 = arith.constant 0 : index
    %c0_19 = arith.constant 0 : index
    %c96 = arith.constant 96 : index
    %26 = vector.load %arg13[%c0_18, %c0_19, %c96] : memref<32x8x192xbf16, #tpu.memory_space<vmem>>, vector<32x7x32xbf16>
    tpu.vector_store %arg13[%c0_18, %c0_19, %c96], %25 {strides = array<i32>} : memref<32x8x192xbf16, #tpu.memory_space<vmem>>, vector<32x7x32xbf16>,
    %27 = vector.extract_strided_slice %13 {offsets = [0, 2, 0], sizes = [32, 6, 32], strides = [1, 1, 1]} : vector<32x8x32xbf16> to vector<32x6x32xbf16>
    %c0_20 = arith.constant 0 : index
    %c0_21 = arith.constant 0 : index
    %c128 = arith.constant 128 : index
    %28 = vector.load %arg13[%c0_20, %c0_21, %c128] : memref<32x8x192xbf16, #tpu.memory_space<vmem>>, vector<32x6x32xbf16>
    tpu.vector_store %arg13[%c0_20, %c0_21, %c128], %27 {strides = array<i32>} : memref<32x8x192xbf16, #tpu.memory_space<vmem>>, vector<32x6x32xbf16>,
    %c0_22 = arith.constant 0 : index
    %c0_23 = arith.constant 0 : index
    %c160 = arith.constant 160 : index
    %29 = vector.load %arg13[%c0_22, %c0_23, %c160] : memref<32x8x192xbf16, #tpu.memory_space<vmem>>, vector<32x8x32xbf16>
    tpu.vector_store %arg13[%c0_22, %c0_23, %c160], %16 {strides = array<i32>} : memref<32x8x192xbf16, #tpu.memory_space<vmem>>, vector<32x8x32xbf16>,
    %c0_24 = arith.constant 0 : index
    %c0_25 = arith.constant 0 : index
    %c0_26 = arith.constant 0 : index
    %30 = vector.load %arg13[%c0_24, %c0_25, %c0_26] : memref<32x8x192xbf16, #tpu.memory_space<vmem>>, vector<32x8x192xbf16>
    %31 = vector.shape_cast %30 : vector<32x8x192xbf16> to vector<256x192xbf16>
    %c0_27 = arith.constant 0 : index
    %c0_28 = arith.constant 0 : index
    %32 = vector.load %arg4[%c0_27, %c0_28] : memref<192x128xbf16, #tpu.memory_space<vmem>>, vector<192x128xbf16>
    %cst_29 = arith.constant dense<0.000000e+00> : vector<256x128xf32>
    %33 = tpu.matmul %31, %32, %cst_29 {dimension_numbers = #tpu.dot_dimension_numbers<[1], [0], [0], [1], [0, 0, 1, 1], [], []>} : vector<256x192xbf16>, vector<192x128xbf16>, vector<256x128xf32> -> vector<256x128xf32>
    %c0_30 = arith.constant 0 : index
    %c0_31 = arith.constant 0 : index
    %34 = vector.load %arg5[%c0_30, %c0_31] : memref<1x128xf32, #tpu.memory_space<vmem>>, vector<1x128xf32>
    %35 = vector.broadcast %34 : vector<1x128xf32> to vector<256x128xf32>
    %36 = arith.addf %33, %35 : vector<256x128xf32>
    %37 = vector.shape_cast %36 : vector<256x128xf32> to vector<32x8x128xf32>
    %cst_32 = arith.constant dense<0.000000e+00> : vector<32x128xf32>
    %38 = vector.multi_reduction <add>, %37, %cst_32 [1] : vector<32x8x128xf32> to vector<32x128xf32>
    %c0_33 = arith.constant 0 : index
    %c0_34 = arith.constant 0 : index
    %39 = vector.load %arg6[%c0_33, %c0_34] : memref<128x2xf32, #tpu.memory_space<vmem>>, vector<128x2xf32>
    %cst_35 = arith.constant dense<0.000000e+00> : vector<32x2xf32>
    %40 = tpu.matmul %38, %39, %cst_35 {dimension_numbers = #tpu.dot_dimension_numbers<[1], [0], [0], [1], [0, 0, 1, 1], [], []>} : vector<32x128xf32>, vector<128x2xf32>, vector<32x2xf32> -> vector<32x2xf32>
    %c0_36 = arith.constant 0 : index
    %c0_37 = arith.constant 0 : index
    %41 = vector.load %arg7[%c0_36, %c0_37] : memref<1x2xf32, #tpu.memory_space<vmem>>, vector<1x2xf32>
    %42 = vector.broadcast %41 : vector<1x2xf32> to vector<32x2xf32>
    %43 = arith.addf %40, %42 : vector<32x2xf32>
    %cst_38 = arith.constant 0.000000e+00 : f32
    %44 = vector.broadcast %cst_38 : f32 to vector<32x2xf32>
    %45 = arith.maximumf %43, %44 : vector<32x2xf32>
    %46 = vector.shape_cast %45 : vector<32x2xf32> to vector<32x2x1xf32>
    %c0_39 = arith.constant 0 : index
    %c0_40 = arith.constant 0 : index
    %47 = vector.load %arg8[%c0_39, %c0_40] : memref<2x128xf32, #tpu.memory_space<vmem>>, vector<2x128xf32>
    %48 = vector.shape_cast %47 : vector<2x128xf32> to vector<1x2x128xf32>
    %49 = vector.broadcast %46 : vector<32x2x1xf32> to vector<32x2x128xf32>
    %50 = vector.broadcast %48 : vector<1x2x128xf32> to vector<32x2x128xf32>
    %51 = arith.mulf %49, %50 : vector<32x2x128xf32>
    %cst_41 = arith.constant dense<0.000000e+00> : vector<32x128xf32>
    %52 = vector.multi_reduction <add>, %51, %cst_41 [1] : vector<32x2x128xf32> to vector<32x128xf32>
    %c0_42 = arith.constant 0 : index
    %c0_43 = arith.constant 0 : index
    %53 = vector.load %arg9[%c0_42, %c0_43] : memref<1x128xf32, #tpu.memory_space<vmem>>, vector<1x128xf32>
    %54 = vector.broadcast %53 : vector<1x128xf32> to vector<32x128xf32>
    %55 = arith.addf %52, %54 : vector<32x128xf32>
    %56 = arith.negf %55 : vector<32x128xf32>
    %57 = math.exp %56 : vector<32x128xf32>
    %cst_44 = arith.constant 1.000000e+00 : f32
    %58 = vector.broadcast %cst_44 : f32 to vector<32x128xf32>
    %59 = arith.addf %58, %57 : vector<32x128xf32>
    %60 = arith.divf %58, %59 : vector<32x128xf32>
    %61 = vector.shape_cast %60 : vector<32x128xf32> to vector<32x1x128xf32>
    %62 = vector.broadcast %61 : vector<32x1x128xf32> to vector<32x8x128xf32>
    %63 = arith.mulf %37, %62 : vector<32x8x128xf32>
    %64 = vector.shape_cast %7 : vector<256x128xf32> to vector<32x8x128xf32>
    %65 = arith.addf %63, %64 : vector<32x8x128xf32>
    %c0_45 = arith.constant 0 : index
    %c0_46 = arith.constant 0 : index
    %66 = vector.load %arg10[%c0_45, %c0_46] : memref<1x128xf32, #tpu.memory_space<vmem>>, vector<1x128xf32>
    %67 = vector.shape_cast %66 : vector<1x128xf32> to vector<1x1x128xf32>
    %68 = vector.broadcast %67 : vector<1x1x128xf32> to vector<32x8x128xf32>
    %69 = arith.mulf %65, %68 : vector<32x8x128xf32>
    %c0_47 = arith.constant 0 : index
    %c0_48 = arith.constant 0 : index
    %70 = vector.load %arg11[%c0_47, %c0_48] : memref<1x128xf32, #tpu.memory_space<vmem>>, vector<1x128xf32>
    %71 = vector.shape_cast %70 : vector<1x128xf32> to vector<1x1x128xf32>
    %72 = vector.broadcast %71 : vector<1x1x128xf32> to vector<32x8x128xf32>
    %73 = arith.addf %69, %72 : vector<32x8x128xf32>
    %cst_49 = arith.constant 0.000000e+00 : f32
    %74 = vector.broadcast %cst_49 : f32 to vector<32x8x128xf32>
    %75 = arith.maximumf %73, %74 : vector<32x8x128xf32>
    %c0_50 = arith.constant 0 : index
    %c0_51 = arith.constant 0 : index
    %c0_52 = arith.constant 0 : index
    %76 = vector.load %arg12[%c0_50, %c0_51, %c0_52] : memref<32x8x128xf32, #tpu.memory_space<vmem>>, vector<32x8x128xf32>
    tpu.vector_store %arg12[%c0_50, %c0_51, %c0_52], %75 {strides = array<i32>} : memref<32x8x128xf32, #tpu.memory_space<vmem>>, vector<32x8x128xf32>,
    return
  }
  func.func @transform_0(%arg0: i32) -> (i32, i32, i32) {
    %c0_i32 = arith.constant 0 : i32
    %c0_i32_0 = arith.constant 0 : i32
    %c0_i32_1 = arith.constant 0 : i32
    return %arg0, %c0_i32, %c0_i32_0 : i32, i32, i32
  }
  func.func @transform_1(%arg0: i32) -> (i32, i32) {
    %c0_i32 = arith.constant 0 : i32
    %c0_i32_0 = arith.constant 0 : i32
    %c0_i32_1 = arith.constant 0 : i32
    return %c0_i32, %c0_i32_0 : i32, i32
  }
  func.func @transform_2(%arg0: i32) -> (i32, i32) {
    %c0_i32 = arith.constant 0 : i32
    %c0_i32_0 = arith.constant 0 : i32
    %c0_i32_1 = arith.constant 0 : i32
    return %c0_i32, %c0_i32_0 : i32, i32
  }
  func.func @transform_3(%arg0: i32) -> (i32, i32) {
    %c0_i32 = arith.constant 0 : i32
    %c0_i32_0 = arith.constant 0 : i32
    %c0_i32_1 = arith.constant 0 : i32
    return %c0_i32, %c0_i32_0 : i32, i32
  }
  func.func @transform_4(%arg0: i32) -> (i32, i32) {
    %c0_i32 = arith.constant 0 : i32
    %c0_i32_0 = arith.constant 0 : i32
    %c0_i32_1 = arith.constant 0 : i32
    return %c0_i32, %c0_i32_0 : i32, i32
  }
  func.func @transform_5(%arg0: i32) -> (i32, i32) {
    %c0_i32 = arith.constant 0 : i32
    %c0_i32_0 = arith.constant 0 : i32
    %c0_i32_1 = arith.constant 0 : i32
    return %c0_i32, %c0_i32_0 : i32, i32
  }
  func.func @transform_6(%arg0: i32) -> (i32, i32) {
    %c0_i32 = arith.constant 0 : i32
    %c0_i32_0 = arith.constant 0 : i32
    %c0_i32_1 = arith.constant 0 : i32
    return %c0_i32, %c0_i32_0 : i32, i32
  }
  func.func @transform_7(%arg0: i32) -> (i32, i32) {
    %c0_i32 = arith.constant 0 : i32
    %c0_i32_0 = arith.constant 0 : i32
    %c0_i32_1 = arith.constant 0 : i32
    return %c0_i32, %c0_i32_0 : i32, i32
  }
  func.func @transform_8(%arg0: i32) -> (i32, i32) {
    %c0_i32 = arith.constant 0 : i32
    %c0_i32_0 = arith.constant 0 : i32
    %c0_i32_1 = arith.constant 0 : i32
    return %c0_i32, %c0_i32_0 : i32, i32
  }
  func.func @transform_9(%arg0: i32) -> (i32, i32) {
    %c0_i32 = arith.constant 0 : i32
    %c0_i32_0 = arith.constant 0 : i32
    %c0_i32_1 = arith.constant 0 : i32
    return %c0_i32, %c0_i32_0 : i32, i32
  }
  func.func @transform_10(%arg0: i32) -> (i32, i32) {
    %c0_i32 = arith.constant 0 : i32
    %c0_i32_0 = arith.constant 0 : i32
    %c0_i32_1 = arith.constant 0 : i32
    return %c0_i32, %c0_i32_0 : i32, i32
  }
  func.func @transform_11(%arg0: i32) -> (i32, i32, i32) {
    %c0_i32 = arith.constant 0 : i32
    %c0_i32_0 = arith.constant 0 : i32
    %c0_i32_1 = arith.constant 0 : i32
    return %arg0, %c0_i32, %c0_i32_0 : i32, i32, i32
  }
}

</mosaic_0001>

<bundles_post_ra>
// kernel: tpu_custom_call.1
= control target key start
LH: loop header
LB: loop body
LE: loop exit
PB: predicated region body
PF: predicated region fallthrough
CT: control target
= control target key end

     0   :  { %16 = vsyncpa [#allocation4], 0  ;;  %s6747_s0 = inlined_call_operand.vmem [shape: bf16[64,8,128], index: 0, kind: input, shape index: {}]   ;;  %s6748_s1 = inlined_call_operand.vmem [shape: bf16[128,192], index: 1, kind: input, shape index: {}]   ;;  %s6749_s2 = inlined_call_operand.vmem [shape: f32[1,192], index: 2, kind: input, shape index: {}]   ;;  %s6750_s3 = inlined_call_operand.vmem [shape: bf16[192,128], index: 3, kind: input, shape index: {}]   ;;  %s6751_s4 = inlined_call_operand.vmem [shape: f32[1,128], index: 4, kind: input, shape index: {}]   ;;  %s6752_s5 = inlined_call_operand.vmem [shape: f32[128,2], index: 5, kind: input, shape index: {}]   ;;  %s6753_s6 = inlined_call_operand.vmem [shape: f32[1,2], index: 6, kind: input, shape index: {}]   ;;  %s6754_s7 = inlined_call_operand.vmem [shape: f32[2,128], index: 7, kind: input, shape index: {}]   ;;  %s6755_s8 = inlined_call_operand.vmem [shape: f32[1,128], index: 8, kind: input, shape index: {}]   ;;  %s6756_s9 = inlined_call_operand.vmem [shape: f32[1,128], index: 9, kind: input, shape index: {}]   ;;  %s6757_s10 = inlined_call_operand.vmem [shape: f32[1,128], index: 10, kind: input, shape index: {}]   ;;  %s6758_s11 = inlined_call_operand.hbm [shape: f32[64,8,128], index: 11, kind: output, shape index: {}]  }
   0x1   :  { %18 = vsyncpa [#allocation4 + $0x1], 0  ;;  %s4901_s17 = smov 0   ;;  %s4903_s18 = smov 0  }
   0x2   :  { %s4905_s19 = smov 0   ;;  %s4907_s20 = smov 0  }
   0x3 LB: > { %6777 = sst [smem:[#allocation6_spill]] %s4828_s19  ;;  %s4922_s21 = sadd.s32 4294967295, %s4832_s20   ;;  %s4832_s20 = sphi %s4907_s20, %s6862_s20   ;;  %s4828_s19 = sphi %s4905_s19, %s6861_s19   ;;  %s4824_s18 = sphi %s4903_s18, %s6860_s18   ;;  %s4820_s17 = sphi %s4901_s17, %s6859_s17  }
   0x4   : > { %s4164_s22 = sadd.s32 4294967294, %s4832_s20   ;;  %s4926_s23 = sadd.s32 1, %s4832_s20  }
   0x5   : > { %s267_s24 = sadd.s32 1, %s4828_s19  ;;  %s264_s25 = ssub.s32 %s4832_s20, %s4926_s23 }
   0x6   : > { %p277_p0 = scmp.ne.s32.totalorder %s4828_s19, %s4824_s18  ;;  %p265_p1 = scmp.eq.s32.totalorder %s264_s25, 0 }
   0x7   : > { %p278_p2 = scmp.eq.s32.totalorder %s4922_s21, 1  ;;  %p283_p3 = scmp.ne.s32.totalorder %s4824_s18, %s4820_s17 }
   0x8   : > { %p284_p4 = scmp.eq.s32.totalorder %s4164_s22, 1  ;;  %p4167_p7 = scmp.ge.s32.totalorder %s4832_s20, 1 }
   0x9   : > { %s4937_s26 = scalar_select %p265_p1, %s4828_s19, %s267_s24  }
   0xa   : > { %p4939_p5 = por %p278_p2, %p277_p0  ;;  %p4943_p6 = por %p284_p4, %p283_p3 }
   0xb   : > { %6778 = sst [smem:[#allocation7_spill]] %s4937_s26  ;;  %p341_p8 = scmp.lt.s32.totalorder %s4832_s20, 3 }
   0xd   : > { %p342_p9 = pnand %p4167_p7, %p341_p8 }
   0xf   : > { %345 = sbr.rel (%p342_p9) target bundleno = 1287 (0x507), region = 64 }
  0x16   : > { %v4537_v0 = vld [vmem:[%s6748_s1 + $0x4] ss:$8 sps:$4 sm:$0xff]   ;;  %s4169_s12 = sshll.u32 %s4922_s21, 5  ;;  %v4539_v1 = vld [vmem:[%s6748_s1] ss:$8 sps:$4 sm:$0xff]   ;;  %v4834_v2 = vmov 0   ;;  %v439_v37 = vlaneseq }
  0x17   : > { %657 = vmatprep.mubr.bf16.mxu0 %v4834_v2  ;;  %p382_p10 = scmp.lt.s32.totalorder %s4169_s12, 63  ;;  %2506 = vmatprep.subr.bf16.mxu1 %v4834_v2  ;;  %v4540_v3 = vld [vmem:[%s6748_s1 + $0x14] ss:$8 sps:$4 sm:$0xff]   ;;  %v4542_v4 = vld [vmem:[%s6748_s1 + $0x10] ss:$8 sps:$4 sm:$0xff]   ;;  %vm978_vm0 = vcmask 1040384  }
  0x18   : > { %625 = vmatprep.subr.bf16.mxu0 %v4537_v0  ;;  %v4543_v5 = vld [vmem:[%s6748_s1 + $0x24] ss:$8 sps:$4 sm:$0xff]   ;;  %v4545_v6 = vld [vmem:[%s6748_s1 + $0x20] ss:$8 sps:$4 sm:$0xff]   ;;  %v4546_v7 = vld [vmem:[%s6748_s1 + $0x34] ss:$8 sps:$4 sm:$0xff]  }
  0x19   : > { %626 = vmatpush1.bf16.msra.mxu0 %v4539_v1  ;;  %s6864_s12 = smov (!%p382_p10, %s4169_s12), 63  ;;  %v4548_v8 = vld [vmem:[%s6748_s1 + $0x30] ss:$8 sps:$4 sm:$0xff]   ;;  %v4549_v9 = vld [vmem:[%s6748_s1 + $0x44] ss:$8 sps:$4 sm:$0xff]   ;;  %vm979_vm1 = vcmask 520196  }
  0x1a   : > { %627 = vmatprep.subr.bf16.mxu0 %v4540_v3  ;;  %s4170_s30 = sshll.u32 %s6864_s12, 2  ;;  %v4551_v10 = vld [vmem:[%s6748_s1 + $0x40] ss:$8 sps:$4 sm:$0xff]   ;;  %v4552_v11 = vld [vmem:[%s6748_s1 + $0x54] ss:$8 sps:$4 sm:$0xff]   ;;  %vm1013_vm2 = vcmask 1043459   ;;  %vm5032_vm4 = vmor %vm979_vm1, %vm978_vm0 }
  0x1b   : > { %s4976_s24 = scalar_lea.vmem %s6747_s0, %s4170_s30  ;;  %v4554_v12 = vld [vmem:[%s6748_s1 + $0x50] ss:$8 sps:$4 sm:$0xff]   ;;  %v4555_v13 = vld [vmem:[%s6748_s1 + $0x64] ss:$8 sps:$4 sm:$0xff]   ;;  %v4557_v14 = vld [vmem:[%s6748_s1 + $0x60] ss:$8 sps:$4 sm:$0xff]  }
  0x1c   : > { %v4558_v15 = vld [vmem:[%s6748_s1 + $0x74] ss:$8 sps:$4 sm:$0xff]   ;;  %v4560_v16 = vld [vmem:[%s6748_s1 + $0x70] ss:$8 sps:$4 sm:$0xff]   ;;  %v4561_v17 = vld [vmem:[%s4976_s24] sm:$0xff]   ;;  %vm1014_vm3 = vcmask 523271  }
  0x1d   : > { %628 = vmatpush1.bf16.msra.mxu0 %v4542_v4  ;;  %v4562_v18 = vld [vmem:[%s4976_s24 + $0x8] sm:$0xff]   ;;  %v4563_v19 = vld [vmem:[%s4976_s24 + $0x10] sm:$0xff]   ;;  %v4564_v20 = vld [vmem:[%s4976_s24 + $0x18] sm:$0xff]   ;;  %981 = vst.msk [vmem:[#allocation2] sm:$0x11] %vm5032_vm4, %v4834_v2  ;;  %v5252_v39 = vshrl.u32 %v439_v37, 7 }
  0x1e   : > { %629 = vmatprep.subr.bf16.mxu0 %v4543_v5  ;;  %v4565_v21 = vld [vmem:[%s4976_s24 + $0x20] sm:$0xff]   ;;  %v4566_v22 = vld [vmem:[%s4976_s24 + $0x28] sm:$0xff]   ;;  %v4567_v23 = vld [vmem:[%s4976_s24 + $0x30] sm:$0xff]   ;;  %982 = vst.msk [vmem:[#allocation2 + $0x8] sm:$0x11] %vm5032_vm4, %v4834_v2  ;;  %vm1112_vm6 = vcmask 257025  }
  0x1f   : > { %v4568_v24 = vld [vmem:[%s4976_s24 + $0x38] sm:$0xff]   ;;  %v4569_v25 = vld [vmem:[%s4976_s24 + $0x40] sm:$0xff]   ;;  %v4570_v26 = vld [vmem:[%s4976_s24 + $0x48] sm:$0xff]   ;;  %983 = vst.msk [vmem:[#allocation2 + $0x10] sm:$0x11] %vm5032_vm4, %v4834_v2  ;;  %v5259_v41 = vsub.s32 1, %v5252_v39 }
  0x20   : > { %v4571_v27 = vld [vmem:[%s4976_s24 + $0x50] sm:$0xff]   ;;  %v4572_v28 = vld [vmem:[%s4976_s24 + $0x58] sm:$0xff]   ;;  %v5030_v29 = vld [vmem:[%s4976_s24 + $0x60] sm:$0xff]   ;;  %984 = vst.msk [vmem:[#allocation2 + $0x18] sm:$0x11] %vm5032_vm4, %v4834_v2  ;;  %vm2112_vm7 = vcmask 256000  }
  0x21   : > { %630 = vmatpush1.bf16.msra.mxu0 %v4545_v6  ;;  %vm5040_vm5 = vmor %vm1014_vm3, %vm1013_vm2  ;;  %985 = vst.msk [vmem:[#allocation2 + $0x20] sm:$0x11] %vm5032_vm4, %v4834_v2  ;;  %v4574_v32 = vld [vmem:[%s4976_s24 + $0x68] sm:$0xff]   ;;  %v4575_v33 = vld [vmem:[%s4976_s24 + $0x70] sm:$0xff]   ;;  %vm1465_vm8 = vcmask 519424   ;;  %s4836_s13 = smov 32  }
  0x22   : > { %631 = vmatprep.subr.bf16.mxu0 %v4546_v7  ;;  %986 = vst.msk [vmem:[#allocation2 + $0x28] sm:$0x11] %vm5032_vm4, %v4834_v2  ;;  %987 = vst.msk [vmem:[#allocation2 + $0x30] sm:$0x11] %vm5032_vm4, %v4834_v2  ;;  %v4576_v34 = vld [vmem:[%s4976_s24 + $0x78] sm:$0xff]   ;;  %v4577_v35 = vld [vmem:[%s6750_s3] sm:$0xff]  }
  0x23   : > { %988 = vst.msk [vmem:[#allocation2 + $0x38] sm:$0x11] %vm5032_vm4, %v4834_v2  ;;  %989 = vst.msk [vmem:[#allocation2 + $0x40] sm:$0x11] %vm5032_vm4, %v4834_v2  ;;  %2507 = vmatpush1.bf16.msra.mxu1 %v4577_v35  ;;  %v4578_v36 = vld [vmem:[%s6750_s3 + $0x8] sm:$0xff]   ;;  %v4579_v38 = vld [vmem:[%s6750_s3 + $0x10] sm:$0xff]  }
  0x24   : > { %990 = vst.msk [vmem:[#allocation2 + $0x48] sm:$0x11] %vm5032_vm4, %v4834_v2  ;;  %991 = vst.msk [vmem:[#allocation2 + $0x50] sm:$0x11] %vm5032_vm4, %v4834_v2  ;;  %2508 = vmatprep.subr.bf16.mxu1 %v4834_v2  ;;  %v4580_v40 = vld [vmem:[%s6750_s3 + $0x18] sm:$0xff]   ;;  %v4581_v42 = vld [vmem:[%s6750_s3 + $0x20] sm:$0xff]  }
  0x25   : > { %632 = vmatpush1.bf16.msra.mxu0 %v4548_v8  ;;  %992 = vst.msk [vmem:[#allocation2 + $0x58] sm:$0x11] %vm5032_vm4, %v4834_v2  ;;  %993 = vst.msk [vmem:[#allocation2 + $0x60] sm:$0x11] %vm5032_vm4, %v4834_v2  ;;  %v437_v43 = vld [vmem:[%s6749_s2] sm:$0x3] }
  0x26   : > { %633 = vmatprep.subr.bf16.mxu0 %v4549_v9  ;;  %994 = vst.msk [vmem:[#allocation2 + $0x68] sm:$0x11] %vm5032_vm4, %v4834_v2  ;;  %995 = vst.msk [vmem:[#allocation2 + $0x70] sm:$0x11] %vm5032_vm4, %v4834_v2  ;;  %v5269_v44 = vrot.slane %v437_v43, %v5259_v41  ;;  %v4582_v45 = vld [vmem:[%s6750_s3 + $0x28] sm:$0xff]   ;;  %v4583_v50 = vld [vmem:[%s6750_s3 + $0x30] sm:$0xff]  }
  0x27   : > { %996 = vst.msk [vmem:[#allocation2 + $0x78] sm:$0x11] %vm5032_vm4, %v4834_v2  ;;  %997 = vst.msk [vmem:[#allocation2 + $0x80] sm:$0x11] %vm5032_vm4, %v4834_v2  ;;  %2509 = vmatpush1.bf16.msra.mxu1 %v4578_v36  ;;  %v4584_v56 = vld [vmem:[%s6750_s3 + $0x38] sm:$0xff]   ;;  %s4835_s24 = smov 64  }
  0x28   : > { %998 = vst.msk [vmem:[#allocation2 + $0x88] sm:$0x11] %vm5032_vm4, %v4834_v2  ;;  %999 = vst.msk [vmem:[#allocation2 + $0x90] sm:$0x11] %vm5032_vm4, %v4834_v2  ;;  %2510 = vmatprep.subr.bf16.mxu1 %v4834_v2  ;;  %v4587_v36 = vld [vmem:[%s6750_s3 + $0x50] sm:$0xff]   ;;  %s4837_s15 = smov 96  }
  0x29   : > { %634 = vmatpush1.bf16.msra.mxu0 %v4551_v10  ;;  %1000 = vst.msk [vmem:[#allocation2 + $0x98] sm:$0x11] %vm5032_vm4, %v4834_v2  ;;  %1001 = vst.msk [vmem:[#allocation2 + $0xa0] sm:$0x11] %vm5032_vm4, %v4834_v2  ;;  %vm1466_vm9 = vsmask.f32 7938 }
  0x2a   : > { %635 = vmatprep.subr.bf16.mxu0 %v4552_v11  ;;  %1002 = vst.msk [vmem:[#allocation2 + $0xa8] sm:$0x11] %vm5032_vm4, %v4834_v2  ;;  %1003 = vst.msk [vmem:[#allocation2 + $0xb0] sm:$0x11] %vm5032_vm4, %v4834_v2  ;;  %vm1660_vm11 = vcmask 781824   ;;  %vm1917_vm12 = vcmask 1044224  }
  0x2b   : > { %1004 = vst.msk [vmem:[#allocation2 + $0xb8] sm:$0x11] %vm5032_vm4, %v4834_v2  ;;  %1005 = vst.msk [vmem:[#allocation2 + $0xc0] sm:$0x11] %vm5032_vm4, %v4834_v2  ;;  %2511 = vmatpush1.bf16.msra.mxu1 %v4579_v38  ;;  %vm1918_vm13 = vsmask.f32 3328 }
  0x2c   : > { %1006 = vst.msk [vmem:[#allocation2 + $0xc8] sm:$0x11] %vm5032_vm4, %v4834_v2  ;;  %1007 = vst.msk [vmem:[#allocation2 + $0xd0] sm:$0x11] %vm5032_vm4, %v4834_v2  ;;  %2512 = vmatprep.subr.bf16.mxu1 %v4834_v2  ;;  %vm2457_vm15 = vcmask 523264   ;;  %vm2914_vm0 = vcmask 1041409  }
  0x2d   : > { %636 = vmatpush1.bf16.msra.mxu0 %v4554_v12  ;;  %1008 = vst.msk [vmem:[#allocation2 + $0xd8] sm:$0x11] %vm5032_vm4, %v4834_v2  ;;  %1009 = vst.msk [vmem:[#allocation2 + $0xe0] sm:$0x11] %vm5032_vm4, %v4834_v2  ;;  %v4585_v12 = vld [vmem:[%s6750_s3 + $0x40] sm:$0xff]   ;;  %vm2916_vm1 = vcmask 1042434  }
  0x2e   : > { %637 = vmatprep.subr.bf16.mxu0 %v4555_v13  ;;  %1010 = vst.msk [vmem:[#allocation2 + $0xe8] sm:$0x11] %vm5032_vm4, %v4834_v2  ;;  %1011 = vst.msk [vmem:[#allocation2 + $0xf0] sm:$0x11] %vm5032_vm4, %v4834_v2  ;;  %vm2919_vm3 = vcmask 1044484   ;;  %s378_s19 = sand.u32 1, %s4824_s18  }
  0x2f   : > { %1012 = vst.msk [vmem:[#allocation2 + $0xf8] sm:$0x11] %vm5032_vm4, %v4834_v2  ;;  %2513 = vmatpush1.bf16.msra.mxu1 %v4580_v40  ;;  %vm5722_vm10 = vmand %vm1465_vm8, %vm1466_vm9  ;;  %vm2921_vm4 = vcmask 1045509   ;;  %s4168_s22 = sshll.u32 %s378_s19, 8  ;;  %s4401_s16 = sshll.u32 %s4922_s21, 12 }
  0x30   : > { %1016 = vst.msk [vmem:[#allocation2] sm:$0x88] %vm5040_vm5, %v4834_v2  ;;  %1017 = vst.msk [vmem:[#allocation2 + $0x8] sm:$0x88] %vm5040_vm5, %v4834_v2  ;;  %2514 = vmatprep.subr.bf16.mxu1 %v4834_v2  ;;  %s6416_s25 = scalar_lea.vmem [#allocation3], %s4168_s22  ;;  %s6699_s29 = scalar_lea.hbm %s6758_s11, %s4401_s16 }
  0x31   : > { %638 = vmatpush1.bf16.msra.mxu0 %v4557_v14  ;;  %1018 = vst.msk [vmem:[#allocation2 + $0x10] sm:$0x88] %vm5040_vm5, %v4834_v2  ;;  %1019 = vst.msk [vmem:[#allocation2 + $0x18] sm:$0x88] %vm5040_vm5, %v4834_v2  ;;  %s4102_s22 = sshll.u32 %s6416_s25, 4  ;;  %s4838_s21 = smov [#allocation3]   ;;  %s6701_s22 = int_to_ptr.vmem [resolvable:$true] %s4102_s22 }
  0x32   : > { %639 = vmatprep.subr.bf16.mxu0 %v4558_v15  ;;  %1020 = vst.msk [vmem:[#allocation2 + $0x20] sm:$0x88] %vm5040_vm5, %v4834_v2  ;;  %1021 = vst.msk [vmem:[#allocation2 + $0x28] sm:$0x88] %vm5040_vm5, %v4834_v2  ;;  %s4770_s14 = scalar_lea.vmem %s6701_s22, 4096  ;;  %s4774_s26 = sshll.u32 %s4838_s21, 4  ;;  %s4775_s26 = int_to_ptr.vmem [resolvable:$false] %s4774_s26 }
  0x33   : > { %1022 = vst.msk [vmem:[#allocation2 + $0x30] sm:$0x88] %vm5040_vm5, %v4834_v2  ;;  %1023 = vst.msk [vmem:[#allocation2 + $0x38] sm:$0x88] %vm5040_vm5, %v4834_v2  ;;  %2515 = vmatpush1.bf16.msra.mxu1 %v4581_v42  ;;  %p4771_p11 = scmp.ne.s32.totalorder %s6701_s22, %s4770_s14  ;;  %s4776_s30 = scalar_lea.vmem %s4775_s26, 8192 }
  0x34   : > { %1024 = vst.msk [vmem:[#allocation2 + $0x40] sm:$0x88] %vm5040_vm5, %v4834_v2  ;;  %1025 = vst.msk [vmem:[#allocation2 + $0x48] sm:$0x88] %vm5040_vm5, %v4834_v2  ;;  %2516 = vmatprep.subr.bf16.mxu1 %v4834_v2  ;;  %p4777_p0 = scmp.lt.s32.totalorder %s6701_s22, %s4775_s26  ;;  %p4778_p1 = scmp.lt.s32.totalorder %s4776_s30, %s4770_s14 }
  0x35   : > { %640 = vmatpush1.bf16.msra.mxu0 %v4560_v16  ;;  %1026 = vst.msk [vmem:[#allocation2 + $0x50] sm:$0x88] %vm5040_vm5, %v4834_v2  ;;  %1027 = vst.msk [vmem:[#allocation2 + $0x58] sm:$0x88] %vm5040_vm5, %v4834_v2  ;;  %p4772_p12 = pnand %p4771_p11, %p4939_p5 }
  0x36   : > { %1028 = vst.msk [vmem:[#allocation2 + $0x60] sm:$0x88] %vm5040_vm5, %v4834_v2  ;;  %1029 = vst.msk [vmem:[#allocation2 + $0x68] sm:$0x88] %vm5040_vm5, %v4834_v2  ;;  %p4779_p2 = por %p4778_p1, %p4777_p0 }
  0x37   : > { %1030 = vst.msk [vmem:[#allocation2 + $0x70] sm:$0x88] %vm5040_vm5, %v4834_v2  ;;  %1031 = vst.msk [vmem:[#allocation2 + $0x78] sm:$0x88] %vm5040_vm5, %v4834_v2  ;;  %2517 = vmatpush1.bf16.msra.mxu1 %v4582_v45  ;;  %p4773_p13 = pneg %p4772_p12 }
  0x38   : > { %658 = vmatmul.mubr.bf16.vlgmr.msra.gmra.mrb[0].mxu0 %v4561_v17  ;;  %1032 = vst.msk [vmem:[#allocation2 + $0x80] sm:$0x88] %vm5040_vm5, %v4834_v2  ;;  %1033 = vst.msk [vmem:[#allocation2 + $0x88] sm:$0x88] %vm5040_vm5, %v4834_v2  ;;  %2518 = vmatprep.subr.bf16.mxu1 %v4834_v2 }
  0x39   : > { %667 = vmatprep.mubr.bf16.mxu0 %v4834_v2  ;;  %1034 = vst.msk [vmem:[#allocation2 + $0x90] sm:$0x88] %vm5040_vm5, %v4834_v2  ;;  %1035 = vst.msk [vmem:[#allocation2 + $0x98] sm:$0x88] %vm5040_vm5, %v4834_v2  ;;  %p4780_p3 = pnand %p4779_p2, %p4773_p13 }
  0x3a   : > { %1036 = vst.msk [vmem:[#allocation2 + $0xa0] sm:$0x88] %vm5040_vm5, %v4834_v2  ;;  %1037 = vst.msk [vmem:[#allocation2 + $0xa8] sm:$0x88] %vm5040_vm5, %v4834_v2 }
  0x3b   : > { %1038 = vst.msk [vmem:[#allocation2 + $0xb0] sm:$0x88] %vm5040_vm5, %v4834_v2  ;;  %1039 = vst.msk [vmem:[#allocation2 + $0xb8] sm:$0x88] %vm5040_vm5, %v4834_v2  ;;  %2519 = vmatpush1.bf16.msra.mxu1 %v4583_v50 }
  0x3c   : > { %1040 = vst.msk [vmem:[#allocation2 + $0xc0] sm:$0x88] %vm5040_vm5, %v4834_v2  ;;  %1041 = vst.msk [vmem:[#allocation2 + $0xc8] sm:$0x88] %vm5040_vm5, %v4834_v2  ;;  %2520 = vmatprep.subr.bf16.mxu1 %v4834_v2 }
  0x3d   : > { %1042 = vst.msk [vmem:[#allocation2 + $0xd0] sm:$0x88] %vm5040_vm5, %v4834_v2  ;;  %1043 = vst.msk [vmem:[#allocation2 + $0xd8] sm:$0x88] %vm5040_vm5, %v4834_v2 }
  0x3e   : > { %1044 = vst.msk [vmem:[#allocation2 + $0xe0] sm:$0x88] %vm5040_vm5, %v4834_v2  ;;  %1045 = vst.msk [vmem:[#allocation2 + $0xe8] sm:$0x88] %vm5040_vm5, %v4834_v2 }
  0x3f   : > { %1046 = vst.msk [vmem:[#allocation2 + $0xf0] sm:$0x88] %vm5040_vm5, %v4834_v2  ;;  %1047 = vst.msk [vmem:[#allocation2 + $0xf8] sm:$0x88] %vm5040_vm5, %v4834_v2  ;;  %2521 = vmatpush1.bf16.msra.mxu1 %v4584_v56  ;;  %vm2923_vm5 = vcmask 1046534  }
  0x40   : > { %668 = vmatmul.mubr.bf16.gmra.mrb[4].mxu0 %v4562_v18  ;;  %2522 = vmatprep.subr.bf16.mxu1 %v4834_v2  ;;  %vm5760_vm14 = vmand %vm1917_vm12, %vm1918_vm13 }
  0x41   : > { %677 = vmatprep.mubr.bf16.mxu0 %v4834_v2 }
  0x43   : > { %2523 = vmatpush1.bf16.msra.mxu1 %v4585_v12 }
  0x44   : > { %2524 = vmatprep.subr.bf16.mxu1 %v4834_v2 }
  0x48   : > { %678 = vmatmul.mubr.bf16.gmra.mrb[8].mxu0 %v4563_v19 }
  0x49   : > { %687 = vmatprep.mubr.bf16.mxu0 %v4834_v2 }
  0x50   : > { %688 = vmatmul.mubr.bf16.gmra.mrb[12].mxu0 %v4564_v20 }
  0x51   : > { %697 = vmatprep.mubr.bf16.mxu0 %v4834_v2 }
  0x58   : > { %698 = vmatmul.mubr.bf16.gmra.mrb[16].mxu0 %v4565_v21 }
  0x59   : > { %707 = vmatprep.mubr.bf16.mxu0 %v4834_v2 }
  0x60   : > { %708 = vmatmul.mubr.bf16.gmra.mrb[20].mxu0 %v4566_v22 }
  0x61   : > { %717 = vmatprep.mubr.bf16.mxu0 %v4834_v2 }
  0x68   : > { %718 = vmatmul.mubr.bf16.gmra.mrb[24].mxu0 %v4567_v23 }
  0x69   : > { %727 = vmatprep.mubr.bf16.mxu0 %v4834_v2 }
  0x70   : > { %728 = vmatmul.mubr.bf16.gmra.mrb[28].mxu0 %v4568_v24  ;;  %v4586_v24 = vld [vmem:[%s6750_s3 + $0x48] sm:$0xff]  }
  0x71   : > { %737 = vmatprep.mubr.bf16.mxu0 %v4834_v2  ;;  %2525 = vmatpush1.bf16.msra.mxu1 %v4586_v24 }
  0x72   : > { %2526 = vmatprep.subr.bf16.mxu1 %v4834_v2 }
  0x75   : > { %2527 = vmatpush1.bf16.msra.mxu1 %v4587_v36 }
  0x76   : > { %2528 = vmatprep.subr.bf16.mxu1 %v4834_v2 }
  0x78   : > { %738 = vmatmul.mubr.bf16.gmra.mrb[32].mxu0 %v4569_v25 }
  0x79   : > { %747 = vmatprep.mubr.bf16.mxu0 %v4834_v2 }
  0x80   : > { %748 = vmatmul.mubr.bf16.gmra.mrb[36].mxu0 %v4570_v26 }
  0x81   : > { %757 = vmatprep.mubr.bf16.mxu0 %v4834_v2 }
  0x88   : > { %758 = vmatmul.mubr.bf16.gmra.mrb[40].mxu0 %v4571_v27 }
  0x89   : > { %767 = vmatprep.mubr.bf16.mxu0 %v4834_v2 }
  0x90   : > { %768 = vmatmul.mubr.bf16.gmra.mrb[44].mxu0 %v4572_v28 }
  0x91   : > { %777 = vmatprep.mubr.bf16.mxu0 %v4834_v2 }
  0x98   : > { %778 = vmatmul.mubr.bf16.gmra.mrb[48].mxu0 %v5030_v29 }
  0x99   : > { %787 = vmatprep.mubr.bf16.mxu0 %v4834_v2 }
  0xa0   : > { %788 = vmatmul.mubr.bf16.gmra.mrb[52].mxu0 %v4574_v32 }
  0xa1   : > { %797 = vmatprep.mubr.bf16.mxu0 %v4834_v2 }
  0xa8   : > { %798 = vmatmul.mubr.bf16.gmra.mrb[56].mxu0 %v4575_v33 }
  0xa9   : > { %807 = vmatprep.mubr.bf16.mxu0 %v4834_v2 }
  0xb0   : > { %808 = vmatmul.mubr.bf16.gmra.mrb[60].mxu0 %v4576_v34 }
 0x10b   : > { %v5274_v46 = vpop.f32.mrb[0].mxu0 }
 0x10c   : > { %v661_v47 = vpop.f32.mrb[1].mxu0 }
 0x10d   : > { %v662_v48 = vadd.f32 %v661_v47, %v5269_v44  ;;  %v5278_v49 = vpop.f32.mrb[2].mxu0 }
 0x10e   : > { %v665_v51 = vpop.f32.mrb[3].mxu0 }
 0x10f   : > { %v818_v52 = vmax.f32 %v662_v48, 0.0  ;;  %v666_v53 = vadd.f32 %v665_v51, %v5269_v44 }
 0x111   : > { %v4369_v54 = vpack.c.bf16 %v818_v52, %v818_v52  ;;  %v819_v55 = vmax.f32 %v666_v53, 0.0 }
 0x113   : > { %v4370_v57 = vpack.c.bf16 %v819_v55, %v819_v55  ;;  %v5288_v58 = vpop.f32.mrb[4].mxu0  ;;  %1564 = vrot.lane.b32.xlu1 %v4369_v54, %s4835_s24  ;;  %v1146_v59 = vshrl.u32 %v4369_v54, 16  ;;  %v4235_v60 = vrot.slane %v4369_v54, 9  ;;  %v1048_v62 = vrot.slane %v4369_v54, 7 }
 0x114   : > { %v671_v61 = vpop.f32.mrb[5].mxu0  ;;  %v1149_v3 = vshll.u32 %v4369_v54, 16 }
 0x115   : > { %v672_v63 = vadd.f32 %v671_v61, %v5269_v44  ;;  %v5293_v0 = vpop.f32.mrb[6].mxu0  ;;  %v1148_v1 = vrot.slane %v1146_v59, 7  ;;  %v1153_v4 = vshrl.u32 %v4370_v57, 16  ;;  %2113 = vst.msk [vmem:[#allocation2 + $0x4] sm:$0x7] %vm2112_vm7, %v4235_v60  ;;  %v1156_v6 = vshll.u32 %v4370_v57, 16 }
 0x116   : > { %v675_v5 = vpop.f32.mrb[7].mxu0  ;;  %2146 = vst.msk [vmem:[#allocation2 + $0x4] sm:$0xf] %vm1465_vm8, %v4369_v54  ;;  %v1049_v7 = vrot.slane %v4370_v57, 7  ;;  %v4236_v15 = vrot.slane %v4370_v57, 9  ;;  %v1694_v18 = vrot.slane %v1149_v3, 5 }
 0x117   : > { %1113 = vst.msk [vmem:[#allocation2] sm:$0xe] %vm1112_vm6, %v1048_v62  ;;  %v820_v8 = vmax.f32 %v672_v63, 0.0  ;;  %v676_v9 = vadd.f32 %v675_v5, %v5269_v44  ;;  %1566 = vrot.lane.b32.xlu1 %v4370_v57, %s4835_s24  ;;  %v1151_v10 = vor.u32 %v1149_v3, %v1148_v1  ;;  %v1155_v11 = vrot.slane %v1153_v4, 7 }
 0x118   : > { %v1697_v13 = vrot.slane %v1153_v4, 4  ;;  %v1698_v14 = vrot.slane %v1156_v6, 5  ;;  %1114 = vst.msk [vmem:[#allocation2 + $0x8] sm:$0xe] %vm1112_vm6, %v1049_v7  ;;  %v1693_v20 = vrot.slane %v1146_v59, 4 }
 0x119   : > { %v5304_v16 = vpack.c.bf16 %v820_v8, %v820_v8  ;;  %v821_v17 = vmax.f32 %v676_v9, 0.0  ;;  %1369 = vrot.lane.b32.xlu0 %v1151_v10, %s4836_s13  ;;  %2114 = vst.msk [vmem:[#allocation2 + $0xc] sm:$0x7] %vm2112_vm7, %v4236_v15  ;;  %v1158_v23 = vor.u32 %v1156_v6, %v1155_v11 }
 0x11a   : > { %v1699_v19 = vor.u32 %v1698_v14, %v1697_v13  ;;  %2147 = vst.msk [vmem:[#allocation2 + $0xc] sm:$0xf] %vm1465_vm8, %v4370_v57  ;;  %v1695_v33 = vor.u32 %v1694_v18, %v1693_v20  ;;  %v4588_v57 = vld [vmem:[%s6750_s3 + $0x58] sm:$0xff]  }
 0x11b   : > { %v4372_v21 = vpack.c.bf16 %v821_v17, %v821_v17  ;;  %v5309_v22 = vpop.f32.mrb[8].mxu0  ;;  %v1050_v25 = vrot.slane %v5304_v16, 7  ;;  %v4237_v27 = vrot.slane %v5304_v16, 9  ;;  %v1160_v34 = vshrl.u32 %v5304_v16, 16  ;;  %2529 = vmatpush1.bf16.msra.mxu1 %v4588_v57 }
 0x11c   : > { %v681_v26 = vpop.f32.mrb[9].mxu0  ;;  %v1700_v32 = vrot.slane %v1699_v19, 4  ;;  %v1163_v48 = vshll.u32 %v5304_v16, 16  ;;  %v1696_v50 = vrot.slane %v1695_v33, 4 }
 0x11d   : > { %1570 = vrot.lane.b32.xlu1 %v4372_v21, %s4835_s24  ;;  %1371 = vrot.lane.b32.xlu0 %v1158_v23, %s4836_s13  ;;  %v682_v28 = vadd.f32 %v681_v26, %v5269_v44  ;;  %v5320_v29 = vpop.f32.mrb[10].mxu0  ;;  %v1167_v30 = vshrl.u32 %v4372_v21, 16  ;;  %1115 = vst.msk [vmem:[#allocation2 + $0x10] sm:$0xe] %vm1112_vm6, %v1050_v25  ;;  %v1051_v35 = vrot.slane %v4372_v21, 7  ;;  %v1170_v42 = vshll.u32 %v4372_v21, 16 }
 0x11e   : > { %v685_v31 = vpop.f32.mrb[11].mxu0  ;;  %2115 = vst.msk [vmem:[#allocation2 + $0x14] sm:$0x7] %vm2112_vm7, %v4237_v27  ;;  %v4238_v43 = vrot.slane %v4372_v21, 9  ;;  %v1162_v51 = vrot.slane %v1160_v34, 7  ;;  %v1701_v1 = vrot.slane %v1160_v34, 4 }
 0x11f   : > { %v822_v37 = vmax.f32 %v682_v28, 0.0  ;;  %v686_v38 = vadd.f32 %v685_v31, %v5269_v44  ;;  %v1169_v40 = vrot.slane %v1167_v30, 7  ;;  %2148 = vst.msk [vmem:[#allocation2 + $0x14] sm:$0xf] %vm1465_vm8, %v5304_v16  ;;  %v1705_v52 = vrot.slane %v1167_v30, 4 }
 0x120   : > { %1116 = vst.msk [vmem:[#allocation2 + $0x18] sm:$0xe] %vm1112_vm6, %v1051_v35  ;;  %v1706_v56 = vrot.slane %v1170_v42, 5  ;;  %v1702_v3 = vrot.slane %v1163_v48, 5  ;;  %v1165_v2 = vor.u32 %v1163_v48, %v1162_v51 }
 0x121   : > { %v5333_v45 = vpack.c.bf16 %v822_v37, %v822_v37  ;;  %v823_v47 = vmax.f32 %v686_v38, 0.0  ;;  %1823 = vrot.lane.b32.xlu1 %v1700_v32, %s4837_s15  ;;  %1568 = vrot.lane.b32.xlu0 %v5304_v16, %s4835_s24  ;;  %2116 = vst.msk [vmem:[#allocation2 + $0x1c] sm:$0x7] %vm2112_vm7, %v4238_v43  ;;  %v1172_v54 = vor.u32 %v1170_v42, %v1169_v40 }
 0x122   : > { %2149 = vst.msk [vmem:[#allocation2 + $0x1c] sm:$0xf] %vm1465_vm8, %v4372_v21  ;;  %v1707_v8 = vor.u32 %v1706_v56, %v1705_v52  ;;  %v1703_v13 = vor.u32 %v1702_v3, %v1701_v1 }
 0x123   : > { %v4374_v53 = vpack.c.bf16 %v823_v47, %v823_v47  ;;  %v5340_v55 = vpop.f32.mrb[12].mxu0  ;;  %v1052_v59 = vrot.slane %v5333_v45, 7  ;;  %v4239_v61 = vrot.slane %v5333_v45, 9  ;;  %v1174_v18 = vshrl.u32 %v5333_v45, 16 }
 0x124   : > { %6785 = vst [vmem:[#allocation8_spill] sm:$0xff] %v5340_v55  ;;  %v691_v60 = vpop.f32.mrb[13].mxu0  ;;  %v1708_v15 = vrot.slane %v1707_v8, 4  ;;  %v1704_v24 = vrot.slane %v1703_v13, 4  ;;  %v1177_v27 = vshll.u32 %v5333_v45, 16 }
 0x125   : > { %1375 = vrot.lane.b32.xlu1 %v1172_v54, %s4836_s13  ;;  %1821 = vrot.lane.b32.xlu0 %v1696_v50, %s4837_s15  ;;  %v692_v62 = vadd.f32 %v691_v60, %v5269_v44  ;;  %v5352_v63 = vpop.f32.mrb[14].mxu0  ;;  %1117 = vst.msk [vmem:[#allocation2 + $0x20] sm:$0xe] %vm1112_vm6, %v1052_v59  ;;  %v1053_v5 = vrot.slane %v4374_v53, 7  ;;  %v1181_v9 = vshrl.u32 %v4374_v53, 16  ;;  %v4240_v10 = vrot.slane %v4374_v53, 9 }
 0x126   : > { %v695_v4 = vpop.f32.mrb[15].mxu0  ;;  %2117 = vst.msk [vmem:[#allocation2 + $0x24] sm:$0x7] %vm2112_vm7, %v4239_v61  ;;  %v1184_v14 = vshll.u32 %v4374_v53, 16  ;;  %v1176_v34 = vrot.slane %v1174_v18, 7  ;;  %v1709_v43 = vrot.slane %v1174_v18, 4 }
 0x127   : > { %v824_v6 = vmax.f32 %v692_v62, 0.0  ;;  %v696_v7 = vadd.f32 %v695_v4, %v5269_v44  ;;  %2150 = vst.msk [vmem:[#allocation2 + $0x24] sm:$0xf] %vm1465_vm8, %v5333_v45  ;;  %v1183_v16 = vrot.slane %v1181_v9, 7  ;;  %v1713_v30 = vrot.slane %v1181_v9, 4 }
 0x128   : > { %1118 = vst.msk [vmem:[#allocation2 + $0x28] sm:$0xe] %vm1112_vm6, %v1053_v5  ;;  %v1714_v31 = vrot.slane %v1184_v14, 5  ;;  %v1179_v47 = vor.u32 %v1177_v27, %v1176_v34 }
 0x129   : > { %1574 = vrot.lane.b32.xlu1 %v4374_v53, %s4835_s24  ;;  %1373 = vrot.lane.b32.xlu0 %v1165_v2, %s4836_s13  ;;  %v5362_v11 = vpack.c.bf16 %v824_v6, %v824_v6  ;;  %v825_v12 = vmax.f32 %v696_v7, 0.0  ;;  %2118 = vst.msk [vmem:[#allocation2 + $0x2c] sm:$0x7] %vm2112_vm7, %v4240_v10  ;;  %v1186_v33 = vor.u32 %v1184_v14, %v1183_v16 }
 0x12a   : > { %2151 = vst.msk [vmem:[#allocation2 + $0x2c] sm:$0xf] %vm1465_vm8, %v4374_v53  ;;  %v1715_v42 = vor.u32 %v1714_v31, %v1713_v30 }
 0x12b   : > { %v5365_v17 = vpop.f32.mrb[16].mxu0  ;;  %v1054_v19 = vrot.slane %v5362_v11, 7  ;;  %v5370_v20 = vpack.c.bf16 %v825_v12, %v825_v12  ;;  %v4241_v23 = vrot.slane %v5362_v11, 9  ;;  %v1188_v61 = vshrl.u32 %v5362_v11, 16 }
 0x12c   : > { %v701_v21 = vpop.f32.mrb[17].mxu0  ;;  %v1716_v59 = vrot.slane %v1715_v42, 4  ;;  %v1191_v7 = vshll.u32 %v5362_v11, 16 }
 0x12d   : > { %1827 = vrot.lane.b32.xlu1 %v1708_v15, %s4837_s15  ;;  %1572 = vrot.lane.b32.xlu0 %v5333_v45, %s4835_s24  ;;  %v702_v25 = vadd.f32 %v701_v21, %v5269_v44  ;;  %v5377_v26 = vpop.f32.mrb[18].mxu0  ;;  %1119 = vst.msk [vmem:[#allocation2 + $0x30] sm:$0xe] %vm1112_vm6, %v1054_v19  ;;  %v1055_v32 = vrot.slane %v5370_v20, 7  ;;  %v4242_v37 = vrot.slane %v5370_v20, 9  ;;  %v1710_v45 = vrot.slane %v1177_v27, 5 }
 0x12e   : > { %v705_v28 = vpop.f32.mrb[19].mxu0  ;;  %2119 = vst.msk [vmem:[#allocation2 + $0x34] sm:$0x7] %vm2112_vm7, %v4241_v23  ;;  %v1195_v48 = vshrl.u32 %v5370_v20, 16  ;;  %v1198_v2 = vshll.u32 %v5370_v20, 16  ;;  %v1190_v12 = vrot.slane %v1188_v61, 7 }
 0x12f   : > { %v826_v35 = vmax.f32 %v702_v25, 0.0  ;;  %v706_v36 = vadd.f32 %v705_v28, %v5269_v44  ;;  %2152 = vst.msk [vmem:[#allocation2 + $0x34] sm:$0xf] %vm1465_vm8, %v5362_v11  ;;  %v1711_v60 = vor.u32 %v1710_v45, %v1709_v43  ;;  %v1717_v21 = vrot.slane %v1188_v61, 4 }
 0x130   : > { %1120 = vst.msk [vmem:[#allocation2 + $0x38] sm:$0xe] %vm1112_vm6, %v1055_v32  ;;  %v1197_v3 = vrot.slane %v1195_v48, 7  ;;  %v1721_v14 = vrot.slane %v1195_v48, 4  ;;  %v1722_v15 = vrot.slane %v1198_v2, 5  ;;  %v1718_v23 = vrot.slane %v1191_v7, 5 }
 0x131   : > { %1379 = vrot.lane.b32.xlu1 %v1186_v33, %s4836_s13  ;;  %1825 = vrot.lane.b32.xlu0 %v1704_v24, %s4837_s15  ;;  %v5390_v38 = vpack.c.bf16 %v826_v35, %v826_v35  ;;  %v827_v40 = vmax.f32 %v706_v36, 0.0  ;;  %2120 = vst.msk [vmem:[#allocation2 + $0x3c] sm:$0x7] %vm2112_vm7, %v4242_v37  ;;  %v1712_v10 = vrot.slane %v1711_v60, 4  ;;  %v1193_v27 = vor.u32 %v1191_v7, %v1190_v12 }
 0x132   : > { %2153 = vst.msk [vmem:[#allocation2 + $0x3c] sm:$0xf] %vm1465_vm8, %v5370_v20  ;;  %v1200_v13 = vor.u32 %v1198_v2, %v1197_v3  ;;  %v1723_v31 = vor.u32 %v1722_v15, %v1721_v14  ;;  %v1719_v36 = vor.u32 %v1718_v23, %v1717_v21 }
 0x133   : > { %v5394_v50 = vpop.f32.mrb[20].mxu0  ;;  %v1056_v51 = vrot.slane %v5390_v38, 7  ;;  %v5399_v52 = vpack.c.bf16 %v827_v40, %v827_v40  ;;  %v4243_v54 = vrot.slane %v5390_v38, 9  ;;  %v1205_v61 = vshll.u32 %v5390_v38, 16 }
 0x134   : > { %v711_v53 = vpop.f32.mrb[21].mxu0  ;;  %v1724_v43 = vrot.slane %v1723_v31, 4 }
 0x135   : > { %1578 = vrot.lane.b32.xlu1 %v5370_v20, %s4835_s24  ;;  %1377 = vrot.lane.b32.xlu0 %v1179_v47, %s4836_s13  ;;  %v712_v56 = vadd.f32 %v711_v53, %v5269_v44  ;;  %v5406_v57 = vpop.f32.mrb[22].mxu0  ;;  %1121 = vst.msk [vmem:[#allocation2 + $0x40] sm:$0xe] %vm1112_vm6, %v1056_v51  ;;  %v1057_v1 = vrot.slane %v5399_v52, 7  ;;  %v4244_v6 = vrot.slane %v5399_v52, 9  ;;  %v1209_v32 = vshrl.u32 %v5399_v52, 16 }
 0x136   : > { %v715_v62 = vpop.f32.mrb[23].mxu0  ;;  %2121 = vst.msk [vmem:[#allocation2 + $0x44] sm:$0x7] %vm2112_vm7, %v4243_v54  ;;  %v1212_v42 = vshll.u32 %v5399_v52, 16  ;;  %v1202_v47 = vshrl.u32 %v5390_v38, 16  ;;  %v1726_v14 = vrot.slane %v1205_v61, 5 }
 0x137   : > { %v828_v4 = vmax.f32 %v712_v56, 0.0  ;;  %v716_v5 = vadd.f32 %v715_v62, %v5269_v44  ;;  %2154 = vst.msk [vmem:[#allocation2 + $0x44] sm:$0xf] %vm1465_vm8, %v5390_v38  ;;  %v1211_v45 = vrot.slane %v1209_v32, 7  ;;  %v1729_v62 = vrot.slane %v1209_v32, 4 }
 0x138   : > { %1122 = vst.msk [vmem:[#allocation2 + $0x48] sm:$0xe] %vm1112_vm6, %v1057_v1  ;;  %v1730_v1 = vrot.slane %v1212_v42, 5 }
 0x139   : > { %1831 = vrot.lane.b32.xlu1 %v1716_v59, %s4837_s15  ;;  %1576 = vrot.lane.b32.xlu0 %v5362_v11, %s4835_s24  ;;  %v5422_v8 = vpack.c.bf16 %v828_v4, %v828_v4  ;;  %v829_v9 = vmax.f32 %v716_v5, 0.0  ;;  %2122 = vst.msk [vmem:[#allocation2 + $0x4c] sm:$0x7] %vm2112_vm7, %v4244_v6  ;;  %v1214_v4 = vor.u32 %v1212_v42, %v1211_v45  ;;  %v1204_v5 = vrot.slane %v1202_v47, 7 }
 0x13a   : > { %2155 = vst.msk [vmem:[#allocation2 + $0x4c] sm:$0xf] %vm1465_vm8, %v5399_v52  ;;  %v1731_v12 = vor.u32 %v1730_v1, %v1729_v62 }
 0x13b   : > { %v5425_v16 = vpop.f32.mrb[24].mxu0  ;;  %v1058_v18 = vrot.slane %v5422_v8, 7  ;;  %v5430_v19 = vpack.c.bf16 %v829_v9, %v829_v9  ;;  %v4245_v20 = vrot.slane %v5422_v8, 9  ;;  %v1207_v15 = vor.u32 %v1205_v61, %v1204_v5 }
 0x13c   : > { %v721_v11 = vpop.f32.mrb[25].mxu0  ;;  %v1216_v32 = vshrl.u32 %v5422_v8, 16  ;;  %v1219_v45 = vshll.u32 %v5422_v8, 16 }
 0x13d   : > { %1383 = vrot.lane.b32.xlu1 %v1200_v13, %s4836_s13  ;;  %1829 = vrot.lane.b32.xlu0 %v1712_v10, %s4837_s15  ;;  %v722_v24 = vadd.f32 %v721_v11, %v5269_v44  ;;  %v5436_v25 = vpop.f32.mrb[26].mxu0  ;;  %1123 = vst.msk [vmem:[#allocation2 + $0x50] sm:$0xe] %vm1112_vm6, %v1058_v18  ;;  %v1059_v30 = vrot.slane %v5430_v19, 7  ;;  %v4246_v35 = vrot.slane %v5430_v19, 9  ;;  %v1725_v13 = vrot.slane %v1202_v47, 4 }
 0x13e   : > { %v725_v28 = vpop.f32.mrb[27].mxu0  ;;  %2123 = vst.msk [vmem:[#allocation2 + $0x54] sm:$0x7] %vm2112_vm7, %v4245_v20  ;;  %v1223_v18 = vshrl.u32 %v5430_v19, 16 }
 0x13f   : > { %v830_v33 = vmax.f32 %v722_v24, 0.0  ;;  %v726_v34 = vadd.f32 %v725_v28, %v5269_v44  ;;  %2156 = vst.msk [vmem:[#allocation2 + $0x54] sm:$0xf] %vm1465_vm8, %v5422_v8  ;;  %v1727_v31 = vor.u32 %v1726_v14, %v1725_v13 }
 0x140   : > { %1124 = vst.msk [vmem:[#allocation2 + $0x58] sm:$0xe] %vm1112_vm6, %v1059_v30  ;;  %v1732_v30 = vrot.slane %v1731_v12, 4 }
 0x141   : > { %1582 = vrot.lane.b32.xlu1 %v5399_v52, %s4835_s24  ;;  %1381 = vrot.lane.b32.xlu0 %v1193_v27, %s4836_s13  ;;  %v5450_v37 = vpack.c.bf16 %v830_v33, %v830_v33  ;;  %v831_v40 = vmax.f32 %v726_v34, 0.0  ;;  %2124 = vst.msk [vmem:[#allocation2 + $0x5c] sm:$0x7] %vm2112_vm7, %v4246_v35  ;;  %v1720_v52 = vrot.slane %v1719_v36, 4  ;;  %v1225_v35 = vrot.slane %v1223_v18, 7 }
 0x142   : > { %2157 = vst.msk [vmem:[#allocation2 + $0x5c] sm:$0xf] %vm1465_vm8, %v5430_v19  ;;  %v1226_v36 = vshll.u32 %v5430_v19, 16 }
 0x143   : > { %v5455_v48 = vpop.f32.mrb[28].mxu0  ;;  %v1060_v51 = vrot.slane %v5450_v37, 7  ;;  %v5460_v53 = vpack.c.bf16 %v831_v40, %v831_v40  ;;  %v4247_v56 = vrot.slane %v5450_v37, 9 }
 0x144   : > { %v731_v54 = vpop.f32.mrb[29].mxu0 }
 0x145   : > { %1835 = vrot.lane.b32.xlu1 %v1724_v43, %s4837_s15  ;;  %1580 = vrot.lane.b32.xlu0 %v5390_v38, %s4835_s24  ;;  %v732_v59 = vadd.f32 %v731_v54, %v5269_v44  ;;  %v5467_v60 = vpop.f32.mrb[30].mxu0  ;;  %1125 = vst.msk [vmem:[#allocation2 + $0x60] sm:$0xe] %vm1112_vm6, %v1060_v51  ;;  %v1061_v2 = vrot.slane %v5460_v53, 7  ;;  %v4248_v9 = vrot.slane %v5460_v53, 9  ;;  %v1728_v51 = vrot.slane %v1727_v31, 4 }
 0x146   : > { %v735_v3 = vpop.f32.mrb[31].mxu0  ;;  %2125 = vst.msk [vmem:[#allocation2 + $0x64] sm:$0x7] %vm2112_vm7, %v4247_v56  ;;  %v1218_v54 = vrot.slane %v1216_v32, 7  ;;  %v1228_v56 = vor.u32 %v1226_v36, %v1225_v35  ;;  %v1237_v13 = vshrl.u32 %v5460_v53, 16 }
 0x147   : > { %v832_v6 = vmax.f32 %v732_v59, 0.0  ;;  %v736_v7 = vadd.f32 %v735_v3, %v5269_v44  ;;  %2158 = vst.msk [vmem:[#allocation2 + $0x64] sm:$0xf] %vm1465_vm8, %v5450_v37  ;;  %v1738_v59 = vrot.slane %v1226_v36, 5 }
 0x148   : > { %1126 = vst.msk [vmem:[#allocation2 + $0x68] sm:$0xe] %vm1112_vm6, %v1061_v2  ;;  %v1733_v2 = vrot.slane %v1216_v32, 4  ;;  %v1239_v31 = vrot.slane %v1237_v13, 7  ;;  %v1230_v32 = vshrl.u32 %v5450_v37, 16 }
 0x149   : > { %1387 = vrot.lane.b32.xlu1 %v1214_v4, %s4836_s13  ;;  %1833 = vrot.lane.b32.xlu0 %v1720_v52, %s4837_s15  ;;  %v5480_v38 = vpack.c.bf16 %v832_v6, %v832_v6  ;;  %v833_v10 = vmax.f32 %v736_v7, 0.0  ;;  %2126 = vst.msk [vmem:[#allocation2 + $0x6c] sm:$0x7] %vm2112_vm7, %v4248_v9  ;;  %v1737_v52 = vrot.slane %v1223_v18, 4  ;;  %v1734_v4 = vrot.slane %v1219_v45, 5 }
 0x14a   : > { %2159 = vst.msk [vmem:[#allocation2 + $0x6c] sm:$0xf] %vm1465_vm8, %v5460_v53  ;;  %v1221_v7 = vor.u32 %v1219_v45, %v1218_v54  ;;  %v1233_v45 = vshll.u32 %v5450_v37, 16 }
 0x14b   : > { %v5484_v11 = vpop.f32.mrb[32].mxu0  ;;  %v1062_v20 = vrot.slane %v5480_v38, 7  ;;  %v5489_v21 = vpack.c.bf16 %v833_v10, %v833_v10  ;;  %v4249_v24 = vrot.slane %v5480_v38, 9  ;;  %v1739_v12 = vor.u32 %v1738_v59, %v1737_v52 }
 0x14c   : > { %6786 = vst [vmem:[#allocation9_spill] sm:$0xff] %v5484_v11  ;;  %v741_v23 = vpop.f32.mrb[33].mxu0  ;;  %v1232_v59 = vrot.slane %v1230_v32, 7 }
 0x14d   : > { %1586 = vrot.lane.b32.xlu1 %v5430_v19, %s4835_s24  ;;  %1385 = vrot.lane.b32.xlu0 %v1207_v15, %s4836_s13  ;;  %v742_v27 = vadd.f32 %v741_v23, %v5269_v44  ;;  %v5496_v28 = vpop.f32.mrb[34].mxu0  ;;  %1127 = vst.msk [vmem:[#allocation2 + $0x70] sm:$0xe] %vm1112_vm6, %v1062_v20  ;;  %v1063_v34 = vrot.slane %v5489_v21, 7  ;;  %v4250_v43 = vrot.slane %v5489_v21, 9  ;;  %v1735_v20 = vor.u32 %v1734_v4, %v1733_v2 }
 0x14e   : > { %6787 = vst [vmem:[#allocation10_spill] sm:$0xff] %v5496_v28  ;;  %v745_v33 = vpop.f32.mrb[35].mxu0  ;;  %2127 = vst.msk [vmem:[#allocation2 + $0x74] sm:$0x7] %vm2112_vm7, %v4249_v24 }
 0x14f   : > { %v834_v40 = vmax.f32 %v742_v27, 0.0  ;;  %v746_v42 = vadd.f32 %v745_v33, %v5269_v44  ;;  %2160 = vst.msk [vmem:[#allocation2 + $0x74] sm:$0xf] %vm1465_vm8, %v5480_v38  ;;  %v1240_v27 = vshll.u32 %v5460_v53, 16 }
 0x150   : > { %1128 = vst.msk [vmem:[#allocation2 + $0x78] sm:$0xe] %vm1112_vm6, %v1063_v34 }
 0x151   : > { %1839 = vrot.lane.b32.xlu1 %v1732_v30, %s4837_s15  ;;  %1584 = vrot.lane.b32.xlu0 %v5422_v8, %s4835_s24  ;;  %v5512_v47 = vpack.c.bf16 %v834_v40, %v834_v40  ;;  %v835_v19 = vmax.f32 %v746_v42, 0.0  ;;  %2128 = vst.msk [vmem:[#allocation2 + $0x7c] sm:$0x7] %vm2112_vm7, %v4250_v43  ;;  %v1740_v30 = vrot.slane %v1739_v12, 4  ;;  %v1242_v52 = vor.u32 %v1240_v27, %v1239_v31 }
 0x152   : > { %2161 = vst.msk [vmem:[#allocation2 + $0x7c] sm:$0xf] %vm1465_vm8, %v5489_v21  ;;  %v1244_v31 = vshrl.u32 %v5480_v38, 16 }
 0x153   : > { %v5515_v61 = vpop.f32.mrb[36].mxu0  ;;  %v1064_v62 = vrot.slane %v5512_v47, 7  ;;  %v5520_v1 = vpack.c.bf16 %v835_v19, %v835_v19  ;;  %v4251_v3 = vrot.slane %v5512_v47, 9  ;;  %v1745_v19 = vrot.slane %v1237_v13, 4 }
 0x154   : > { %6788 = vst [vmem:[#allocation11_spill] sm:$0xff] %v5515_v61  ;;  %v751_v8 = vpop.f32.mrb[37].mxu0 }
 0x155   : > { %1391 = vrot.lane.b32.xlu1 %v1228_v56, %s4836_s13  ;;  %1837 = vrot.lane.b32.xlu0 %v1728_v51, %s4837_s15  ;;  %v752_v5 = vadd.f32 %v751_v8, %v5269_v44  ;;  %v5526_v6 = vpop.f32.mrb[38].mxu0  ;;  %1129 = vst.msk [vmem:[#allocation2 + $0x80] sm:$0xe] %vm1112_vm6, %v1064_v62  ;;  %v1065_v10 = vrot.slane %v5520_v1, 7  ;;  %v4252_v18 = vrot.slane %v5520_v1, 9  ;;  %v1746_v51 = vrot.slane %v1240_v27, 5 }
 0x156   : > { %6789 = vst [vmem:[#allocation12_spill] sm:$0xff] %v5526_v6  ;;  %v755_v9 = vpop.f32.mrb[39].mxu0  ;;  %2129 = vst.msk [vmem:[#allocation2 + $0x84] sm:$0x7] %vm2112_vm7, %v4251_v3 }
 0x157   : > { %v836_v14 = vmax.f32 %v752_v5, 0.0  ;;  %v756_v15 = vadd.f32 %v755_v9, %v5269_v44  ;;  %2162 = vst.msk [vmem:[#allocation2 + $0x84] sm:$0xf] %vm1465_vm8, %v5512_v47  ;;  %v1747_v4 = vor.u32 %v1746_v51, %v1745_v19  ;;  %v1741_v5 = vrot.slane %v1230_v32, 4 }
 0x158   : > { %1130 = vst.msk [vmem:[#allocation2 + $0x88] sm:$0xe] %vm1112_vm6, %v1065_v10  ;;  %v1235_v9 = vor.u32 %v1233_v45, %v1232_v59  ;;  %v1251_v10 = vshrl.u32 %v5489_v21, 16  ;;  %v1247_v19 = vshll.u32 %v5480_v38, 16 }
 0x159   : > { %1590 = vrot.lane.b32.xlu1 %v5460_v53, %s4835_s24  ;;  %1389 = vrot.lane.b32.xlu0 %v1221_v7, %s4836_s13  ;;  %v5540_v23 = vpack.c.bf16 %v836_v14, %v836_v14  ;;  %v837_v24 = vmax.f32 %v756_v15, 0.0  ;;  %2130 = vst.msk [vmem:[#allocation2 + $0x8c] sm:$0x7] %vm2112_vm7, %v4252_v18  ;;  %v1736_v53 = vrot.slane %v1735_v20, 4  ;;  %v1742_v7 = vrot.slane %v1233_v45, 5 }
 0x15a   : > { %2163 = vst.msk [vmem:[#allocation2 + $0x8c] sm:$0xf] %vm1465_vm8, %v5520_v1  ;;  %v1748_v27 = vrot.slane %v1747_v4, 4  ;;  %v1753_v59 = vrot.slane %v1251_v10, 4 }
 0x15b   : > { %v5545_v33 = vpop.f32.mrb[40].mxu0  ;;  %v1066_v34 = vrot.slane %v5540_v23, 7  ;;  %v5550_v35 = vpack.c.bf16 %v837_v24, %v837_v24  ;;  %v4253_v40 = vrot.slane %v5540_v23, 9 }
 0x15c   : > { %6790 = vst [vmem:[#allocation13_spill] sm:$0xff] %v5545_v33  ;;  %v761_v36 = vpop.f32.mrb[41].mxu0 }
 0x15d   : > { %1843 = vrot.lane.b32.xlu1 %v1740_v30, %s4837_s15  ;;  %1588 = vrot.lane.b32.xlu0 %v5450_v37, %s4835_s24  ;;  %v762_v42 = vadd.f32 %v761_v36, %v5269_v44  ;;  %v5557_v43 = vpop.f32.mrb[42].mxu0  ;;  %1131 = vst.msk [vmem:[#allocation2 + $0x90] sm:$0xe] %vm1112_vm6, %v1066_v34  ;;  %v1067_v56 = vrot.slane %v5550_v35, 7  ;;  %v4254_v3 = vrot.slane %v5550_v35, 9  ;;  %v1743_v30 = vor.u32 %v1742_v7, %v1741_v5 }
 0x15e   : > { %6791 = vst [vmem:[#allocation14_spill] sm:$0xff] %v5557_v43  ;;  %v765_v54 = vpop.f32.mrb[43].mxu0  ;;  %2131 = vst.msk [vmem:[#allocation2 + $0x94] sm:$0x7] %vm2112_vm7, %v4253_v40  ;;  %v1253_v36 = vrot.slane %v1251_v10, 7  ;;  %v1254_v40 = vshll.u32 %v5489_v21, 16 }
 0x15f   : > { %v838_v62 = vmax.f32 %v762_v42, 0.0  ;;  %v766_v8 = vadd.f32 %v765_v54, %v5269_v44  ;;  %2164 = vst.msk [vmem:[#allocation2 + $0x94] sm:$0xf] %vm1465_vm8, %v5540_v23  ;;  %v1744_v54 = vrot.slane %v1743_v30, 4  ;;  %v1749_v5 = vrot.slane %v1244_v31, 4 }
 0x160   : > { %1132 = vst.msk [vmem:[#allocation2 + $0x98] sm:$0xe] %vm1112_vm6, %v1067_v56  ;;  %v1246_v56 = vrot.slane %v1244_v31, 7  ;;  %v1750_v7 = vrot.slane %v1247_v19, 5 }
 0x161   : > { %1395 = vrot.lane.b32.xlu1 %v1242_v52, %s4836_s13  ;;  %1841 = vrot.lane.b32.xlu0 %v1736_v53, %s4837_s15  ;;  %v5570_v37 = vpack.c.bf16 %v838_v62, %v838_v62  ;;  %v839_v2 = vmax.f32 %v766_v8, 0.0  ;;  %2132 = vst.msk [vmem:[#allocation2 + $0x9c] sm:$0x7] %vm2112_vm7, %v4254_v3  ;;  %v1256_v52 = vor.u32 %v1254_v40, %v1253_v36  ;;  %v1754_v62 = vrot.slane %v1254_v40, 5 }
 0x162   : > { %2165 = vst.msk [vmem:[#allocation2 + $0x9c] sm:$0xf] %vm1465_vm8, %v5550_v35 }
 0x163   : > { %v5574_v12 = vpop.f32.mrb[44].mxu0  ;;  %v1068_v13 = vrot.slane %v5570_v37, 7  ;;  %v5579_v14 = vpack.c.bf16 %v839_v2, %v839_v2  ;;  %v4255_v18 = vrot.slane %v5570_v37, 9 }
 0x164   : > { %6792 = vst [vmem:[#allocation15_spill] sm:$0xff] %v5574_v12  ;;  %v771_v15 = vpop.f32.mrb[45].mxu0 }
 0x165   : > { %1594 = vrot.lane.b32.xlu1 %v5489_v21, %s4835_s24  ;;  %1393 = vrot.lane.b32.xlu0 %v1235_v9, %s4836_s13  ;;  %v772_v20 = vadd.f32 %v771_v15, %v5269_v44  ;;  %v5586_v24 = vpop.f32.mrb[46].mxu0  ;;  %1133 = vst.msk [vmem:[#allocation2 + $0xa0] sm:$0xe] %vm1112_vm6, %v1068_v13  ;;  %v1069_v34 = vrot.slane %v5579_v14, 7  ;;  %v4256_v45 = vrot.slane %v5579_v14, 9  ;;  %v1249_v13 = vor.u32 %v1247_v19, %v1246_v56 }
 0x166   : > { %6793 = vst [vmem:[#allocation16_spill] sm:$0xff] %v5586_v24  ;;  %v775_v32 = vpop.f32.mrb[47].mxu0  ;;  %2133 = vst.msk [vmem:[#allocation2 + $0xa4] sm:$0x7] %vm2112_vm7, %v4255_v18  ;;  %v1268_v19 = vshll.u32 %v5520_v1, 16 }
 0x167   : > { %v840_v53 = vmax.f32 %v772_v20, 0.0  ;;  %v776_v42 = vadd.f32 %v775_v32, %v5269_v44  ;;  %2166 = vst.msk [vmem:[#allocation2 + $0xa4] sm:$0xf] %vm1465_vm8, %v5570_v37  ;;  %v1755_v20 = vor.u32 %v1754_v62, %v1753_v59 }
 0x168   : > { %1134 = vst.msk [vmem:[#allocation2 + $0xa8] sm:$0xe] %vm1112_vm6, %v1069_v34  ;;  %v1751_v34 = vor.u32 %v1750_v7, %v1749_v5 }
 0x169   : > { %1847 = vrot.lane.b32.xlu1 %v1748_v27, %s4837_s15  ;;  %1592 = vrot.lane.b32.xlu0 %v5480_v38, %s4835_s24  ;;  %v5602_v51 = vpack.c.bf16 %v840_v53, %v840_v53  ;;  %v841_v21 = vmax.f32 %v776_v42, 0.0  ;;  %2134 = vst.msk [vmem:[#allocation2 + $0xac] sm:$0x7] %vm2112_vm7, %v4256_v45  ;;  %v1265_v27 = vshrl.u32 %v5520_v1, 16  ;;  %v1258_v53 = vshrl.u32 %v5512_v47, 16 }
 0x16a   : > { %2167 = vst.msk [vmem:[#allocation2 + $0xac] sm:$0xf] %vm1465_vm8, %v5579_v14  ;;  %v1756_v42 = vrot.slane %v1755_v20, 4  ;;  %v1752_v62 = vrot.slane %v1751_v34, 4 }
 0x16b   : > { %v5605_v8 = vpop.f32.mrb[48].mxu0  ;;  %v1070_v3 = vrot.slane %v5602_v51, 7  ;;  %v5610_v2 = vpack.c.bf16 %v841_v21, %v841_v21  ;;  %v4257_v4 = vrot.slane %v5602_v51, 9  ;;  %v1267_v45 = vrot.slane %v1265_v27, 7 }
 0x16c   : > { %6794 = vst [vmem:[#allocation17_spill] sm:$0xff] %v5605_v8  ;;  %v781_v38 = vpop.f32.mrb[49].mxu0  ;;  %v1761_v5 = vrot.slane %v1265_v27, 4 }
 0x16d   : > { %1399 = vrot.lane.b32.xlu1 %v1256_v52, %s4836_s13  ;;  %1845 = vrot.lane.b32.xlu0 %v1744_v54, %s4837_s15  ;;  %v782_v9 = vadd.f32 %v781_v38, %v5269_v44  ;;  %v5616_v10 = vpop.f32.mrb[50].mxu0  ;;  %1135 = vst.msk [vmem:[#allocation2 + $0xb0] sm:$0xe] %vm1112_vm6, %v1070_v3  ;;  %v1071_v18 = vrot.slane %v5610_v2, 7  ;;  %v4258_v31 = vrot.slane %v5610_v2, 9  ;;  %v1260_v38 = vrot.slane %v1258_v53, 7 }
 0x16e   : > { %6795 = vst [vmem:[#allocation18_spill] sm:$0xff] %v5616_v10  ;;  %v785_v15 = vpop.f32.mrb[51].mxu0  ;;  %2135 = vst.msk [vmem:[#allocation2 + $0xb4] sm:$0x7] %vm2112_vm7, %v4257_v4  ;;  %v1261_v4 = vshll.u32 %v5512_v47, 16 }
 0x16f   : > { %v842_v30 = vmax.f32 %v782_v9, 0.0  ;;  %v786_v32 = vadd.f32 %v785_v15, %v5269_v44  ;;  %2168 = vst.msk [vmem:[#allocation2 + $0xb4] sm:$0xf] %vm1465_vm8, %v5602_v51  ;;  %v1762_v15 = vrot.slane %v1268_v19, 5 }
 0x170   : > { %1136 = vst.msk [vmem:[#allocation2 + $0xb8] sm:$0xe] %vm1112_vm6, %v1071_v18  ;;  %v1263_v34 = vor.u32 %v1261_v4, %v1260_v38 }
 0x171   : > { %1598 = vrot.lane.b32.xlu1 %v5520_v1, %s4835_s24  ;;  %1397 = vrot.lane.b32.xlu0 %v1249_v13, %s4836_s13  ;;  %v5630_v36 = vpack.c.bf16 %v842_v30, %v842_v30  ;;  %v843_v40 = vmax.f32 %v786_v32, 0.0  ;;  %2136 = vst.msk [vmem:[#allocation2 + $0xbc] sm:$0x7] %vm2112_vm7, %v4258_v31  ;;  %v1270_v13 = vor.u32 %v1268_v19, %v1267_v45  ;;  %v1757_v32 = vrot.slane %v1258_v53, 4 }
 0x172   : > { %2169 = vst.msk [vmem:[#allocation2 + $0xbc] sm:$0xf] %vm1465_vm8, %v5610_v2  ;;  %v1758_v31 = vrot.slane %v1261_v4, 5  ;;  %v1272_v4 = vshrl.u32 %v5540_v23, 16 }
 0x173   : > { %v5635_v21 = vpop.f32.mrb[52].mxu0  ;;  %v1072_v54 = vrot.slane %v5630_v36, 7  ;;  %v5640_v56 = vpack.c.bf16 %v843_v40, %v843_v40  ;;  %v4259_v59 = vrot.slane %v5630_v36, 9  ;;  %v1763_v40 = vor.u32 %v1762_v15, %v1761_v5 }
 0x174   : > { %6796 = vst [vmem:[#allocation19_spill] sm:$0xff] %v5635_v21  ;;  %v791_v52 = vpop.f32.mrb[53].mxu0  ;;  %v1759_v38 = vor.u32 %v1758_v31, %v1757_v32 }
 0x175   : > { %1851 = vrot.lane.b32.xlu1 %v1756_v42, %s4837_s15  ;;  %1596 = vrot.lane.b32.xlu0 %v5512_v47, %s4835_s24  ;;  %v792_v1 = vadd.f32 %v791_v52, %v5269_v44  ;;  %v5647_v3 = vpop.f32.mrb[54].mxu0  ;;  %1137 = vst.msk [vmem:[#allocation2 + $0xc0] sm:$0xe] %vm1112_vm6, %v1072_v54  ;;  %v1073_v9 = vrot.slane %v5640_v56, 7  ;;  %v4260_v30 = vrot.slane %v5640_v56, 9  ;;  %v1279_v42 = vshrl.u32 %v5550_v35, 16 }
 0x176   : > { %6797 = vst [vmem:[#allocation20_spill] sm:$0xff] %v5647_v3  ;;  %v795_v7 = vpop.f32.mrb[55].mxu0  ;;  %2137 = vst.msk [vmem:[#allocation2 + $0xc4] sm:$0x7] %vm2112_vm7, %v4259_v59 }
 0x177   : > { %v844_v18 = vmax.f32 %v792_v1, 0.0  ;;  %v796_v20 = vadd.f32 %v795_v7, %v5269_v44  ;;  %2170 = vst.msk [vmem:[#allocation2 + $0xc4] sm:$0xf] %vm1465_vm8, %v5630_v36  ;;  %v1282_v1 = vshll.u32 %v5550_v35, 16  ;;  %v1769_v32 = vrot.slane %v1279_v42, 4 }
 0x178   : > { %1138 = vst.msk [vmem:[#allocation2 + $0xc8] sm:$0xe] %vm1112_vm6, %v1073_v9  ;;  %v1764_v9 = vrot.slane %v1763_v40, 4  ;;  %v1760_v40 = vrot.slane %v1759_v38, 4 }
 0x179   : > { %1403 = vrot.lane.b32.xlu1 %v1270_v13, %s4836_s13  ;;  %1849 = vrot.lane.b32.xlu0 %v1752_v62, %s4837_s15  ;;  %v5660_v47 = vpack.c.bf16 %v844_v18, %v844_v18  ;;  %v845_v27 = vmax.f32 %v796_v20, 0.0  ;;  %2138 = vst.msk [vmem:[#allocation2 + $0xcc] sm:$0x7] %vm2112_vm7, %v4260_v30  ;;  %v1281_v13 = vrot.slane %v1279_v42, 7  ;;  %v1770_v31 = vrot.slane %v1282_v1, 5 }
 0x17a   : > { %2171 = vst.msk [vmem:[#allocation2 + $0xcc] sm:$0xf] %vm1465_vm8, %v5640_v56 }
 0x17b   : > { %v5664_v45 = vpop.f32.mrb[56].mxu0  ;;  %v1074_v19 = vrot.slane %v5660_v47, 7  ;;  %v5669_v54 = vpack.c.bf16 %v845_v27, %v845_v27  ;;  %v4261_v59 = vrot.slane %v5660_v47, 9  ;;  %v1275_v27 = vshll.u32 %v5540_v23, 16 }
 0x17c   : > { %6798 = vst [vmem:[#allocation21_spill] sm:$0xff] %v5664_v45  ;;  %v801_v52 = vpop.f32.mrb[57].mxu0  ;;  %v1771_v38 = vor.u32 %v1770_v31, %v1769_v32 }
 0x17d   : > { %1602 = vrot.lane.b32.xlu1 %v5550_v35, %s4835_s24  ;;  %1401 = vrot.lane.b32.xlu0 %v1263_v34, %s4836_s13  ;;  %v802_v53 = vadd.f32 %v801_v52, %v5269_v44  ;;  %v5676_v62 = vpop.f32.mrb[58].mxu0  ;;  %1139 = vst.msk [vmem:[#allocation2 + $0xd0] sm:$0xe] %vm1112_vm6, %v1074_v19  ;;  %v1075_v7 = vrot.slane %v5669_v54, 7  ;;  %v4262_v35 = vrot.slane %v5669_v54, 9  ;;  %v1284_v34 = vor.u32 %v1282_v1, %v1281_v13 }
 0x17e   : > { %6799 = vst [vmem:[#allocation22_spill] sm:$0xff] %v5676_v62  ;;  %v805_v5 = vpop.f32.mrb[59].mxu0  ;;  %2139 = vst.msk [vmem:[#allocation2 + $0xd4] sm:$0x7] %vm2112_vm7, %v4261_v59  ;;  %v1274_v19 = vrot.slane %v1272_v4, 7  ;;  %v1766_v13 = vrot.slane %v1275_v27, 5 }
 0x17f   : > { %v846_v15 = vmax.f32 %v802_v53, 0.0  ;;  %v806_v18 = vadd.f32 %v805_v5, %v5269_v44  ;;  %2172 = vst.msk [vmem:[#allocation2 + $0xd4] sm:$0xf] %vm1465_vm8, %v5660_v47  ;;  %v1772_v31 = vrot.slane %v1771_v38, 4 }
 0x180   : > { %1140 = vst.msk [vmem:[#allocation2 + $0xd8] sm:$0xe] %vm1112_vm6, %v1075_v7 }
 0x181   : > { %1855 = vrot.lane.b32.xlu1 %v1764_v9, %s4837_s15  ;;  %1600 = vrot.lane.b32.xlu0 %v5540_v23, %s4835_s24  ;;  %v5691_v20 = vpack.c.bf16 %v846_v15, %v846_v15  ;;  %v847_v30 = vmax.f32 %v806_v18, 0.0  ;;  %2140 = vst.msk [vmem:[#allocation2 + $0xdc] sm:$0x7] %vm2112_vm7, %v4262_v35  ;;  %v1765_v9 = vrot.slane %v1272_v4, 4  ;;  %v1277_v35 = vor.u32 %v1275_v27, %v1274_v19  ;;  %v2863_v4 = vld [vmem:[%s6752_s5 + $0x20] sm:$0xff] }
 0x182   : > { %2173 = vst.msk [vmem:[#allocation2 + $0xdc] sm:$0xf] %vm1465_vm8, %v5669_v54 }
 0x183   : > { %v5695_v52 = vpop.f32.mrb[60].mxu0  ;;  %v1076_v59 = vrot.slane %v5691_v20, 7  ;;  %v5700_v53 = vpack.c.bf16 %v847_v30, %v847_v30  ;;  %v4263_v7 = vrot.slane %v5691_v20, 9  ;;  %v1293_v30 = vshrl.u32 %v5579_v14, 16 }
 0x184   : > { %6800 = vst [vmem:[#allocation23_spill] sm:$0xff] %v5695_v52  ;;  %v811_v5 = vpop.f32.mrb[61].mxu0  ;;  %v1767_v19 = vor.u32 %v1766_v13, %v1765_v9  ;;  %v1289_v13 = vshll.u32 %v5570_v37, 16 }
 0x185   : > { %1407 = vrot.lane.b32.xlu1 %v1284_v34, %s4836_s13  ;;  %v1565_v23 = vpop.permute.xlu1 %1564  ;;  %1853 = vrot.lane.b32.xlu0 %v1760_v40, %s4837_s15  ;;  %v812_v42 = vadd.f32 %v811_v5, %v5269_v44  ;;  %v5706_v1 = vpop.f32.mrb[62].mxu0  ;;  %1141 = vst.msk [vmem:[#allocation2 + $0xe0] sm:$0xe] %vm1112_vm6, %v1076_v59  ;;  %v1077_v18 = vrot.slane %v5700_v53, 7  ;;  %v4264_v32 = vrot.slane %v5700_v53, 9  ;;  %v1286_v59 = vshrl.u32 %v5570_v37, 16 }
 0x186   : > { %6801 = vst [vmem:[#allocation24_spill] sm:$0xff] %v5706_v1  ;;  %v815_v15 = vpop.f32.mrb[63].mxu0  ;;  %2141 = vst.msk [vmem:[#allocation2 + $0xe4] sm:$0x7] %vm2112_vm7, %v4263_v7  ;;  %v1777_v52 = vrot.slane %v1293_v30, 4 }
 0x187   : > { %v848_v34 = vmax.f32 %v812_v42, 0.0  ;;  %v816_v40 = vadd.f32 %v815_v15, %v5269_v44  ;;  %2174 = vst.msk [vmem:[#allocation2 + $0xe4] sm:$0xf] %vm1465_vm8, %v5691_v20  ;;  %v1468_v42 = vld [vmem:[#allocation2] sm:$0xf]  ;;  %v1295_v15 = vrot.slane %v1293_v30, 7 }
 0x188   : > { %1142 = vst.msk [vmem:[#allocation2 + $0xe8] sm:$0xe] %vm1112_vm6, %v1077_v18  ;;  %v1296_v18 = vshll.u32 %v5579_v14, 16  ;;  %v1774_v30 = vrot.slane %v1289_v13, 5 }
 0x189   : > { %1606 = vrot.lane.b32.xlu1 %v5579_v14, %s4835_s24  ;;  %1405 = vrot.lane.b32.xlu0 %v1277_v35, %s4836_s13  ;;  %v5726_v27 = vpack.c.bf16 %v848_v34, %v848_v34  ;;  %v849_v44 = vmax.f32 %v816_v40, 0.0  ;;  %2142 = vst.msk [vmem:[#allocation2 + $0xec] sm:$0x7] %vm2112_vm7, %v4264_v32  ;;  %v1567_v5 = vpop.permute.xlu1 %1566  ;;  %v1768_v14 = vrot.slane %v1767_v19, 4 }
 0x18a   : > { %2175 = vst.msk [vmem:[#allocation2 + $0xec] sm:$0xf] %vm1465_vm8, %v5700_v53  ;;  %v1778_v1 = vrot.slane %v1296_v18, 5 }
 0x18b   : > { %v1370_v7 = vpop.permute.xlu0 %1369  ;;  %v5731_v35 = vpack.c.bf16 %v849_v44, %v849_v44  ;;  %v1078_v34 = vrot.slane %v5726_v27, 7  ;;  %v4265_v9 = vrot.slane %v5726_v27, 9 }
 0x18c   : > { %v1469_v38 = vsel %vm5722_vm10, %v1370_v7, %v1468_v42  ;;  %v1471_v7 = vld [vmem:[#allocation2 + $0x8] sm:$0xf] }
 0x18d   : > { %1470 = vst [vmem:[#allocation2] sm:$0xf] %v1469_v38  ;;  %1859 = vrot.lane.b32.xlu1 %v1772_v31, %s4837_s15  ;;  %1604 = vrot.lane.b32.xlu0 %v5570_v37, %s4835_s24  ;;  %1143 = vst.msk [vmem:[#allocation2 + $0xf0] sm:$0xe] %vm1112_vm6, %v1078_v34  ;;  %v1079_v40 = vrot.slane %v5731_v35, 7  ;;  %v4266_v32 = vrot.slane %v5731_v35, 9  ;;  %v1298_v31 = vor.u32 %v1296_v18, %v1295_v15 }
 0x18e   : > { %1661 = vst.msk [vmem:[#allocation2] sm:$0xf] %vm1660_vm11, %v1565_v23  ;;  %v1288_v38 = vrot.slane %v1286_v59, 7  ;;  %v1773_v37 = vrot.slane %v1286_v59, 4  ;;  %v1779_v34 = vor.u32 %v1778_v1, %v1777_v52  ;;  %v1310_v52 = vshll.u32 %v5610_v2, 16 }
 0x18f   : > { %2143 = vst.msk [vmem:[#allocation2 + $0xf4] sm:$0x7] %vm2112_vm7, %v4265_v9  ;;  %v1571_v44 = vpop.permute.xlu1 %1570  ;;  %v1372_v42 = vpop.permute.xlu0 %1371  ;;  %2144 = vst.msk [vmem:[#allocation2 + $0xfc] sm:$0x7] %vm2112_vm7, %v4266_v32  ;;  %v1307_v9 = vshrl.u32 %v5610_v2, 16  ;;  %v1300_v1 = vshrl.u32 %v5602_v51, 16 }
 0x190   : > { %2176 = vst.msk [vmem:[#allocation2 + $0xf4] sm:$0xf] %vm1465_vm8, %v5726_v27  ;;  %v1472_v23 = vsel %vm5722_vm10, %v1372_v42, %v1471_v7  ;;  %2177 = vst.msk [vmem:[#allocation2 + $0xfc] sm:$0xf] %vm1465_vm8, %v5731_v35  ;;  %v1291_v18 = vor.u32 %v1289_v13, %v1288_v38  ;;  %v1775_v32 = vor.u32 %v1774_v30, %v1773_v37  ;;  %v1780_v42 = vrot.slane %v1779_v34, 4 }
 0x191   : > { %1144 = vst.msk [vmem:[#allocation2 + $0xf8] sm:$0xe] %vm1112_vm6, %v1079_v40  ;;  %1473 = vst [vmem:[#allocation2 + $0x8] sm:$0xf] %v1472_v23  ;;  %1411 = vrot.lane.b32.xlu1 %v1298_v31, %s4836_s13  ;;  %1857 = vrot.lane.b32.xlu0 %v1768_v14, %s4837_s15  ;;  %v1477_v14 = vld [vmem:[#allocation2 + $0x18] sm:$0xf] }
 0x192   : > { %1662 = vst.msk [vmem:[#allocation2 + $0x8] sm:$0xf] %vm1660_vm11, %v1567_v5  ;;  %v1309_v31 = vrot.slane %v1307_v9, 7  ;;  %v1303_v30 = vshll.u32 %v5602_v51, 16  ;;  %v1474_v34 = vld [vmem:[#allocation2 + $0x10] sm:$0xf] }
 0x193   : > { %v1824_v19 = vpop.permute.xlu1 %1823  ;;  %v1569_v15 = vpop.permute.xlu0 %1568  ;;  %v2867_v40 = vld [vmem:[%s6752_s5 + $0x40] sm:$0xff]  ;;  %vm2925_vm6 = vcmask 1047559  }
 0x195   : > { %1610 = vrot.lane.b32.xlu1 %v5610_v2, %s4835_s24  ;;  %1409 = vrot.lane.b32.xlu0 %v1291_v18, %s4836_s13  ;;  %v1920_v7 = vld [vmem:[#allocation2] sm:$0xf]  ;;  %v1776_v2 = vrot.slane %v1775_v32, 4 }
 0x197   : > { %v1376_v5 = vpop.permute.xlu1 %1375  ;;  %v1822_v59 = vpop.permute.xlu0 %1821 }
 0x198   : > { %v1478_v13 = vsel %vm5722_vm10, %v1376_v5, %v1477_v14  ;;  %v1921_v38 = vsel %vm5760_vm14, %v1822_v59, %v1920_v7  ;;  %v1312_v5 = vor.u32 %v1310_v52, %v1309_v31  ;;  %v1302_v59 = vrot.slane %v1300_v1, 7 }
 0x199   : > { %v1923_v23 = vld [vmem:[#allocation2 + $0x8] sm:$0xf]  ;;  %1479 = vst [vmem:[#allocation2 + $0x18] sm:$0xf] %v1478_v13  ;;  %1922 = vst [vmem:[#allocation2] sm:$0xf] %v1921_v38  ;;  %1863 = vrot.lane.b32.xlu1 %v1780_v42, %s4837_s15  ;;  %1608 = vrot.lane.b32.xlu0 %v5602_v51, %s4835_s24 }
 0x19a   : > { %v1924_v37 = vsel %vm5760_vm14, %v1824_v19, %v1923_v23  ;;  %1664 = vst.msk [vmem:[#allocation2 + $0x18] sm:$0xf] %vm1660_vm11, %v1571_v44  ;;  %v1785_v7 = vrot.slane %v1307_v9, 4  ;;  %v1786_v13 = vrot.slane %v1310_v52, 5  ;;  %v1781_v44 = vrot.slane %v1300_v1, 4 }
 0x19b   : > { %1925 = vst [vmem:[#allocation2 + $0x8] sm:$0xf] %v1924_v37  ;;  %v1575_v18 = vpop.permute.xlu1 %1574  ;;  %v1374_v14 = vpop.permute.xlu0 %1373  ;;  %v1782_v51 = vrot.slane %v1303_v30, 5  ;;  %v1305_v38 = vor.u32 %v1303_v30, %v1302_v59  ;;  %v1321_v31 = vshrl.u32 %v5640_v56, 16  ;;  %v1324_v59 = vshll.u32 %v5640_v56, 16 }
 0x19c   : > { %v1475_v42 = vsel %vm5722_vm10, %v1374_v14, %v1474_v34  ;;  %v1787_v23 = vor.u32 %v1786_v13, %v1785_v7  ;;  %v1314_v7 = vshrl.u32 %v5630_v36, 16 }
 0x19d   : > { %1476 = vst [vmem:[#allocation2 + $0x10] sm:$0xf] %v1475_v42  ;;  %1415 = vrot.lane.b32.xlu1 %v1312_v5, %s4836_s13  ;;  %1861 = vrot.lane.b32.xlu0 %v1776_v2, %s4837_s15  ;;  %v1783_v1 = vor.u32 %v1782_v51, %v1781_v44  ;;  %v1483_v2 = vld [vmem:[#allocation2 + $0x28] sm:$0xf]  ;;  %v1323_v5 = vrot.slane %v1321_v31, 7  ;;  %v1317_v51 = vshll.u32 %v5630_v36, 16 }
 0x19e   : > { %1663 = vst.msk [vmem:[#allocation2 + $0x10] sm:$0xf] %vm1660_vm11, %v1569_v15  ;;  %v4591_v15 = vld [vmem:[#allocation2 + $0x4] ss:$8 sps:$4 sm:$0xff]   ;;  %v1788_v14 = vrot.slane %v1787_v23, 4 }
 0x19f   : > { %v1828_v19 = vpop.permute.xlu1 %1827  ;;  %v1573_v32 = vpop.permute.xlu0 %1572  ;;  %4312 = vmatprep.mubr.msk.bf16.mxu1 %vm2457_vm15, %v4591_v15  ;;  %v1793_v15 = vrot.slane %v1321_v31, 4 }
 0x1a1   : > { %v1929_v9 = vld [vmem:[#allocation2 + $0x18] sm:$0xf]  ;;  %1614 = vrot.lane.b32.xlu1 %v5640_v56, %s4835_s24  ;;  %1413 = vrot.lane.b32.xlu0 %v1305_v38, %s4836_s13  ;;  %v1784_v56 = vrot.slane %v1783_v1, 4  ;;  %v1480_v38 = vld [vmem:[#allocation2 + $0x20] sm:$0xf] }
 0x1a2   : > { %v1930_v52 = vsel %vm5760_vm14, %v1828_v19, %v1929_v9  ;;  %v4589_v37 = vld [vmem:[#allocation2] ss:$8 sps:$4 sm:$0xff]   ;;  %v1326_v9 = vor.u32 %v1324_v59, %v1323_v5  ;;  %v1335_v5 = vshrl.u32 %v5669_v54, 16 }
 0x1a3   : > { %1931 = vst [vmem:[#allocation2 + $0x18] sm:$0xf] %v1930_v52  ;;  %v1380_v34 = vpop.permute.xlu1 %1379  ;;  %v1826_v30 = vpop.permute.xlu0 %1825  ;;  %2539 = vmatmul.mubr.bf16.vlgmr.msra.gmra.mrb[0].mxu1 %v4589_v37  ;;  %v1316_v52 = vrot.slane %v1314_v7, 7 }
 0x1a4   : > { %v1484_v13 = vsel %vm5722_vm10, %v1380_v34, %v1483_v2  ;;  %v1794_v2 = vrot.slane %v1324_v59, 5 }
 0x1a5   : > { %1485 = vst [vmem:[#allocation2 + $0x28] sm:$0xf] %v1484_v13  ;;  %v1926_v42 = vld [vmem:[#allocation2 + $0x10] sm:$0xf]  ;;  %1867 = vrot.lane.b32.xlu1 %v1788_v14, %s4837_s15  ;;  %1612 = vrot.lane.b32.xlu0 %v5630_v36, %s4835_s24  ;;  %v1790_v36 = vrot.slane %v1317_v51, 5 }
 0x1a6   : > { %1666 = vst.msk [vmem:[#allocation2 + $0x28] sm:$0xf] %vm1660_vm11, %v1575_v18  ;;  %v1927_v44 = vsel %vm5760_vm14, %v1826_v30, %v1926_v42  ;;  %v1789_v18 = vrot.slane %v1314_v7, 4  ;;  %v1319_v30 = vor.u32 %v1317_v51, %v1316_v52  ;;  %v1795_v14 = vor.u32 %v1794_v2, %v1793_v15  ;;  %v4592_v13 = vld [vmem:[#allocation2 + $0x14] ss:$8 sps:$4 sm:$0xff]  }
 0x1a7   : > { %1928 = vst [vmem:[#allocation2 + $0x10] sm:$0xf] %v1927_v44  ;;  %v1579_v19 = vpop.permute.xlu1 %1578  ;;  %v1378_v23 = vpop.permute.xlu0 %1377  ;;  %v1489_v7 = vld [vmem:[#allocation2 + $0x38] sm:$0xf]  ;;  %4313 = vmatprep.mubr.msk.bf16.mxu1 %vm2457_vm15, %v4592_v13 }
 0x1a8   : > { %v1481_v34 = vsel %vm5722_vm10, %v1378_v23, %v1480_v38  ;;  %v1796_v51 = vrot.slane %v1795_v14, 4  ;;  %v1337_v38 = vrot.slane %v1335_v5, 7  ;;  %v1338_v23 = vshll.u32 %v5669_v54, 16 }
 0x1a9   : > { %1482 = vst [vmem:[#allocation2 + $0x20] sm:$0xf] %v1481_v34  ;;  %1419 = vrot.lane.b32.xlu1 %v1326_v9, %s4836_s13  ;;  %1865 = vrot.lane.b32.xlu0 %v1784_v56, %s4837_s15  ;;  %v1328_v9 = vshrl.u32 %v5660_v47, 16  ;;  %v1331_v34 = vshll.u32 %v5660_v47, 16 }
 0x1aa   : > { %1665 = vst.msk [vmem:[#allocation2 + $0x20] sm:$0xf] %vm1660_vm11, %v1573_v32  ;;  %v1791_v32 = vor.u32 %v1790_v36, %v1789_v18  ;;  %v1486_v36 = vld [vmem:[#allocation2 + $0x30] sm:$0xf] }
 0x1ab   : > { %v1832_v37 = vpop.permute.xlu1 %1831  ;;  %v1577_v1 = vpop.permute.xlu0 %1576  ;;  %v1330_v14 = vrot.slane %v1328_v9, 7 }
 0x1ad   : > { %v1935_v31 = vld [vmem:[#allocation2 + $0x28] sm:$0xf]  ;;  %1618 = vrot.lane.b32.xlu1 %v5669_v54, %s4835_s24  ;;  %1417 = vrot.lane.b32.xlu0 %v1319_v30, %s4836_s13  ;;  %v1792_v54 = vrot.slane %v1791_v32, 4  ;;  %v1340_v30 = vor.u32 %v1338_v23, %v1337_v38  ;;  %v4595_v38 = vld [vmem:[#allocation2 + $0x24] ss:$8 sps:$4 sm:$0xff]  }
 0x1ae   : > { %v1936_v59 = vsel %vm5760_vm14, %v1832_v37, %v1935_v31  ;;  %v4594_v42 = vld [vmem:[#allocation2 + $0x10] ss:$8 sps:$4 sm:$0xff]   ;;  %v1801_v31 = vrot.slane %v1335_v5, 4 }
 0x1af   : > { %1937 = vst [vmem:[#allocation2 + $0x28] sm:$0xf] %v1936_v59  ;;  %v1384_v44 = vpop.permute.xlu1 %1383  ;;  %v1830_v56 = vpop.permute.xlu0 %1829  ;;  %2547 = vmatmul.mubr.bf16.gmra.mrb[4].mxu1 %v4594_v42  ;;  %v1802_v59 = vrot.slane %v1338_v23, 5 }
 0x1b0   : > { %v1490_v52 = vsel %vm5722_vm10, %v1384_v44, %v1489_v7  ;;  %v1333_v7 = vor.u32 %v1331_v34, %v1330_v14  ;;  %4314 = vmatprep.mubr.msk.bf16.mxu1 %vm2457_vm15, %v4595_v38  ;;  %v1363_v14 = vshrl.u32 %v5731_v35, 16 }
 0x1b1   : > { %1491 = vst [vmem:[#allocation2 + $0x38] sm:$0xf] %v1490_v52  ;;  %v1932_v15 = vld [vmem:[#allocation2 + $0x20] sm:$0xf]  ;;  %1871 = vrot.lane.b32.xlu1 %v1796_v51, %s4837_s15  ;;  %1616 = vrot.lane.b32.xlu0 %v5660_v47, %s4835_s24  ;;  %v1798_v47 = vrot.slane %v1331_v34, 5  ;;  %v1803_v44 = vor.u32 %v1802_v59, %v1801_v31  ;;  %v1352_v34 = vshll.u32 %v5700_v53, 16 }
 0x1b2   : > { %1668 = vst.msk [vmem:[#allocation2 + $0x38] sm:$0xf] %vm1660_vm11, %v1579_v19  ;;  %v1933_v2 = vsel %vm5760_vm14, %v1830_v56, %v1932_v15  ;;  %v1797_v19 = vrot.slane %v1328_v9, 4  ;;  %v1349_v56 = vshrl.u32 %v5700_v53, 16  ;;  %v1495_v9 = vld [vmem:[#allocation2 + $0x48] sm:$0xf] }
 0x1b3   : > { %1934 = vst [vmem:[#allocation2 + $0x20] sm:$0xf] %v1933_v2  ;;  %v1583_v18 = vpop.permute.xlu1 %1582  ;;  %v1382_v37 = vpop.permute.xlu0 %1381  ;;  %v1804_v2 = vrot.slane %v1803_v44, 4  ;;  %v1492_v59 = vld [vmem:[#allocation2 + $0x40] sm:$0xf]  ;;  %v1810_v38 = vrot.slane %v1352_v34, 5 }
 0x1b4   : > { %v1487_v13 = vsel %vm5722_vm10, %v1382_v37, %v1486_v36  ;;  %v1342_v36 = vshrl.u32 %v5691_v20, 16 }
 0x1b5   : > { %1488 = vst [vmem:[#allocation2 + $0x30] sm:$0xf] %v1487_v13  ;;  %1423 = vrot.lane.b32.xlu1 %v1340_v30, %s4836_s13  ;;  %1869 = vrot.lane.b32.xlu0 %v1792_v54, %s4837_s15  ;;  %v1351_v54 = vrot.slane %v1349_v56, 7 }
 0x1b6   : > { %1667 = vst.msk [vmem:[#allocation2 + $0x30] sm:$0xf] %vm1660_vm11, %v1577_v1  ;;  %v1799_v1 = vor.u32 %v1798_v47, %v1797_v19 }
 0x1b7   : > { %v1836_v42 = vpop.permute.xlu1 %1835  ;;  %v1581_v32 = vpop.permute.xlu0 %1580  ;;  %v1354_v19 = vor.u32 %v1352_v34, %v1351_v54 }
 0x1b8   : > { %v1800_v47 = vrot.slane %v1799_v1, 4 }
 0x1b9   : > { %v1941_v5 = vld [vmem:[#allocation2 + $0x38] sm:$0xf]  ;;  %1622 = vrot.lane.b32.xlu1 %v5700_v53, %s4835_s24  ;;  %1421 = vrot.lane.b32.xlu0 %v1333_v7, %s4836_s13  ;;  %v1345_v7 = vshll.u32 %v5691_v20, 16 }
 0x1ba   : > { %v1942_v51 = vsel %vm5760_vm14, %v1836_v42, %v1941_v5  ;;  %v4597_v23 = vld [vmem:[#allocation2 + $0x20] ss:$8 sps:$4 sm:$0xff]   ;;  %v1344_v42 = vrot.slane %v1342_v36, 7  ;;  %v1366_v5 = vshll.u32 %v5731_v35, 16 }
 0x1bb   : > { %1943 = vst [vmem:[#allocation2 + $0x38] sm:$0xf] %v1942_v51  ;;  %v1388_v52 = vpop.permute.xlu1 %1387  ;;  %v1834_v15 = vpop.permute.xlu0 %1833  ;;  %2555 = vmatmul.mubr.bf16.gmra.mrb[8].mxu1 %v4597_v23  ;;  %v1809_v51 = vrot.slane %v1349_v56, 4  ;;  %v1806_v34 = vrot.slane %v1345_v7, 5 }
 0x1bc   : > { %v1496_v37 = vsel %vm5722_vm10, %v1388_v52, %v1495_v9  ;;  %v1347_v9 = vor.u32 %v1345_v7, %v1344_v42 }
 0x1bd   : > { %1497 = vst [vmem:[#allocation2 + $0x48] sm:$0xf] %v1496_v37  ;;  %v1938_v30 = vld [vmem:[#allocation2 + $0x30] sm:$0xf]  ;;  %1875 = vrot.lane.b32.xlu1 %v1804_v2, %s4837_s15  ;;  %1620 = vrot.lane.b32.xlu0 %v5691_v20, %s4835_s24  ;;  %v1356_v20 = vshrl.u32 %v5726_v27, 16  ;;  %v1805_v2 = vrot.slane %v1342_v36, 4  ;;  %v1811_v56 = vor.u32 %v1810_v38, %v1809_v51 }
 0x1be   : > { %1670 = vst.msk [vmem:[#allocation2 + $0x48] sm:$0xf] %vm1660_vm11, %v1583_v18  ;;  %v1939_v53 = vsel %vm5760_vm14, %v1834_v15, %v1938_v30  ;;  %v1365_v18 = vrot.slane %v1363_v14, 7  ;;  %v4598_v37 = vld [vmem:[#allocation2 + $0x34] ss:$8 sps:$4 sm:$0xff]  }
 0x1bf   : > { %1940 = vst [vmem:[#allocation2 + $0x30] sm:$0xf] %v1939_v53  ;;  %v1587_v31 = vpop.permute.xlu1 %1586  ;;  %v1386_v13 = vpop.permute.xlu0 %1385  ;;  %v1501_v30 = vld [vmem:[#allocation2 + $0x58] sm:$0xf]  ;;  %4315 = vmatprep.mubr.msk.bf16.mxu1 %vm2457_vm15, %v4598_v37 }
 0x1c0   : > { %v1493_v44 = vsel %vm5722_vm10, %v1386_v13, %v1492_v59  ;;  %v1368_v15 = vor.u32 %v1366_v5, %v1365_v18  ;;  %v1358_v13 = vrot.slane %v1356_v20, 7 }
 0x1c1   : > { %1494 = vst [vmem:[#allocation2 + $0x40] sm:$0xf] %v1493_v44  ;;  %1427 = vrot.lane.b32.xlu1 %v1354_v19, %s4836_s13  ;;  %1873 = vrot.lane.b32.xlu0 %v1800_v47, %s4837_s15  ;;  %v1359_v19 = vshll.u32 %v5726_v27, 16  ;;  %v1817_v47 = vrot.slane %v1363_v14, 4  ;;  %v1812_v14 = vrot.slane %v1811_v56, 4  ;;  %v1807_v44 = vor.u32 %v1806_v34, %v1805_v2 }
 0x1c2   : > { %1669 = vst.msk [vmem:[#allocation2 + $0x40] sm:$0xf] %vm1660_vm11, %v1581_v32  ;;  %v4601_v56 = vld [vmem:[#allocation2 + $0x44] ss:$8 sps:$4 sm:$0xff]  }
 0x1c3   : > { %v1840_v23 = vpop.permute.xlu1 %1839  ;;  %v1585_v1 = vpop.permute.xlu0 %1584  ;;  %v1361_v38 = vor.u32 %v1359_v19, %v1358_v13 }
 0x1c5   : > { %v1947_v52 = vld [vmem:[#allocation2 + $0x48] sm:$0xf]  ;;  %1626 = vrot.lane.b32.xlu1 %v5731_v35, %s4835_s24  ;;  %1425 = vrot.lane.b32.xlu0 %v1347_v9, %s4836_s13  ;;  %v1818_v35 = vrot.slane %v1366_v5, 5  ;;  %v1498_v5 = vld [vmem:[#allocation2 + $0x50] sm:$0xf]  ;;  %v1813_v9 = vrot.slane %v1356_v20, 4 }
 0x1c6   : > { %v1948_v54 = vsel %vm5760_vm14, %v1840_v23, %v1947_v52  ;;  %v4600_v32 = vld [vmem:[#allocation2 + $0x30] ss:$8 sps:$4 sm:$0xff]   ;;  %v1814_v52 = vrot.slane %v1359_v19, 5 }
 0x1c7   : > { %1949 = vst [vmem:[#allocation2 + $0x48] sm:$0xf] %v1948_v54  ;;  %v1392_v53 = vpop.permute.xlu1 %1391  ;;  %v1838_v59 = vpop.permute.xlu0 %1837  ;;  %2563 = vmatmul.mubr.bf16.gmra.mrb[12].mxu1 %v4600_v32  ;;  %v1819_v23 = vor.u32 %v1818_v35, %v1817_v47  ;;  %v1808_v54 = vrot.slane %v1807_v44, 4 }
 0x1c8   : > { %v1502_v42 = vsel %vm5722_vm10, %v1392_v53, %v1501_v30  ;;  %v1815_v37 = vor.u32 %v1814_v52, %v1813_v9  ;;  %v1507_v30 = vld [vmem:[#allocation2 + $0x68] sm:$0xf]  ;;  %4316 = vmatprep.mubr.msk.bf16.mxu1 %vm2457_vm15, %v4601_v56 }
 0x1c9   : > { %1503 = vst [vmem:[#allocation2 + $0x58] sm:$0xf] %v1502_v42  ;;  %v1944_v36 = vld [vmem:[#allocation2 + $0x40] sm:$0xf]  ;;  %1431 = vrot.lane.b32.xlu1 %v1368_v15, %s4836_s13  ;;  %1624 = vrot.lane.b32.xlu0 %v5726_v27, %s4835_s24  ;;  %v1820_v2 = vrot.slane %v1819_v23, 4 }
 0x1ca   : > { %1672 = vst.msk [vmem:[#allocation2 + $0x58] sm:$0xf] %vm1660_vm11, %v1587_v31  ;;  %v1945_v7 = vsel %vm5760_vm14, %v1838_v59, %v1944_v36  ;;  %v1504_v42 = vld [vmem:[#allocation2 + $0x60] sm:$0xf]  ;;  %v1513_v23 = vld [vmem:[#allocation2 + $0x78] sm:$0xf] }
 0x1cb   : > { %1946 = vst [vmem:[#allocation2 + $0x40] sm:$0xf] %v1945_v7  ;;  %v1591_v18 = vpop.permute.xlu1 %1590  ;;  %v1390_v51 = vpop.permute.xlu0 %1389 }
 0x1cc   : > { %v1499_v15 = vsel %vm5722_vm10, %v1390_v51, %v1498_v5 }
 0x1cd   : > { %1500 = vst [vmem:[#allocation2 + $0x50] sm:$0xf] %v1499_v15  ;;  %1879 = vrot.lane.b32.xlu1 %v1812_v14, %s4837_s15  ;;  %1429 = vrot.lane.b32.xlu0 %v1361_v38, %s4836_s13  ;;  %s6706_s13 = scalar_lea.sflag [#allocation4], %s378_s19 }
 0x1ce   : > { %1671 = vst.msk [vmem:[#allocation2 + $0x50] sm:$0xf] %vm1660_vm11, %v1585_v1  ;;  %v1816_v1 = vrot.slane %v1815_v37, 4 }
 0x1cf   : > { %v1844_v27 = vpop.permute.xlu1 %1843  ;;  %v1589_v31 = vpop.permute.xlu0 %1588 }
 0x1d1   : > { %v1953_v32 = vld [vmem:[#allocation2 + $0x58] sm:$0xf]  ;;  %1883 = vrot.lane.b32.xlu1 %v1820_v2, %s4837_s15  ;;  %1877 = vrot.lane.b32.xlu0 %v1808_v54, %s4837_s15  ;;  %v1510_v54 = vld [vmem:[#allocation2 + $0x70] sm:$0xf] }
 0x1d2   : > { %v1954_v20 = vsel %vm5760_vm14, %v1844_v27, %v1953_v32  ;;  %v4603_v34 = vld [vmem:[#allocation2 + $0x40] ss:$8 sps:$4 sm:$0xff]  }
 0x1d3   : > { %1955 = vst [vmem:[#allocation2 + $0x58] sm:$0xf] %v1954_v20  ;;  %v1396_v53 = vpop.permute.xlu1 %1395  ;;  %v1842_v59 = vpop.permute.xlu0 %1841  ;;  %2571 = vmatmul.mubr.bf16.gmra.mrb[16].mxu1 %v4603_v34 }
 0x1d4   : > { %v1508_v13 = vsel %vm5722_vm10, %v1396_v53, %v1507_v30  ;;  %v4607_v53 = vld [vmem:[#allocation2 + $0x64] ss:$8 sps:$4 sm:$0xff]  }
 0x1d5   : > { %1509 = vst [vmem:[#allocation2 + $0x68] sm:$0xf] %v1508_v13  ;;  %v1950_v19 = vld [vmem:[#allocation2 + $0x50] sm:$0xf]  ;;  %1881 = vrot.lane.b32.xlu0 %v1816_v1, %s4837_s15  ;;  %v1519_v1 = vld [vmem:[#allocation2 + $0x88] sm:$0xf] }
 0x1d6   : > { %1674 = vst.msk [vmem:[#allocation2 + $0x68] sm:$0xf] %vm1660_vm11, %v1591_v18  ;;  %v1951_v47 = vsel %vm5760_vm14, %v1842_v59, %v1950_v19  ;;  %v4604_v18 = vld [vmem:[#allocation2 + $0x54] ss:$8 sps:$4 sm:$0xff]  }
 0x1d7   : > { %1952 = vst [vmem:[#allocation2 + $0x50] sm:$0xf] %v1951_v47  ;;  %v1595_v35 = vpop.permute.xlu1 %1594  ;;  %v1394_v36 = vpop.permute.xlu0 %1393  ;;  %4317 = vmatprep.mubr.msk.bf16.mxu1 %vm2457_vm15, %v4604_v18 }
 0x1d8   : > { %v1505_v7 = vsel %vm5722_vm10, %v1394_v36, %v1504_v42 }
 0x1d9   : > { %1506 = vst [vmem:[#allocation2 + $0x60] sm:$0xf] %v1505_v7  ;;  %v1516_v7 = vld [vmem:[#allocation2 + $0x80] sm:$0xf] }
 0x1da   : > { %1673 = vst.msk [vmem:[#allocation2 + $0x60] sm:$0xf] %vm1660_vm11, %v1589_v31 }
 0x1db   : > { %v1848_v14 = vpop.permute.xlu1 %1847  ;;  %v1593_v44 = vpop.permute.xlu0 %1592 }
 0x1dd   : > { %v1959_v5 = vld [vmem:[#allocation2 + $0x68] sm:$0xf] }
 0x1de   : > { %v1960_v51 = vsel %vm5760_vm14, %v1848_v14, %v1959_v5  ;;  %v4606_v38 = vld [vmem:[#allocation2 + $0x50] ss:$8 sps:$4 sm:$0xff]  }
 0x1df   : > { %1961 = vst [vmem:[#allocation2 + $0x68] sm:$0xf] %v1960_v51  ;;  %v1400_v9 = vpop.permute.xlu1 %1399  ;;  %v1846_v52 = vpop.permute.xlu0 %1845  ;;  %2579 = vmatmul.mubr.bf16.gmra.mrb[20].mxu1 %v4606_v38 }
 0x1e0   : > { %v1514_v15 = vsel %vm5722_vm10, %v1400_v9, %v1513_v23  ;;  %4318 = vmatprep.mubr.msk.bf16.mxu1 %vm2457_vm15, %v4607_v53  ;;  %v4610_v23 = vld [vmem:[#allocation2 + $0x74] ss:$8 sps:$4 sm:$0xff]  }
 0x1e1   : > { %1515 = vst [vmem:[#allocation2 + $0x78] sm:$0xf] %v1514_v15  ;;  %v1956_v27 = vld [vmem:[#allocation2 + $0x60] sm:$0xf] }
 0x1e2   : > { %1676 = vst.msk [vmem:[#allocation2 + $0x78] sm:$0xf] %vm1660_vm11, %v1595_v35  ;;  %v1957_v31 = vsel %vm5760_vm14, %v1846_v52, %v1956_v27  ;;  %v1525_v52 = vld [vmem:[#allocation2 + $0x98] sm:$0xf] }
 0x1e3   : > { %1958 = vst [vmem:[#allocation2 + $0x60] sm:$0xf] %v1957_v31  ;;  %v1599_v2 = vpop.permute.xlu1 %1598  ;;  %v1398_v37 = vpop.permute.xlu0 %1397 }
 0x1e4   : > { %v1511_v32 = vsel %vm5722_vm10, %v1398_v37, %v1510_v54 }
 0x1e5   : > { %1512 = vst [vmem:[#allocation2 + $0x70] sm:$0xf] %v1511_v32  ;;  %v1522_v32 = vld [vmem:[#allocation2 + $0x90] sm:$0xf] }
 0x1e6   : > { %1675 = vst.msk [vmem:[#allocation2 + $0x70] sm:$0xf] %vm1660_vm11, %v1593_v44 }
 0x1e7   : > { %v1852_v20 = vpop.permute.xlu1 %1851  ;;  %v1597_v56 = vpop.permute.xlu0 %1596 }
 0x1e9   : > { %v1965_v34 = vld [vmem:[#allocation2 + $0x78] sm:$0xf] }
 0x1ea   : > { %v1966_v30 = vsel %vm5760_vm14, %v1852_v20, %v1965_v34  ;;  %v4609_v59 = vld [vmem:[#allocation2 + $0x60] ss:$8 sps:$4 sm:$0xff]  }
 0x1eb   : > { %1967 = vst [vmem:[#allocation2 + $0x78] sm:$0xf] %v1966_v30  ;;  %v1404_v13 = vpop.permute.xlu1 %1403  ;;  %v1850_v19 = vpop.permute.xlu0 %1849  ;;  %2587 = vmatmul.mubr.bf16.gmra.mrb[24].mxu1 %v4609_v59 }
 0x1ec   : > { %v1520_v47 = vsel %vm5722_vm10, %v1404_v13, %v1519_v1  ;;  %4319 = vmatprep.mubr.msk.bf16.mxu1 %vm2457_vm15, %v4610_v23  ;;  %v4613_v1 = vld [vmem:[#allocation2 + $0x84] ss:$8 sps:$4 sm:$0xff]  }
 0x1ed   : > { %1521 = vst [vmem:[#allocation2 + $0x88] sm:$0xf] %v1520_v47  ;;  %v1962_v35 = vld [vmem:[#allocation2 + $0x70] sm:$0xf] }
 0x1ee   : > { %1678 = vst.msk [vmem:[#allocation2 + $0x88] sm:$0xf] %vm1660_vm11, %v1599_v2  ;;  %v1963_v42 = vsel %vm5760_vm14, %v1850_v19, %v1962_v35  ;;  %v1531_v19 = vld [vmem:[#allocation2 + $0xa8] sm:$0xf] }
 0x1ef   : > { %1964 = vst [vmem:[#allocation2 + $0x70] sm:$0xf] %v1963_v42  ;;  %v1603_v36 = vpop.permute.xlu1 %1602  ;;  %v1402_v14 = vpop.permute.xlu0 %1401 }
 0x1f0   : > { %v1517_v44 = vsel %vm5722_vm10, %v1402_v14, %v1516_v7 }
 0x1f1   : > { %1518 = vst [vmem:[#allocation2 + $0x80] sm:$0xf] %v1517_v44  ;;  %v1528_v44 = vld [vmem:[#allocation2 + $0xa0] sm:$0xf] }
 0x1f2   : > { %1677 = vst.msk [vmem:[#allocation2 + $0x80] sm:$0xf] %vm1660_vm11, %v1597_v56 }
 0x1f3   : > { %v1856_v5 = vpop.permute.xlu1 %1855  ;;  %v1601_v51 = vpop.permute.xlu0 %1600 }
 0x1f5   : > { %v1971_v18 = vld [vmem:[#allocation2 + $0x88] sm:$0xf] }
 0x1f6   : > { %v1972_v38 = vsel %vm5760_vm14, %v1856_v5, %v1971_v18  ;;  %v4612_v9 = vld [vmem:[#allocation2 + $0x70] ss:$8 sps:$4 sm:$0xff]  }
 0x1f7   : > { %1973 = vst [vmem:[#allocation2 + $0x88] sm:$0xf] %v1972_v38  ;;  %v1408_v15 = vpop.permute.xlu1 %1407  ;;  %v1854_v27 = vpop.permute.xlu0 %1853  ;;  %2595 = vmatmul.mubr.bf16.gmra.mrb[28].mxu1 %v4612_v9 }
 0x1f8   : > { %v1526_v31 = vsel %vm5722_vm10, %v1408_v15, %v1525_v52  ;;  %4320 = vmatprep.mubr.msk.bf16.mxu1 %vm2457_vm15, %v4613_v1  ;;  %v4616_v52 = vld [vmem:[#allocation2 + $0x94] ss:$8 sps:$4 sm:$0xff]  }
 0x1f9   : > { %1527 = vst [vmem:[#allocation2 + $0x98] sm:$0xf] %v1526_v31  ;;  %v1968_v2 = vld [vmem:[#allocation2 + $0x80] sm:$0xf] }
 0x1fa   : > { %1680 = vst.msk [vmem:[#allocation2 + $0x98] sm:$0xf] %vm1660_vm11, %v1603_v36  ;;  %v1969_v54 = vsel %vm5760_vm14, %v1854_v27, %v1968_v2  ;;  %v1537_v27 = vld [vmem:[#allocation2 + $0xb8] sm:$0xf] }
 0x1fb   : > { %1970 = vst [vmem:[#allocation2 + $0x80] sm:$0xf] %v1969_v54  ;;  %v1607_v37 = vpop.permute.xlu1 %1606  ;;  %v1406_v20 = vpop.permute.xlu0 %1405 }
 0x1fc   : > { %v1523_v56 = vsel %vm5722_vm10, %v1406_v20, %v1522_v32 }
 0x1fd   : > { %1524 = vst [vmem:[#allocation2 + $0x90] sm:$0xf] %v1523_v56  ;;  %v1534_v56 = vld [vmem:[#allocation2 + $0xb0] sm:$0xf] }
 0x1fe   : > { %1679 = vst.msk [vmem:[#allocation2 + $0x90] sm:$0xf] %vm1660_vm11, %v1601_v51 }
 0x1ff   : > { %v1860_v34 = vpop.permute.xlu1 %1859  ;;  %v1605_v30 = vpop.permute.xlu0 %1604 }
 0x201   : > { %v1977_v53 = vld [vmem:[#allocation2 + $0x98] sm:$0xf] }
 0x202   : > { %v1978_v59 = vsel %vm5760_vm14, %v1860_v34, %v1977_v53  ;;  %v4615_v13 = vld [vmem:[#allocation2 + $0x80] ss:$8 sps:$4 sm:$0xff]  }
 0x203   : > { %1979 = vst [vmem:[#allocation2 + $0x98] sm:$0xf] %v1978_v59  ;;  %v1412_v47 = vpop.permute.xlu1 %1411  ;;  %v1858_v35 = vpop.permute.xlu0 %1857  ;;  %2603 = vmatmul.mubr.bf16.gmra.mrb[32].mxu1 %v4615_v13 }
 0x204   : > { %v1532_v42 = vsel %vm5722_vm10, %v1412_v47, %v1531_v19  ;;  %4321 = vmatprep.mubr.msk.bf16.mxu1 %vm2457_vm15, %v4616_v52  ;;  %v4619_v19 = vld [vmem:[#allocation2 + $0xa4] ss:$8 sps:$4 sm:$0xff]  }
 0x205   : > { %1533 = vst [vmem:[#allocation2 + $0xa8] sm:$0xf] %v1532_v42  ;;  %v1974_v36 = vld [vmem:[#allocation2 + $0x90] sm:$0xf] }
 0x206   : > { %1682 = vst.msk [vmem:[#allocation2 + $0xa8] sm:$0xf] %vm1660_vm11, %v1607_v37  ;;  %v1975_v7 = vsel %vm5760_vm14, %v1858_v35, %v1974_v36  ;;  %v1543_v35 = vld [vmem:[#allocation2 + $0xc8] sm:$0xf] }
 0x207   : > { %1976 = vst [vmem:[#allocation2 + $0x90] sm:$0xf] %v1975_v7  ;;  %v1611_v14 = vpop.permute.xlu1 %1610  ;;  %v1410_v5 = vpop.permute.xlu0 %1409 }
 0x208   : > { %v1529_v51 = vsel %vm5722_vm10, %v1410_v5, %v1528_v44 }
 0x209   : > { %1530 = vst [vmem:[#allocation2 + $0xa0] sm:$0xf] %v1529_v51  ;;  %v1540_v51 = vld [vmem:[#allocation2 + $0xc0] sm:$0xf] }
 0x20a   : > { %1681 = vst.msk [vmem:[#allocation2 + $0xa0] sm:$0xf] %vm1660_vm11, %v1605_v30 }
 0x20b   : > { %v1864_v18 = vpop.permute.xlu1 %1863  ;;  %v1609_v38 = vpop.permute.xlu0 %1608 }
 0x20d   : > { %v1983_v23 = vld [vmem:[#allocation2 + $0xa8] sm:$0xf] }
 0x20e   : > { %v1984_v9 = vsel %vm5760_vm14, %v1864_v18, %v1983_v23  ;;  %v4618_v15 = vld [vmem:[#allocation2 + $0x90] ss:$8 sps:$4 sm:$0xff]   ;;  %v2859_v23 = vld [vmem:[%s6752_s5] sm:$0xff] }
 0x20f   : > { %1985 = vst [vmem:[#allocation2 + $0xa8] sm:$0xf] %v1984_v9  ;;  %v1416_v31 = vpop.permute.xlu1 %1415  ;;  %v1862_v2 = vpop.permute.xlu0 %1861  ;;  %2611 = vmatmul.mubr.bf16.gmra.mrb[36].mxu1 %v4618_v15  ;;  %v2860_v9 = vld [vmem:[%s6752_s5 + $0x8] sm:$0xff] }
 0x210   : > { %v1538_v54 = vsel %vm5722_vm10, %v1416_v31, %v1537_v27  ;;  %4322 = vmatprep.mubr.msk.bf16.mxu1 %vm2457_vm15, %v4619_v19  ;;  %v4460_v52 = vpack.c.bf16 %v2860_v9, %v2859_v23 }
 0x211   : > { %1539 = vst [vmem:[#allocation2 + $0xb8] sm:$0xf] %v1538_v54  ;;  %v1980_v37 = vld [vmem:[#allocation2 + $0xa0] sm:$0xf]  ;;  %v4622_v54 = vld [vmem:[#allocation2 + $0xb4] ss:$8 sps:$4 sm:$0xff]  }
 0x212   : > { %1684 = vst.msk [vmem:[#allocation2 + $0xb8] sm:$0xf] %vm1660_vm11, %v1611_v14  ;;  %v1981_v32 = vsel %vm5760_vm14, %v1862_v2, %v1980_v37  ;;  %4461 = vmatprep.subr.bf16.mxu0 %v4460_v52 }
 0x213   : > { %1982 = vst [vmem:[#allocation2 + $0xa0] sm:$0xf] %v1981_v32  ;;  %v1615_v20 = vpop.permute.xlu1 %1614  ;;  %v1414_v34 = vpop.permute.xlu0 %1413  ;;  %4463 = vmatpush3.bf16.msra.mxu0 %v4460_v52  ;;  %v1549_v32 = vld [vmem:[#allocation2 + $0xd8] sm:$0xf]  ;;  %v1552_v52 = vld [vmem:[#allocation2 + $0xe0] sm:$0xf] }
 0x214   : > { %v1535_v30 = vsel %vm5722_vm10, %v1414_v34, %v1534_v56 }
 0x215   : > { %1536 = vst [vmem:[#allocation2 + $0xb0] sm:$0xf] %v1535_v30 }
 0x216   : > { %1683 = vst.msk [vmem:[#allocation2 + $0xb0] sm:$0xf] %vm1660_vm11, %v1609_v38 }
 0x217   : > { %v1868_v53 = vpop.permute.xlu1 %1867  ;;  %v1613_v59 = vpop.permute.xlu0 %1612 }
 0x219   : > { %v1989_v1 = vld [vmem:[#allocation2 + $0xb8] sm:$0xf] }
 0x21a   : > { %v1990_v13 = vsel %vm5760_vm14, %v1868_v53, %v1989_v1  ;;  %v4621_v47 = vld [vmem:[#allocation2 + $0xa0] ss:$8 sps:$4 sm:$0xff]   ;;  %v1546_v1 = vld [vmem:[#allocation2 + $0xd0] sm:$0xf] }
 0x21b   : > { %1991 = vst [vmem:[#allocation2 + $0xb8] sm:$0xf] %v1990_v13  ;;  %v1420_v42 = vpop.permute.xlu1 %1419  ;;  %v1866_v36 = vpop.permute.xlu0 %1865  ;;  %2619 = vmatmul.mubr.bf16.gmra.mrb[40].mxu1 %v4621_v47 }
 0x21c   : > { %v1544_v7 = vsel %vm5722_vm10, %v1420_v42, %v1543_v35  ;;  %4323 = vmatprep.mubr.msk.bf16.mxu1 %vm2457_vm15, %v4622_v54 }
 0x21d   : > { %1545 = vst [vmem:[#allocation2 + $0xc8] sm:$0xf] %v1544_v7  ;;  %v1986_v14 = vld [vmem:[#allocation2 + $0xb0] sm:$0xf]  ;;  %v4625_v7 = vld [vmem:[#allocation2 + $0xc4] ss:$8 sps:$4 sm:$0xff]  }
 0x21e   : > { %1686 = vst.msk [vmem:[#allocation2 + $0xc8] sm:$0xf] %vm1660_vm11, %v1615_v20  ;;  %v1987_v44 = vsel %vm5760_vm14, %v1866_v36, %v1986_v14 }
 0x21f   : > { %1988 = vst [vmem:[#allocation2 + $0xb0] sm:$0xf] %v1987_v44  ;;  %v1619_v5 = vpop.permute.xlu1 %1618  ;;  %v1418_v18 = vpop.permute.xlu0 %1417  ;;  %v1555_v44 = vld [vmem:[#allocation2 + $0xe8] sm:$0xf] }
 0x220   : > { %v1541_v38 = vsel %vm5722_vm10, %v1418_v18, %v1540_v51 }
 0x221   : > { %1542 = vst [vmem:[#allocation2 + $0xc0] sm:$0xf] %v1541_v38 }
 0x222   : > { %1685 = vst.msk [vmem:[#allocation2 + $0xc0] sm:$0xf] %vm1660_vm11, %v1613_v59 }
 0x223   : > { %v1872_v15 = vpop.permute.xlu1 %1871  ;;  %v1617_v27 = vpop.permute.xlu0 %1616 }
 0x225   : > { %v1995_v31 = vld [vmem:[#allocation2 + $0xc8] sm:$0xf] }
 0x226   : > { %v1996_v2 = vsel %vm5760_vm14, %v1872_v15, %v1995_v31  ;;  %v4624_v37 = vld [vmem:[#allocation2 + $0xb0] ss:$8 sps:$4 sm:$0xff]  }
 0x227   : > { %1997 = vst [vmem:[#allocation2 + $0xc8] sm:$0xf] %v1996_v2  ;;  %v1424_v20 = vpop.permute.xlu1 %1423  ;;  %v1870_v56 = vpop.permute.xlu0 %1869  ;;  %2627 = vmatmul.mubr.bf16.gmra.mrb[44].mxu1 %v4624_v37  ;;  %v2861_v31 = vld [vmem:[%s6752_s5 + $0x10] sm:$0xff]  ;;  %v2862_v2 = vld [vmem:[%s6752_s5 + $0x18] sm:$0xff] }
 0x228   : > { %v1550_v34 = vsel %vm5722_vm10, %v1424_v20, %v1549_v32  ;;  %4324 = vmatprep.mubr.msk.bf16.mxu1 %vm2457_vm15, %v4625_v7  ;;  %v4464_v54 = vpack.c.bf16 %v2862_v2, %v2861_v31  ;;  %v1561_v37 = vld [vmem:[#allocation2 + $0xf8] sm:$0xf]  ;;  %v2868_v2 = vld [vmem:[%s6752_s5 + $0x48] sm:$0xff] }
 0x229   : > { %1551 = vst [vmem:[#allocation2 + $0xd8] sm:$0xf] %v1550_v34  ;;  %v1992_v30 = vld [vmem:[#allocation2 + $0xc0] sm:$0xf]  ;;  %v4628_v34 = vld [vmem:[#allocation2 + $0xd4] ss:$8 sps:$4 sm:$0xff]  }
 0x22a   : > { %1688 = vst.msk [vmem:[#allocation2 + $0xd8] sm:$0xf] %vm1660_vm11, %v1619_v5  ;;  %v1993_v53 = vsel %vm5760_vm14, %v1870_v56, %v1992_v30  ;;  %4465 = vmatprep.subr.bf16.mxu0 %v4464_v54 }
 0x22b   : > { %1994 = vst [vmem:[#allocation2 + $0xc0] sm:$0xf] %v1993_v53  ;;  %v1623_v59 = vpop.permute.xlu1 %1622  ;;  %v1422_v13 = vpop.permute.xlu0 %1421  ;;  %4467 = vmatpush3.bf16.msra.mxu0 %v4464_v54  ;;  %v4476_v54 = vpack.c.bf16 %v2868_v2, %v2867_v40 }
 0x22c   : > { %v1547_v19 = vsel %vm5722_vm10, %v1422_v13, %v1546_v1  ;;  %v1558_v1 = vld [vmem:[#allocation2 + $0xf0] sm:$0xf] }
 0x22d   : > { %1548 = vst [vmem:[#allocation2 + $0xd0] sm:$0xf] %v1547_v19 }
 0x22e   : > { %1687 = vst.msk [vmem:[#allocation2 + $0xd0] sm:$0xf] %vm1660_vm11, %v1617_v27 }
 0x22f   : > { %v1876_v47 = vpop.permute.xlu1 %1875  ;;  %v1621_v35 = vpop.permute.xlu0 %1620 }
 0x231   : > { %v2001_v42 = vld [vmem:[#allocation2 + $0xd8] sm:$0xf] }
 0x232   : > { %v2002_v36 = vsel %vm5760_vm14, %v1876_v47, %v2001_v42  ;;  %v4627_v14 = vld [vmem:[#allocation2 + $0xc0] ss:$8 sps:$4 sm:$0xff]  }
 0x233   : > { %2003 = vst [vmem:[#allocation2 + $0xd8] sm:$0xf] %v2002_v36  ;;  %v1428_v5 = vpop.permute.xlu1 %1427  ;;  %v1874_v51 = vpop.permute.xlu0 %1873  ;;  %2635 = vmatmul.mubr.bf16.gmra.mrb[48].mxu1 %v4627_v14 }
 0x234   : > { %v1556_v18 = vsel %vm5722_vm10, %v1428_v5, %v1555_v44  ;;  %4325 = vmatprep.mubr.msk.bf16.mxu1 %vm2457_vm15, %v4628_v34  ;;  %v2864_v44 = vld [vmem:[%s6752_s5 + $0x28] sm:$0xff] }
 0x235   : > { %1557 = vst [vmem:[#allocation2 + $0xe8] sm:$0xf] %v1556_v18  ;;  %v1998_v38 = vld [vmem:[#allocation2 + $0xd0] sm:$0xf] }
 0x236   : > { %1690 = vst.msk [vmem:[#allocation2 + $0xe8] sm:$0xf] %vm1660_vm11, %v1623_v59  ;;  %v1999_v23 = vsel %vm5760_vm14, %v1874_v51, %v1998_v38  ;;  %v4468_v51 = vpack.c.bf16 %v2864_v44, %v2863_v4 }
 0x237   : > { %2000 = vst [vmem:[#allocation2 + $0xd0] sm:$0xf] %v1999_v23  ;;  %v1627_v9 = vpop.permute.xlu1 %1626  ;;  %v1426_v15 = vpop.permute.xlu0 %1425 }
 0x238   : > { %v1553_v27 = vsel %vm5722_vm10, %v1426_v15, %v1552_v52  ;;  %4469 = vmatprep.subr.bf16.mxu0 %v4468_v51  ;;  %v2866_v52 = vld [vmem:[%s6752_s5 + $0x38] sm:$0xff] }
 0x239   : > { %1554 = vst [vmem:[#allocation2 + $0xe0] sm:$0xf] %v1553_v27  ;;  %4471 = vmatpush3.bf16.msra.mxu0 %v4468_v51  ;;  %v4631_v27 = vld [vmem:[#allocation2 + $0xe4] ss:$8 sps:$4 sm:$0xff]  }
 0x23a   : > { %1689 = vst.msk [vmem:[#allocation2 + $0xe0] sm:$0xf] %vm1660_vm11, %v1621_v35 }
 0x23b   : > { %v1432_v32 = vpop.permute.xlu1 %1431  ;;  %v1625_v20 = vpop.permute.xlu0 %1624 }
 0x23c   : > { %v1562_v56 = vsel %vm5722_vm10, %v1432_v32, %v1561_v37  ;;  %v4634_v37 = vld [vmem:[#allocation2 + $0xf4] ss:$8 sps:$4 sm:$0xff]  }
 0x23d   : > { %1563 = vst [vmem:[#allocation2 + $0xf8] sm:$0xf] %v1562_v56  ;;  %v2007_v53 = vld [vmem:[#allocation2 + $0xe8] sm:$0xf]  ;;  %v2869_v32 = vld [vmem:[%s6752_s5 + $0x50] sm:$0xff] }
 0x23e   : > { %1692 = vst.msk [vmem:[#allocation2 + $0xf8] sm:$0xf] %vm1660_vm11, %v1627_v9  ;;  %v4630_v30 = vld [vmem:[#allocation2 + $0xd0] ss:$8 sps:$4 sm:$0xff]  }
 0x23f   : > { %v1880_v59 = vpop.permute.xlu1 %1879  ;;  %v1430_v13 = vpop.permute.xlu0 %1429  ;;  %2643 = vmatmul.mubr.bf16.gmra.mrb[52].mxu1 %v4630_v30  ;;  %v2865_v9 = vld [vmem:[%s6752_s5 + $0x30] sm:$0xff]  ;;  %v2871_v30 = vld [vmem:[%s6752_s5 + $0x60] sm:$0xff] }
 0x240   : > { %v2008_v19 = vsel %vm5760_vm14, %v1880_v59, %v2007_v53  ;;  %v1559_v47 = vsel %vm5722_vm10, %v1430_v13, %v1558_v1  ;;  %v4472_v15 = vpack.c.bf16 %v2866_v52, %v2865_v9  ;;  %4326 = vmatprep.mubr.msk.bf16.mxu1 %vm2457_vm15, %v4631_v27  ;;  %v2872_v53 = vld [vmem:[%s6752_s5 + $0x68] sm:$0xff]  ;;  %v2873_v1 = vld [vmem:[%s6752_s5 + $0x70] sm:$0xff]  ;;  %v2874_v13 = vld [vmem:[%s6752_s5 + $0x78] sm:$0xff] }
 0x241   : > { %2009 = vst [vmem:[#allocation2 + $0xe8] sm:$0xf] %v2008_v19  ;;  %1560 = vst [vmem:[#allocation2 + $0xf0] sm:$0xf] %v1559_v47  ;;  %v2004_v35 = vld [vmem:[#allocation2 + $0xe0] sm:$0xf]  ;;  %v4484_v59 = vpack.c.bf16 %v2872_v53, %v2871_v30  ;;  %v4488_v19 = vpack.c.bf16 %v2874_v13, %v2873_v1 }
 0x242   : > { %1691 = vst.msk [vmem:[#allocation2 + $0xf0] sm:$0xf] %vm1660_vm11, %v1625_v20  ;;  %4473 = vmatprep.subr.bf16.mxu0 %v4472_v15  ;;  %v2870_v20 = vld [vmem:[%s6752_s5 + $0x58] sm:$0xff] }
 0x243   : > { %v1878_v42 = vpop.permute.xlu0 %1877  ;;  %v1884_v14 = vpop.permute.xlu1 %1883  ;;  %4475 = vmatpush3.bf16.msra.mxu0 %v4472_v15  ;;  %v4480_v56 = vpack.c.bf16 %v2870_v20, %v2869_v32 }
 0x244   : > { %v2005_v36 = vsel %vm5760_vm14, %v1878_v42, %v2004_v35  ;;  %4477 = vmatprep.subr.bf16.mxu0 %v4476_v54 }
 0x245   : > { %v2013_v7 = vld [vmem:[#allocation2 + $0xf8] sm:$0xf]  ;;  %2006 = vst [vmem:[#allocation2 + $0xe0] sm:$0xf] %v2005_v36 }
 0x246   : > { %v2014_v5 = vsel %vm5760_vm14, %v1884_v14, %v2013_v7  ;;  %v6047_v14 = vld [vmem:[%s6751_s4] ss:$0 sm:$0xff] }
 0x247   : > { %2015 = vst [vmem:[#allocation2 + $0xf8] sm:$0xf] %v2014_v5  ;;  %v1882_v38 = vpop.permute.xlu0 %1881  ;;  %4479 = vmatpush3.bf16.msra.mxu0 %v4476_v54 }
 0x248   : > { %4481 = vmatprep.subr.bf16.mxu0 %v4480_v56 }
 0x249   : > { %v2010_v18 = vld [vmem:[#allocation2 + $0xf0] sm:$0xf] }
 0x24a   : > { %v2011_v23 = vsel %vm5760_vm14, %v1882_v38, %v2010_v18 }
 0x24b   : > { %2012 = vst [vmem:[#allocation2 + $0xf0] sm:$0xf] %v2011_v23  ;;  %4483 = vmatpush3.bf16.msra.mxu0 %v4480_v56 }
 0x24c   : > { %v4633_v31 = vld [vmem:[#allocation2 + $0xe0] ss:$8 sps:$4 sm:$0xff]   ;;  %4485 = vmatprep.subr.bf16.mxu0 %v4484_v59 }
 0x24d   : > { %2651 = vmatmul.mubr.bf16.gmra.mrb[56].mxu1 %v4633_v31 }
 0x24e   : > { %4327 = vmatprep.mubr.msk.bf16.mxu1 %vm2457_vm15, %v4634_v37 }
 0x24f   : > { %4487 = vmatpush3.bf16.msra.mxu0 %v4484_v59 }
 0x250   : > { %4489 = vmatprep.subr.bf16.mxu0 %v4488_v19 }
 0x252   : > { %v4636_v34 = vld [vmem:[#allocation2 + $0xf0] ss:$8 sps:$4 sm:$0xff]  }
 0x253   : > { %4491 = vmatpush3.bf16.msra.mxu0 %v4488_v19 }
 0x255   : > { %2659 = vmatmul.mubr.bf16.gmra.mrb[60].mxu1 %v4636_v34 }
 0x276   : > { %v2540_v47 = vpop.f32.mrb[0].mxu1 }
 0x277   : > { %v2542_v35 = vpop.f32.mrb[1].mxu1  ;;  %v6056_v38 = vadd.f32 %v6047_v14, %v2540_v47 }
 0x278   : > { %v2543_v42 = vpop.f32.mrb[2].mxu1 }
 0x279   : > { %v2545_v36 = vpop.f32.mrb[3].mxu1  ;;  %v6050_v44 = vadd.f32 %v6047_v14, %v2543_v42  ;;  %v2667_v15 = vrot.slane %v6056_v38, 4 }
 0x27b   : > { %v2673_v23 = vrot.slane %v6050_v44, 4  ;;  %v2668_v2 = vadd.f32 %v2667_v15, %v6056_v38 }
 0x27d   : > { %v2674_v27 = vadd.f32 %v2673_v23, %v6050_v44  ;;  %v2669_v13 = vrot.slane %v2668_v2, 2 }
 0x27f   : > { %v2675_v20 = vrot.slane %v2674_v27, 2 }
 0x281   : > { %v2676_v35 = vadd.f32 %v2675_v20, %v2674_v27 }
 0x282   : > { %v2548_v7 = vpop.f32.mrb[4].mxu1 }
 0x283   : > { %v2550_v4 = vpop.f32.mrb[5].mxu1  ;;  %v6053_v51 = vadd.f32 %v6047_v14, %v2548_v7 }
 0x284   : > { %v2551_v5 = vpop.f32.mrb[6].mxu1 }
 0x285   : > { %v2553_v18 = vpop.f32.mrb[7].mxu1  ;;  %v6060_v9 = vadd.f32 %v6047_v14, %v2551_v5  ;;  %v2679_v52 = vrot.slane %v6053_v51, 4  ;;  %v2670_v5 = vadd.f32 %v2669_v13, %v2668_v2 }
 0x286   : > { %v2677_v18 = vrot.slane %v2676_v35, 1 }
 0x287   : > { %v2685_v31 = vrot.slane %v6060_v9, 4  ;;  %v2680_v40 = vadd.f32 %v2679_v52, %v6053_v51 }
 0x289   : > { %v2686_v56 = vadd.f32 %v2685_v31, %v6060_v9  ;;  %v2681_v30 = vrot.slane %v2680_v40, 2 }
 0x28b   : > { %v2687_v42 = vrot.slane %v2686_v56, 2  ;;  %v2682_v36 = vadd.f32 %v2681_v30, %v2680_v40 }
 0x28d   : > { %v2688_v23 = vadd.f32 %v2687_v42, %v2686_v56  ;;  %v2683_v15 = vrot.slane %v2682_v36, 1 }
 0x28e   : > { %v2556_v54 = vpop.f32.mrb[8].mxu1 }
 0x28f   : > { %v6069_v37 = vadd.f32 %v6047_v14, %v2556_v54  ;;  %v2558_v32 = vpop.f32.mrb[9].mxu1  ;;  %v2671_v54 = vrot.slane %v2670_v5, 1  ;;  %v2689_v27 = vrot.slane %v2688_v23, 1  ;;  %v2684_v30 = vadd.f32 %v2683_v15, %v2682_v36 }
 0x290   : > { %v2559_v34 = vpop.f32.mrb[10].mxu1 }
 0x291   : > { %v2691_v53 = vrot.slane %v6069_v37, 4  ;;  %v6074_v59 = vadd.f32 %v6047_v14, %v2559_v34  ;;  %v2561_v1 = vpop.f32.mrb[11].mxu1 }
 0x292   : > { %v2678_v1 = vadd.f32 %v2677_v18, %v2676_v35 }
 0x293   : > { %v2692_v19 = vadd.f32 %v2691_v53, %v6069_v37  ;;  %v2697_v47 = vrot.slane %v6074_v59, 4 }
 0x295   : > { %v2693_v7 = vrot.slane %v2692_v19, 2  ;;  %v2698_v4 = vadd.f32 %v2697_v47, %v6074_v59 }
 0x297   : > { %v2699_v52 = vrot.slane %v2698_v4, 2  ;;  %v2694_v31 = vadd.f32 %v2693_v7, %v2692_v19  ;;  %v2672_v19 = vadd.f32 %v2671_v54, %v2670_v5  ;;  %v2690_v7 = vadd.f32 %v2689_v27, %v2688_v23 }
 0x299   : > { %v2700_v20 = vadd.f32 %v2699_v52, %v2698_v4  ;;  %v2695_v12 = vrot.slane %v2694_v31, 1  ;;  %v2915_v35 = vsel %vm2914_vm0, %v2678_v1, %v2672_v19 }
 0x29a   : > { %v2564_v32 = vpop.f32.mrb[12].mxu1  ;;  %v2917_v15 = vsel %vm2916_vm1, %v2684_v30, %v2915_v35 }
 0x29b   : > { %v6080_v34 = vadd.f32 %v6047_v14, %v2564_v32  ;;  %v2566_v53 = vpop.f32.mrb[13].mxu1  ;;  %v2701_v18 = vrot.slane %v2700_v20, 1  ;;  %v2696_v4 = vadd.f32 %v2695_v12, %v2694_v31  ;;  %v2918_v5 = vsel %vm1013_vm2, %v2690_v7, %v2917_v15 }
 0x29c   : > { %v2567_v40 = vpop.f32.mrb[14].mxu1 }
 0x29d   : > { %6806 = vst [vmem:[#allocation25_spill] sm:$0xff] %v6080_v34  ;;  %v2703_v2 = vrot.slane %v6080_v34, 4  ;;  %v6084_v56 = vadd.f32 %v6047_v14, %v2567_v40  ;;  %v2569_v13 = vpop.f32.mrb[15].mxu1  ;;  %v2702_v40 = vadd.f32 %v2701_v18, %v2700_v20  ;;  %v2920_v24 = vsel %vm2919_vm3, %v2696_v4, %v2918_v5 }
 0x29f   : > { %v2704_v47 = vadd.f32 %v2703_v2, %v6080_v34  ;;  %v2709_v42 = vrot.slane %v6084_v56, 4  ;;  %v2922_v30 = vsel %vm2921_vm4, %v2702_v40, %v2920_v24 }
 0x2a1   : > { %v2705_v52 = vrot.slane %v2704_v47, 2  ;;  %v2710_v36 = vadd.f32 %v2709_v42, %v6084_v56 }
 0x2a3   : > { %v2706_v32 = vadd.f32 %v2705_v52, %v2704_v47  ;;  %v2711_v53 = vrot.slane %v2710_v36, 2 }
 0x2a5   : > { %v2707_v54 = vrot.slane %v2706_v32, 1  ;;  %v2712_v2 = vadd.f32 %v2711_v53, %v2710_v36 }
 0x2a6   : > { %v2572_v13 = vpop.f32.mrb[16].mxu1 }
 0x2a7   : > { %v2574_v23 = vpop.f32.mrb[17].mxu1  ;;  %v2708_v31 = vadd.f32 %v2707_v54, %v2706_v32  ;;  %v2713_v1 = vrot.slane %v2712_v2, 1  ;;  %v6103_v36 = vadd.f32 %v6047_v14, %v2572_v13 }
 0x2a8   : > { %v2575_v12 = vpop.f32.mrb[18].mxu1 }
 0x2a9   : > { %v2577_v27 = vpop.f32.mrb[19].mxu1  ;;  %v2714_v19 = vadd.f32 %v2713_v1, %v2712_v2  ;;  %v2924_v20 = vsel %vm2923_vm5, %v2708_v31, %v2922_v30  ;;  %v6097_v7 = vadd.f32 %v6047_v14, %v2575_v12  ;;  %v2715_v53 = vrot.slane %v6103_v36, 4 }
 0x2ab   : > { %v2926_v47 = vsel %vm2925_vm6, %v2714_v19, %v2924_v20  ;;  %v2721_v24 = vrot.slane %v6097_v7, 4  ;;  %v2716_v2 = vadd.f32 %v2715_v53, %v6103_v36 }
 0x2ac   : > { %4454 = vmatprep.mubr.f32.mxu0 %v2926_v47 }
 0x2ad   : > { %v2722_v40 = vadd.f32 %v2721_v24, %v6097_v7 }
 0x2af   : > { %v2723_v31 = vrot.slane %v2722_v40, 2 }
 0x2b2   : > { %v2580_v42 = vpop.f32.mrb[20].mxu1 }
 0x2b3   : > { %v2582_v35 = vpop.f32.mrb[21].mxu1  ;;  %v6100_v4 = vadd.f32 %v6047_v14, %v2580_v42  ;;  %v2717_v42 = vrot.slane %v2716_v2, 2 }
 0x2b4   : > { %v2583_v18 = vpop.f32.mrb[22].mxu1 }
 0x2b5   : > { %v2585_v52 = vpop.f32.mrb[23].mxu1  ;;  %v6107_v15 = vadd.f32 %v6047_v14, %v2583_v18  ;;  %v2727_v32 = vrot.slane %v6100_v4, 4 }
 0x2b6   : > { %v2724_v52 = vadd.f32 %v2723_v31, %v2722_v40 }
 0x2b7   : > { %v2733_v5 = vrot.slane %v6107_v15, 4  ;;  %v2728_v54 = vadd.f32 %v2727_v32, %v6100_v4 }
 0x2b9   : > { %v2734_v1 = vadd.f32 %v2733_v5, %v6107_v15  ;;  %v2729_v30 = vrot.slane %v2728_v54, 2  ;;  %v2718_v5 = vadd.f32 %v2717_v42, %v2716_v2 }
 0x2bb   : > { %v2735_v24 = vrot.slane %v2734_v1, 2  ;;  %v2730_v32 = vadd.f32 %v2729_v30, %v2728_v54 }
 0x2bd   : > { %v2736_v33 = vadd.f32 %v2735_v24, %v2734_v1  ;;  %v2731_v61 = vrot.slane %v2730_v32, 1 }
 0x2be   : > { %v2588_v23 = vpop.f32.mrb[24].mxu1 }
 0x2bf   : > { %v6116_v13 = vadd.f32 %v6047_v14, %v2588_v23  ;;  %v2590_v12 = vpop.f32.mrb[25].mxu1  ;;  %v2737_v34 = vrot.slane %v2736_v33, 1  ;;  %v2732_v54 = vadd.f32 %v2731_v61, %v2730_v32 }
 0x2c0   : > { %v2591_v27 = vpop.f32.mrb[26].mxu1  ;;  %v2725_v12 = vrot.slane %v2724_v52, 1 }
 0x2c1   : > { %v2739_v19 = vrot.slane %v6116_v13, 4  ;;  %v6121_v20 = vadd.f32 %v6047_v14, %v2591_v27  ;;  %v2593_v47 = vpop.f32.mrb[27].mxu1  ;;  %v2719_v27 = vrot.slane %v2718_v5, 1 }
 0x2c2   : > { %v2726_v62 = vadd.f32 %v2725_v12, %v2724_v52 }
 0x2c3   : > { %v2740_v35 = vadd.f32 %v2739_v19, %v6116_v13  ;;  %v2745_v18 = vrot.slane %v6121_v20, 4  ;;  %v2720_v42 = vadd.f32 %v2719_v27, %v2718_v5 }
 0x2c5   : > { %v2741_v53 = vrot.slane %v2740_v35, 2  ;;  %v2746_v23 = vadd.f32 %v2745_v18, %v6121_v20 }
 0x2c7   : > { %v2747_v43 = vrot.slane %v2746_v23, 2  ;;  %v2742_v6 = vadd.f32 %v2741_v53, %v2740_v35  ;;  %v2738_v53 = vadd.f32 %v2737_v34, %v2736_v33 }
 0x2c9   : > { %v2748_v40 = vadd.f32 %v2747_v43, %v2746_v23  ;;  %v2743_v30 = vrot.slane %v2742_v6, 1 }
 0x2ca   : > { %v2596_v11 = vpop.f32.mrb[28].mxu1 }
 0x2cb   : > { %v6127_v47 = vadd.f32 %v6047_v14, %v2596_v11  ;;  %v2598_v19 = vpop.f32.mrb[29].mxu1  ;;  %v2927_v11 = vsel %vm2914_vm0, %v2726_v62, %v2720_v42  ;;  %v2749_v52 = vrot.slane %v2748_v40, 1  ;;  %v2744_v23 = vadd.f32 %v2743_v30, %v2742_v6 }
 0x2cc   : > { %v2599_v31 = vpop.f32.mrb[30].mxu1  ;;  %v2928_v43 = vsel %vm2916_vm1, %v2732_v54, %v2927_v11 }
 0x2cd   : > { %v2751_v18 = vrot.slane %v6127_v47, 4  ;;  %v6131_v2 = vadd.f32 %v6047_v14, %v2599_v31  ;;  %v2601_v1 = vpop.f32.mrb[31].mxu1  ;;  %v2929_v31 = vsel %vm1013_vm2, %v2738_v53, %v2928_v43 }
 0x2ce   : > { %v2750_v1 = vadd.f32 %v2749_v52, %v2748_v40 }
 0x2cf   : > { %v2752_v35 = vadd.f32 %v2751_v18, %v6127_v47  ;;  %v2757_v24 = vrot.slane %v6131_v2, 4  ;;  %v2930_v18 = vsel %vm2919_vm3, %v2744_v23, %v2929_v31 }
 0x2d0   : > { %v2931_v54 = vsel %vm2921_vm4, %v2750_v1, %v2930_v18 }
 0x2d1   : > { %v2753_v61 = vrot.slane %v2752_v35, 2  ;;  %v2758_v32 = vadd.f32 %v2757_v24, %v6131_v2 }
 0x2d3   : > { %v2754_v12 = vadd.f32 %v2753_v61, %v2752_v35  ;;  %v2759_v19 = vrot.slane %v2758_v32, 2 }
 0x2d5   : > { %v2755_v5 = vrot.slane %v2754_v12, 1  ;;  %v2760_v27 = vadd.f32 %v2759_v19, %v2758_v32 }
 0x2d6   : > { %v2604_v45 = vpop.f32.mrb[32].mxu1 }
 0x2d7   : > { %v2756_v3 = vadd.f32 %v2755_v5, %v2754_v12  ;;  %v2761_v62 = vrot.slane %v2760_v27, 1  ;;  %v2606_v33 = vpop.f32.mrb[33].mxu1  ;;  %v6150_v23 = vadd.f32 %v6047_v14, %v2604_v45 }
 0x2d8   : > { %v2607_v34 = vpop.f32.mrb[34].mxu1 }
 0x2d9   : > { %v2762_v6 = vadd.f32 %v2761_v62, %v2760_v27  ;;  %v2609_v30 = vpop.f32.mrb[35].mxu1  ;;  %v2932_v42 = vsel %vm2923_vm5, %v2756_v3, %v2931_v54  ;;  %v6144_v11 = vadd.f32 %v6047_v14, %v2607_v34  ;;  %6809 = vst [vmem:[#allocation28_spill] sm:$0xff] %v6150_v23  ;;  %v2763_v12 = vrot.slane %v6150_v23, 4 }
 0x2db   : > { %v2933_v35 = vsel %vm2925_vm6, %v2762_v6, %v2932_v42  ;;  %6807 = vst [vmem:[#allocation26_spill] sm:$0xff] %v6144_v11  ;;  %v2769_v61 = vrot.slane %v6144_v11, 4  ;;  %v2764_v5 = vadd.f32 %v2763_v12, %v6150_v23 }
 0x2dc   : > { %4455 = vmatmul.mubr.f32.vlgmr.msra.gmra.mrb[64].mxu0 %v2933_v35 }
 0x2dd   : > { %v2770_v19 = vadd.f32 %v2769_v61, %v6144_v11  ;;  %v2765_v35 = vrot.slane %v2764_v5, 2 }
 0x2df   : > { %v2771_v62 = vrot.slane %v2770_v19, 2 }
 0x2e2   : > { %v2612_v24 = vpop.f32.mrb[36].mxu1 }
 0x2e3   : > { %v2614_v40 = vpop.f32.mrb[37].mxu1  ;;  %v6147_v52 = vadd.f32 %v6047_v14, %v2612_v24 }
 0x2e4   : > { %v2615_v53 = vpop.f32.mrb[38].mxu1 }
 0x2e5   : > { %6808 = vst [vmem:[#allocation27_spill] sm:$0xff] %v6147_v52  ;;  %v2617_v43 = vpop.f32.mrb[39].mxu1  ;;  %v6154_v3 = vadd.f32 %v6047_v14, %v2615_v53  ;;  %v2775_v32 = vrot.slane %v6147_v52, 4  ;;  %v2772_v53 = vadd.f32 %v2771_v62, %v2770_v19 }
 0x2e7   : > { %6810 = vst [vmem:[#allocation29_spill] sm:$0xff] %v6154_v3  ;;  %v2781_v31 = vrot.slane %v6154_v3, 4  ;;  %v2776_v1 = vadd.f32 %v2775_v32, %v6147_v52 }
 0x2e9   : > { %v2782_v33 = vadd.f32 %v2781_v31, %v6154_v3  ;;  %v2777_v54 = vrot.slane %v2776_v1, 2  ;;  %v2766_v31 = vadd.f32 %v2765_v35, %v2764_v5 }
 0x2eb   : > { %v2783_v43 = vrot.slane %v2782_v33, 2  ;;  %v2778_v61 = vadd.f32 %v2777_v54, %v2776_v1 }
 0x2ed   : > { %v2779_v3 = vrot.slane %v2778_v61, 1 }
 0x2ee   : > { %v2620_v27 = vpop.f32.mrb[40].mxu1 }
 0x2ef   : > { %v6163_v45 = vadd.f32 %v6047_v14, %v2620_v27  ;;  %v2622_v18 = vpop.f32.mrb[41].mxu1  ;;  %v2773_v27 = vrot.slane %v2772_v53, 1  ;;  %v2780_v1 = vadd.f32 %v2779_v3, %v2778_v61 }
 0x2f0   : > { %v2623_v34 = vpop.f32.mrb[42].mxu1  ;;  %v2784_v18 = vadd.f32 %v2783_v43, %v2782_v33 }
 0x2f1   : > { %6811 = vst [vmem:[#allocation30_spill] sm:$0xff] %v6163_v45  ;;  %v2787_v6 = vrot.slane %v6163_v45, 4  ;;  %v6168_v30 = vadd.f32 %v6047_v14, %v2623_v34  ;;  %v2625_v42 = vpop.f32.mrb[43].mxu1  ;;  %v2767_v34 = vrot.slane %v2766_v31, 1 }
 0x2f2   : > { %v2785_v21 = vrot.slane %v2784_v18, 1 }
 0x2f3   : > { %6812 = vst [vmem:[#allocation31_spill] sm:$0xff] %v6168_v30  ;;  %v2788_v24 = vadd.f32 %v2787_v6, %v6163_v45  ;;  %v2793_v40 = vrot.slane %v6168_v30, 4  ;;  %v2774_v45 = vadd.f32 %v2773_v27, %v2772_v53  ;;  %v2768_v35 = vadd.f32 %v2767_v34, %v2766_v31 }
 0x2f5   : > { %v2789_v32 = vrot.slane %v2788_v24, 2  ;;  %v2794_v12 = vadd.f32 %v2793_v40, %v6168_v30 }
 0x2f7   : > { %v2795_v52 = vrot.slane %v2794_v12, 2  ;;  %v2790_v23 = vadd.f32 %v2789_v32, %v2788_v24  ;;  %v2786_v32 = vadd.f32 %v2785_v21, %v2784_v18 }
 0x2f9   : > { %v2796_v19 = vadd.f32 %v2795_v52, %v2794_v12  ;;  %v2791_v54 = vrot.slane %v2790_v23, 1 }
 0x2fa   : > { %v2628_v11 = vpop.f32.mrb[44].mxu1 }
 0x2fb   : > { %v6174_v42 = vadd.f32 %v6047_v14, %v2628_v11  ;;  %v2630_v6 = vpop.f32.mrb[45].mxu1  ;;  %v2934_v11 = vsel %vm2914_vm0, %v2774_v45, %v2768_v35  ;;  %v2797_v53 = vrot.slane %v2796_v19, 1  ;;  %v2792_v27 = vadd.f32 %v2791_v54, %v2790_v23 }
 0x2fc   : > { %v2631_v62 = vpop.f32.mrb[46].mxu1  ;;  %v2935_v61 = vsel %vm2916_vm1, %v2780_v1, %v2934_v11 }
 0x2fd   : > { %6813 = vst [vmem:[#allocation32_spill] sm:$0xff] %v6174_v42  ;;  %v2799_v40 = vrot.slane %v6174_v42, 4  ;;  %v6178_v5 = vadd.f32 %v6047_v14, %v2631_v62  ;;  %v2633_v33 = vpop.f32.mrb[47].mxu1  ;;  %v2798_v62 = vadd.f32 %v2797_v53, %v2796_v19 }
 0x2fe   : > { %v2936_v33 = vsel %vm1013_vm2, %v2786_v32, %v2935_v61 }
 0x2ff   : > { %6814 = vst [vmem:[#allocation33_spill] sm:$0xff] %v6178_v5  ;;  %v2800_v24 = vadd.f32 %v2799_v40, %v6174_v42  ;;  %v2805_v43 = vrot.slane %v6178_v5, 4  ;;  %v2937_v40 = vsel %vm2919_vm3, %v2792_v27, %v2936_v33 }
 0x300   : > { %v2938_v23 = vsel %vm2921_vm4, %v2798_v62, %v2937_v40 }
 0x301   : > { %v2801_v52 = vrot.slane %v2800_v24, 2  ;;  %v2806_v3 = vadd.f32 %v2805_v43, %v6178_v5 }
 0x303   : > { %v2802_v12 = vadd.f32 %v2801_v52, %v2800_v24  ;;  %v2807_v6 = vrot.slane %v2806_v3, 2 }
 0x305   : > { %v2803_v31 = vrot.slane %v2802_v12, 1  ;;  %v2808_v34 = vadd.f32 %v2807_v6, %v2806_v3 }
 0x306   : > { %v2636_v42 = vpop.f32.mrb[48].mxu1 }
 0x307   : > { %v2638_v30 = vpop.f32.mrb[49].mxu1  ;;  %v2804_v45 = vadd.f32 %v2803_v31, %v2802_v12  ;;  %v2809_v21 = vrot.slane %v2808_v34, 1  ;;  %v6197_v32 = vadd.f32 %v6047_v14, %v2636_v42 }
 0x308   : > { %v2639_v18 = vpop.f32.mrb[50].mxu1 }
 0x309   : > { %v2641_v54 = vpop.f32.mrb[51].mxu1  ;;  %v2810_v35 = vadd.f32 %v2809_v21, %v2808_v34  ;;  %v2939_v1 = vsel %vm2923_vm5, %v2804_v45, %v2938_v23  ;;  %v6191_v19 = vadd.f32 %v6047_v14, %v2639_v18  ;;  %6817 = vst [vmem:[#allocation36_spill] sm:$0xff] %v6197_v32  ;;  %v2811_v12 = vrot.slane %v6197_v32, 4 }
 0x30b   : > { %v2940_v24 = vsel %vm2925_vm6, %v2810_v35, %v2939_v1  ;;  %6815 = vst [vmem:[#allocation34_spill] sm:$0xff] %v6191_v19  ;;  %v2817_v52 = vrot.slane %v6191_v19, 4  ;;  %v2812_v42 = vadd.f32 %v2811_v12, %v6197_v32 }
 0x30c   : > { %4457 = vmatprep.mubr.f32.mxu0 %v2940_v24 }
 0x30d   : > { %v2818_v6 = vadd.f32 %v2817_v52, %v6191_v19  ;;  %v2813_v45 = vrot.slane %v2812_v42, 2 }
 0x30f   : > { %v2819_v31 = vrot.slane %v2818_v6, 2 }
 0x311   : > { %v2820_v54 = vadd.f32 %v2819_v31, %v2818_v6 }
 0x312   : > { %v2644_v43 = vpop.f32.mrb[52].mxu1 }
 0x313   : > { %v6194_v11 = vadd.f32 %v6047_v14, %v2644_v43  ;;  %v2646_v30 = vpop.f32.mrb[53].mxu1  ;;  %v2821_v12 = vrot.slane %v2820_v54, 1 }
 0x314   : > { %v2647_v53 = vpop.f32.mrb[54].mxu1 }
 0x315   : > { %6816 = vst [vmem:[#allocation35_spill] sm:$0xff] %v6194_v11  ;;  %v2649_v27 = vpop.f32.mrb[55].mxu1  ;;  %v2823_v3 = vrot.slane %v6194_v11, 4  ;;  %v6202_v61 = vadd.f32 %v6047_v14, %v2647_v53 }
 0x316   : > { %v2814_v27 = vadd.f32 %v2813_v45, %v2812_v42 }
 0x317   : > { %6818 = vst [vmem:[#allocation37_spill] sm:$0xff] %v6202_v61  ;;  %v2824_v62 = vadd.f32 %v2823_v3, %v6194_v11  ;;  %v2829_v33 = vrot.slane %v6202_v61, 4 }
 0x319   : > { %v2825_v34 = vrot.slane %v2824_v62, 2  ;;  %v2830_v40 = vadd.f32 %v2829_v33, %v6202_v61 }
 0x31b   : > { %v2826_v35 = vadd.f32 %v2825_v34, %v2824_v62  ;;  %v2831_v1 = vrot.slane %v2830_v40, 2  ;;  %v2815_v62 = vrot.slane %v2814_v27, 1 }
 0x31d   : > { %v2827_v33 = vrot.slane %v2826_v35, 1 }
 0x31f   : > { %v2828_v42 = vadd.f32 %v2827_v33, %v2826_v35 }
 0x320   : > { %v2652_v21 = vpop.f32.mrb[56].mxu1 }
 0x321   : > { %v6211_v18 = vadd.f32 %v6047_v14, %v2652_v21  ;;  %v2654_v23 = vpop.f32.mrb[57].mxu1  ;;  %v2832_v21 = vadd.f32 %v2831_v1, %v2830_v40 }
 0x322   : > { %v2655_v24 = vpop.f32.mrb[58].mxu1 }
 0x323   : > { %6819 = vst [vmem:[#allocation38_spill] sm:$0xff] %v6211_v18  ;;  %v2835_v43 = vrot.slane %v6211_v18, 4  ;;  %v6215_v30 = vadd.f32 %v6047_v14, %v2655_v24  ;;  %v2657_v53 = vpop.f32.mrb[59].mxu1  ;;  %v2833_v45 = vrot.slane %v2832_v21, 1 }
 0x324   : > { %v2822_v53 = vadd.f32 %v2821_v12, %v2820_v54 }
 0x325   : > { %6820 = vst [vmem:[#allocation39_spill] sm:$0xff] %v6215_v30  ;;  %v2836_v52 = vadd.f32 %v2835_v43, %v6211_v18  ;;  %v2841_v3 = vrot.slane %v6215_v30, 4 }
 0x327   : > { %v2837_v5 = vrot.slane %v2836_v52, 2  ;;  %v2842_v6 = vadd.f32 %v2841_v3, %v6215_v30  ;;  %v2816_v3 = vadd.f32 %v2815_v62, %v2814_v27 }
 0x328   : > { %v2660_v31 = vpop.f32.mrb[60].mxu1 }
 0x329   : > { %v2838_v34 = vadd.f32 %v2837_v5, %v2836_v52  ;;  %v2843_v23 = vrot.slane %v2842_v6, 2  ;;  %v6221_v11 = vadd.f32 %v6047_v14, %v2660_v31  ;;  %v2662_v24 = vpop.f32.mrb[61].mxu1  ;;  %v2941_v31 = vsel %vm2914_vm0, %v2822_v53, %v2816_v3 }
 0x32a   : > { %v2663_v43 = vpop.f32.mrb[62].mxu1  ;;  %v2834_v24 = vadd.f32 %v2833_v45, %v2832_v21 }
 0x32b   : > { %6821 = vst [vmem:[#allocation40_spill] sm:$0xff] %v6221_v11  ;;  %v2839_v18 = vrot.slane %v2838_v34, 1  ;;  %v2844_v61 = vadd.f32 %v2843_v23, %v2842_v6  ;;  %v2847_v32 = vrot.slane %v6221_v11, 4  ;;  %v6225_v40 = vadd.f32 %v6047_v14, %v2663_v43  ;;  %v2665_v1 = vpop.f32.mrb[63].mxu1 }
 0x32c   : > { %v2942_v6 = vsel %vm2916_vm1, %v2828_v42, %v2941_v31  ;;  %v3064_v31 = vsub.s32 3, %v5252_v39 }
 0x32d   : > { %6822 = vst [vmem:[#allocation41_spill] sm:$0xff] %v6225_v40  ;;  %v2848_v5 = vadd.f32 %v2847_v32, %v6221_v11  ;;  %v2853_v52 = vrot.slane %v6225_v40, 4  ;;  %v2845_v54 = vrot.slane %v2844_v61, 1  ;;  %v2840_v35 = vadd.f32 %v2839_v18, %v2838_v34 }
 0x32e   : > { %v2943_v43 = vsel %vm1013_vm2, %v2834_v24, %v2942_v6  ;;  %v3057_v24 = vsub.s32 2, %v5252_v39  ;;  %v6254_v6 = vsub.s32 7, %v5252_v39  ;;  %vm3298_vm2 = vcmask 1041408  }
 0x32f   : > { %v2849_v12 = vrot.slane %v2848_v5, 2  ;;  %v2854_v33 = vadd.f32 %v2853_v52, %v6225_v40  ;;  %v2846_v14 = vadd.f32 %v2845_v54, %v2844_v61  ;;  %v2944_v32 = vsel %vm2919_vm3, %v2840_v35, %v2943_v43  ;;  %v4328_v61 = vld [vmem:[%s6753_s6] ss:$0 sm:$0xff] }
 0x331   : > { %v2850_v23 = vadd.f32 %v2849_v12, %v2848_v5  ;;  %v2855_v30 = vrot.slane %v2854_v33, 2  ;;  %v2945_v21 = vsel %vm2921_vm4, %v2846_v14, %v2944_v32  ;;  %v6248_v12 = vsub.s32 5, %v5252_v39 }
 0x333   : > { %v2851_v27 = vrot.slane %v2850_v23, 1  ;;  %v2856_v62 = vadd.f32 %v2855_v30, %v2854_v33  ;;  %v6241_v30 = vsub.s32 0, %v5252_v39  ;;  %v6251_v33 = vsub.s32 4, %v5252_v39 }
 0x335   : > { %v2852_v1 = vadd.f32 %v2851_v27, %v2850_v23  ;;  %v2857_v11 = vrot.slane %v2856_v62, 1  ;;  %v6259_v27 = vsub.s32 6, %v5252_v39 }
 0x337   : > { %v2858_v53 = vadd.f32 %v2857_v11, %v2856_v62  ;;  %v2946_v18 = vsel %vm2923_vm5, %v2852_v1, %v2945_v21 }
 0x339   : > { %v2947_v34 = vsel %vm2925_vm6, %v2858_v53, %v2946_v18 }
 0x33a   : > { %4458 = vmatmul.mubr.f32.gmra.mrb[66].mxu0 %v2947_v34 }
 0x3af   : > { %v4456_v42 = vpop.f32.mrb[64].mxu0 }
 0x3b0   : > { %v3024_v45 = vadd.f32 %v4456_v42, %v4328_v61  ;;  %v3018_v3 = vpop.f32.mrb[65].mxu0 }
 0x3b1   : > { %v3019_v23 = vadd.f32 %v4328_v61, %v3018_v3 }
 0x3b2   : > { %v3038_v5 = vmax.f32 %v3024_v45, 0.0 }
 0x3b3   : > { %v3037_v62 = vmax.f32 %v3019_v23, 0.0 }
 0x3b4   : > { %v3107_v52 = vrot.slane %v3038_v5, %v5259_v41  ;;  %v3100_v11 = vrot.slane %v3038_v5, %v6241_v30  ;;  %v3121_v54 = vrot.slane %v3038_v5, %v3064_v31  ;;  %v3114_v35 = vrot.slane %v3038_v5, %v3057_v24 }
 0x3b5   : > { %v3135_v14 = vrot.slane %v3038_v5, %v6248_v12  ;;  %v3128_v43 = vrot.slane %v3038_v5, %v6251_v33  ;;  %v3149_v32 = vrot.slane %v3038_v5, %v6254_v6  ;;  %v3142_v1 = vrot.slane %v3038_v5, %v6259_v27 }
 0x3b6   : > { %3109 = vbcast.lane.b32.xlu1 %v3107_v52, 256  ;;  %3102 = vbcast.lane.b32.xlu0 %v3100_v11, 256  ;;  %v3051_v21 = vrot.slane %v3037_v62, %v5259_v41  ;;  %v3044_v53 = vrot.slane %v3037_v62, %v6241_v30  ;;  %v3065_v18 = vrot.slane %v3037_v62, %v3064_v31 }
 0x3b7   : > { %v3058_v34 = vrot.slane %v3037_v62, %v3057_v24  ;;  %v3079_v39 = vrot.slane %v3037_v62, %v6248_v12  ;;  %v3072_v42 = vrot.slane %v3037_v62, %v6251_v33  ;;  %v3093_v45 = vrot.slane %v3037_v62, %v6254_v6 }
 0x3b8   : > { %v3086_v3 = vrot.slane %v3037_v62, %v6259_v27 }
 0x3ba   : > { %3123 = vbcast.lane.b32.xlu1 %v3121_v54, 256  ;;  %3116 = vbcast.lane.b32.xlu0 %v3114_v35, 256 }
 0x3be   : > { %3137 = vbcast.lane.b32.xlu1 %v3135_v14, 256  ;;  %3130 = vbcast.lane.b32.xlu0 %v3128_v43, 256 }
 0x3c2   : > { %3151 = vbcast.lane.b32.xlu1 %v3149_v32, 256  ;;  %3144 = vbcast.lane.b32.xlu0 %v3142_v1, 256 }
 0x3c6   : > { %3053 = vbcast.lane.b32.xlu1 %v3051_v21, 256  ;;  %3046 = vbcast.lane.b32.xlu0 %v3044_v53, 256 }
 0x3ca   : > { %3067 = vbcast.lane.b32.xlu1 %v3065_v18, 256  ;;  %3060 = vbcast.lane.b32.xlu0 %v3058_v34, 256 }
 0x3ce   : > { %3081 = vbcast.lane.b32.xlu1 %v3079_v39, 256  ;;  %3074 = vbcast.lane.b32.xlu0 %v3072_v42, 256  ;;  %v6286_v39 = vld [vmem:[%s6754_s7] sm:$0x3] }
 0x3d2   : > { %3095 = vbcast.lane.b32.xlu1 %v3093_v45, 256  ;;  %3088 = vbcast.lane.b32.xlu0 %v3086_v3, 256 }
 0x40d   : > { %v4459_v5 = vpop.f32.mrb[66].mxu0 }
 0x40e   : > { %v3034_v52 = vadd.f32 %v4459_v5, %v4328_v61  ;;  %v3028_v11 = vpop.f32.mrb[67].mxu0 }
 0x40f   : > { %v3029_v14 = vadd.f32 %v4328_v61, %v3028_v11  ;;  %v4765_v11 = vld [vmem:[%s6749_s2] sm:$0x3] }
 0x410   : > { %v6269_v54 = vmax.f32 %v3034_v52, 0.0 }
 0x411   : > { %v3039_v32 = vmax.f32 %v3029_v14, 0.0 }
 0x412   : > { %v3219_v35 = vrot.slane %v6269_v54, %v5259_v41  ;;  %v3212_v23 = vrot.slane %v6269_v54, %v6241_v30  ;;  %v3233_v43 = vrot.slane %v6269_v54, %v3064_v31  ;;  %v3226_v62 = vrot.slane %v6269_v54, %v3057_v24 }
 0x413   : > { %v3247_v1 = vrot.slane %v6269_v54, %v6248_v12  ;;  %v3240_v21 = vrot.slane %v6269_v54, %v6251_v33  ;;  %v3163_v53 = vrot.slane %v3039_v32, %v5259_v41  ;;  %v3156_v18 = vrot.slane %v3039_v32, %v6241_v30 }
 0x414   : > { %3221 = vbcast.lane.b32.xlu1 %v3219_v35, 256  ;;  %3214 = vbcast.lane.b32.xlu0 %v3212_v23, 256  ;;  %v3177_v61 = vrot.slane %v3039_v32, %v3064_v31  ;;  %v3170_v34 = vrot.slane %v3039_v32, %v3057_v24  ;;  %v3191_v42 = vrot.slane %v3039_v32, %v6248_v12 }
 0x415   : > { %v3184_v45 = vrot.slane %v3039_v32, %v6251_v33  ;;  %v3205_v24 = vrot.slane %v3039_v32, %v6254_v6  ;;  %v3198_v52 = vrot.slane %v3039_v32, %v6259_v27  ;;  %v6298_v12 = vrot.slane %v4765_v11, %v6241_v30 }
 0x417   : > { %v6304_v32 = vadd.f32 %v5365_v17, %v6298_v12  ;;  %v6318_v17 = vadd.f32 %v5394_v50, %v6298_v12  ;;  %v6328_v50 = vadd.f32 %v5425_v16, %v6298_v12 }
 0x418   : > { %3235 = vbcast.lane.b32.xlu1 %v3233_v43, 256  ;;  %3228 = vbcast.lane.b32.xlu0 %v3226_v62, 256 }
 0x41c   : > { %3249 = vbcast.lane.b32.xlu1 %v3247_v1, 256  ;;  %3242 = vbcast.lane.b32.xlu0 %v3240_v21, 256 }
 0x420   : > { %3165 = vbcast.lane.b32.xlu1 %v3163_v53, 256  ;;  %3158 = vbcast.lane.b32.xlu0 %v3156_v18, 256 }
 0x424   : > { %3179 = vbcast.lane.b32.xlu1 %v3177_v61, 256  ;;  %3172 = vbcast.lane.b32.xlu0 %v3170_v34, 256  ;;  %v3261_v61 = vrot.slane %v6269_v54, %v6254_v6  ;;  %v3254_v34 = vrot.slane %v6269_v54, %v6259_v27 }
 0x428   : > { %v3110_v3 = vpop.permute.xlu1 %3109  ;;  %v3103_v41 = vpop.permute.xlu0 %3102  ;;  %3193 = vbcast.lane.b32.xlu1 %v3191_v42, 256  ;;  %3186 = vbcast.lane.b32.xlu0 %v3184_v45, 256  ;;  %v6314_v42 = vadd.f32 %v5377_v26, %v6298_v12  ;;  %v6324_v26 = vadd.f32 %v5406_v57, %v6298_v12  ;;  %v6338_v57 = vadd.f32 %v5455_v48, %v6298_v12 }
 0x429   : > { %v3275_v5 = vmul.f32 %v6286_v39, %v3110_v3  ;;  %v3274_v31 = vmul.f32 %v6286_v39, %v3103_v41 }
 0x42b   : > { %v3362_v33 = vsel %vm3298_vm2, %v3275_v5, 0.0  ;;  %v3355_v35 = vsel %vm3298_vm2, %v3274_v31, 0.0 }
 0x42c   : > { %v3363_v23 = vrot.slane %v3362_v33, 4  ;;  %v3356_v14 = vrot.slane %v3355_v35, 4  ;;  %v3124_v43 = vpop.permute.xlu1 %3123  ;;  %v3117_v62 = vpop.permute.xlu0 %3116  ;;  %3207 = vbcast.lane.b32.xlu1 %v3205_v24, 256  ;;  %3200 = vbcast.lane.b32.xlu0 %v3198_v52, 256 }
 0x42d   : > { %v3277_v1 = vmul.f32 %v6286_v39, %v3124_v43  ;;  %v3276_v21 = vmul.f32 %v6286_v39, %v3117_v62 }
 0x42e   : > { %v3364_v53 = vadd.f32 %v3363_v23, %v3362_v33  ;;  %v3357_v18 = vadd.f32 %v3356_v14, %v3355_v35  ;;  %v6334_v14 = vadd.f32 %v5436_v25, %v6298_v12 }
 0x42f   : > { %v3376_v45 = vsel %vm3298_vm2, %v3277_v1, 0.0  ;;  %v3369_v3 = vsel %vm3298_vm2, %v3276_v21, 0.0 }
 0x430   : > { %v3365_v41 = vrot.slane %v3364_v53, 2  ;;  %v3358_v5 = vrot.slane %v3357_v18, 2  ;;  %v3377_v31 = vrot.slane %v3376_v45, 4  ;;  %v3370_v24 = vrot.slane %v3369_v3, 4  ;;  %v3138_v6 = vpop.permute.xlu1 %3137  ;;  %v3131_v52 = vpop.permute.xlu0 %3130  ;;  %3263 = vbcast.lane.b32.xlu1 %v3261_v61, 256  ;;  %3256 = vbcast.lane.b32.xlu0 %v3254_v34, 256 }
 0x431   : > { %v3279_v27 = vmul.f32 %v6286_v39, %v3138_v6  ;;  %v3278_v54 = vmul.f32 %v6286_v39, %v3131_v52  ;;  %v6345_v34 = vld [vmem:[%s6755_s8] ss:$0 sm:$0xff] }
 0x432   : > { %v3366_v11 = vadd.f32 %v3365_v41, %v3364_v53  ;;  %v3359_v33 = vadd.f32 %v3358_v5, %v3357_v18  ;;  %v3378_v35 = vadd.f32 %v3377_v31, %v3376_v45  ;;  %v3371_v23 = vadd.f32 %v3370_v24, %v3369_v3 }
 0x433   : > { %v3390_v43 = vsel %vm3298_vm2, %v3279_v27, 0.0  ;;  %v3383_v16 = vsel %vm3298_vm2, %v3278_v54, 0.0 }
 0x434   : > { %v3367_v62 = vrot.slane %v3366_v11, 1  ;;  %v3360_v1 = vrot.slane %v3359_v33, 1  ;;  %v3379_v21 = vrot.slane %v3378_v35, 2  ;;  %v3372_v61 = vrot.slane %v3371_v23, 2  ;;  %v3152_v53 = vpop.permute.xlu1 %3151  ;;  %v3145_v18 = vpop.permute.xlu0 %3144 }
 0x435   : > { %v3391_v25 = vrot.slane %v3390_v43, 4  ;;  %v3384_v45 = vrot.slane %v3383_v16, 4  ;;  %v3281_v48 = vmul.f32 %v6286_v39, %v3152_v53  ;;  %v3280_v3 = vmul.f32 %v6286_v39, %v3145_v18 }
 0x436   : > { %v3368_v41 = vadd.f32 %v3367_v62, %v3366_v11  ;;  %v3361_v5 = vadd.f32 %v3360_v1, %v3359_v33  ;;  %v3380_v31 = vadd.f32 %v3379_v21, %v3378_v35  ;;  %v3373_v24 = vadd.f32 %v3372_v61, %v3371_v23 }
 0x437   : > { %v3392_v6 = vadd.f32 %v3391_v25, %v3390_v43  ;;  %v3385_v52 = vadd.f32 %v3384_v45, %v3383_v16  ;;  %v3404_v27 = vsel %vm3298_vm2, %v3281_v48, 0.0  ;;  %v3397_v54 = vsel %vm3298_vm2, %v3280_v3, 0.0 }
 0x438   : > { %v3539_v40 = vadd.f32 %v6345_v34, %v3368_v41  ;;  %v3538_v19 = vadd.f32 %v6345_v34, %v3361_v5  ;;  %v3381_v10 = vrot.slane %v3380_v31, 1  ;;  %v3374_v8 = vrot.slane %v3373_v24, 1  ;;  %v3054_v28 = vpop.permute.xlu1 %3053  ;;  %v3047_v61 = vpop.permute.xlu0 %3046 }
 0x439   : > { %v3393_v53 = vrot.slane %v3392_v6, 2  ;;  %v3386_v55 = vrot.slane %v3385_v52, 2  ;;  %v3405_v18 = vrot.slane %v3404_v27, 4  ;;  %v3398_v11 = vrot.slane %v3397_v54, 4 }
 0x43a   : > { %v4339_v33 = vmul.f32 -1.442695, %v3539_v40  ;;  %v4338_v35 = vmul.f32 -1.442695, %v3538_v19  ;;  %v3382_v23 = vadd.f32 %v3381_v10, %v3380_v31  ;;  %v3375_v43 = vadd.f32 %v3374_v8, %v3373_v24 }
 0x43b   : > { %v3394_v16 = vadd.f32 %v3393_v53, %v3392_v6  ;;  %v3387_v62 = vadd.f32 %v3386_v55, %v3385_v52  ;;  %v3406_v1 = vadd.f32 %v3405_v18, %v3404_v27  ;;  %v3399_v21 = vadd.f32 %v3398_v11, %v3397_v54 }
 0x43c   : > { %4637 = vpow2.f32 %v4339_v33  ;;  %v3541_v25 = vadd.f32 %v6345_v34, %v3382_v23  ;;  %v3540_v45 = vadd.f32 %v6345_v34, %v3375_v43  ;;  %v3267_v48 = vmul.f32 %v6286_v39, %v3054_v28  ;;  %v3068_v3 = vpop.permute.xlu1 %3067  ;;  %v3061_v33 = vpop.permute.xlu0 %3060 }
 0x43d   : > { %4639 = vpow2.f32 %v4338_v35  ;;  %v3395_v41 = vrot.slane %v3394_v16, 1  ;;  %v3388_v5 = vrot.slane %v3387_v62, 1  ;;  %v3407_v40 = vrot.slane %v3406_v1, 2 }
 0x43e   : > { %v4341_v19 = vmul.f32 -1.442695, %v3541_v25  ;;  %v4340_v10 = vmul.f32 -1.442695, %v3540_v45  ;;  %v3400_v8 = vrot.slane %v3399_v21, 2  ;;  %v3306_v55 = vsel %vm3298_vm2, %v3267_v48, 0.0 }
 0x43f   : > { %v3396_v31 = vadd.f32 %v3395_v41, %v3394_v16  ;;  %v3389_v24 = vadd.f32 %v3388_v5, %v3387_v62  ;;  %v3408_v6 = vadd.f32 %v3407_v40, %v3406_v1  ;;  %v3307_v52 = vrot.slane %v3306_v55, 4 }
 0x440   : > { %4641 = vpow2.f32 %v4341_v19  ;;  %v3401_v27 = vadd.f32 %v3400_v8, %v3399_v21  ;;  %v3266_v54 = vmul.f32 %v6286_v39, %v3047_v61  ;;  %v3269_v28 = vmul.f32 %v6286_v39, %v3068_v3  ;;  %v3082_v62 = vpop.permute.xlu1 %3081 }
 0x441   : > { %4643 = vpow2.f32 %v4340_v10  ;;  %v3543_v53 = vadd.f32 %v6345_v34, %v3396_v31  ;;  %v3542_v18 = vadd.f32 %v6345_v34, %v3389_v24  ;;  %v3409_v11 = vrot.slane %v3408_v6, 1 }
 0x442   : > { %v3402_v35 = vrot.slane %v3401_v27, 1  ;;  %v3308_v23 = vadd.f32 %v3307_v52, %v3306_v55  ;;  %v3299_v43 = vsel %vm3298_vm2, %v3266_v54, 0.0  ;;  %v3320_v16 = vsel %vm3298_vm2, %v3269_v28, 0.0 }
 0x443   : > { %v4343_v1 = vmul.f32 -1.442695, %v3543_v53  ;;  %v4342_v21 = vmul.f32 -1.442695, %v3542_v18  ;;  %v3410_v25 = vadd.f32 %v3409_v11, %v3408_v6  ;;  %v3300_v61 = vrot.slane %v3299_v43, 4 }
 0x444   : > { %v3403_v45 = vadd.f32 %v3402_v35, %v3401_v27  ;;  %v3309_v48 = vrot.slane %v3308_v23, 2  ;;  %v3321_v3 = vrot.slane %v3320_v16, 4  ;;  %v3268_v41 = vmul.f32 %v6286_v39, %v3061_v33 }
 0x445   : > { %4645 = vpow2.f32 %v4343_v1  ;;  %v3545_v5 = vadd.f32 %v6345_v34, %v3410_v25  ;;  %v3301_v40 = vadd.f32 %v3300_v61, %v3299_v43  ;;  %v3271_v19 = vmul.f32 %v6286_v39, %v3082_v62 }
 0x446   : > { %v4638_v10 = vpop.eup %4637  ;;  %4647 = vpow2.f32 %v4342_v21  ;;  %v3544_v8 = vadd.f32 %v6345_v34, %v3403_v45  ;;  %v3310_v55 = vadd.f32 %v3309_v48, %v3308_v23  ;;  %v3322_v31 = vadd.f32 %v3321_v3, %v3320_v16  ;;  %v3075_v48 = vpop.permute.xlu0 %3074 }
 0x447   : > { %v4640_v24 = vpop.eup %4639  ;;  %v3667_v6 = vadd.f32 1.0, %v4638_v10  ;;  %v4345_v52 = vmul.f32 -1.442695, %v3545_v5  ;;  %v3302_v27 = vrot.slane %v3301_v40, 2  ;;  %v3313_v54 = vsel %vm3298_vm2, %v3268_v41, 0.0 }
 0x448   : > { %v3666_v28 = vadd.f32 1.0, %v4640_v24  ;;  %v4344_v53 = vmul.f32 -1.442695, %v3544_v8  ;;  %v3311_v18 = vrot.slane %v3310_v55, 1  ;;  %v3323_v11 = vrot.slane %v3322_v31, 2 }
 0x449   : > { %4649 = vrcp.f32 %v3667_v6  ;;  %v3303_v33 = vadd.f32 %v3302_v27, %v3301_v40  ;;  %v3314_v35 = vrot.slane %v3313_v54, 4  ;;  %v3334_v43 = vsel %vm3298_vm2, %v3271_v19, 0.0  ;;  %v3096_v40 = vpop.permute.xlu1 %3095 }
 0x44a   : > { %v4642_v62 = vpop.eup %4641  ;;  %4651 = vrcp.f32 %v3666_v28  ;;  %v3312_v1 = vadd.f32 %v3311_v18, %v3310_v55  ;;  %v3324_v23 = vadd.f32 %v3323_v11, %v3322_v31  ;;  %v3335_v16 = vrot.slane %v3334_v43, 4 }
 0x44b   : > { %v4644_v21 = vpop.eup %4643  ;;  %v3669_v25 = vadd.f32 1.0, %v4642_v62  ;;  %4653 = vpow2.f32 %v4345_v52  ;;  %v3304_v61 = vrot.slane %v3303_v33, 1  ;;  %v3315_v45 = vadd.f32 %v3314_v35, %v3313_v54 }
 0x44c   : > { %v3668_v3 = vadd.f32 1.0, %v4644_v21  ;;  %4655 = vpow2.f32 %v4344_v53  ;;  %v3531_v41 = vadd.f32 %v6345_v34, %v3312_v1  ;;  %v3325_v5 = vrot.slane %v3324_v23, 1 }
 0x44d   : > { %4657 = vrcp.f32 %v3669_v25  ;;  %v3305_v10 = vadd.f32 %v3304_v61, %v3303_v33  ;;  %v3316_v19 = vrot.slane %v3315_v45, 2  ;;  %v3336_v8 = vadd.f32 %v3335_v16, %v3334_v43 }
 0x44e   : > { %4659 = vrcp.f32 %v3668_v3  ;;  %v4331_v55 = vmul.f32 -1.442695, %v3531_v41  ;;  %v3326_v31 = vadd.f32 %v3325_v5, %v3324_v23  ;;  %v3270_v24 = vmul.f32 %v6286_v39, %v3075_v48  ;;  %v3089_v23 = vpop.permute.xlu0 %3088 }
 0x44f   : > { %v4646_v6 = vpop.eup %4645  ;;  %v3530_v52 = vadd.f32 %v6345_v34, %v3305_v10  ;;  %v3317_v27 = vadd.f32 %v3316_v19, %v3315_v45  ;;  %v3337_v54 = vrot.slane %v3336_v8, 2  ;;  %v3273_v28 = vmul.f32 %v6286_v39, %v3096_v40 }
 0x450   : > { %v4648_v53 = vpop.eup %4647  ;;  %v3671_v18 = vadd.f32 1.0, %v4646_v6  ;;  %4661 = vpow2.f32 %v4331_v55  ;;  %v3533_v11 = vadd.f32 %v6345_v34, %v3326_v31  ;;  %v3327_v33 = vsel %vm3298_vm2, %v3270_v24, 0.0 }
 0x451   : > { %v3670_v35 = vadd.f32 1.0, %v4648_v53  ;;  %v4330_v43 = vmul.f32 -1.442695, %v3530_v52  ;;  %v3318_v62 = vrot.slane %v3317_v27, 1  ;;  %v3338_v1 = vadd.f32 %v3337_v54, %v3336_v8  ;;  %v6386_v53 = vld [vmem:[%s6756_s9] ss:$0 sm:$0xff] }
 0x452   : > { %4663 = vrcp.f32 %v3671_v18  ;;  %v4333_v16 = vmul.f32 -1.442695, %v3533_v11  ;;  %v3328_v21 = vrot.slane %v3327_v33, 4  ;;  %v3348_v25 = vsel %vm3298_vm2, %v3273_v28, 0.0 }
 0x453   : > { %v4650_v61 = vpop.eup %4649  ;;  %4665 = vrcp.f32 %v3670_v35  ;;  %v3319_v45 = vadd.f32 %v3318_v62, %v3317_v27  ;;  %v3339_v48 = vrot.slane %v3338_v1, 1  ;;  %v3349_v3 = vrot.slane %v3348_v25, 4 }
 0x454   : > { %v4652_v41 = vpop.eup %4651  ;;  %v3793_v5 = vrot.slane %v4650_v61, %v6241_v30  ;;  %4667 = vpow2.f32 %v4330_v43  ;;  %v3329_v40 = vadd.f32 %v3328_v21, %v3327_v33  ;;  %v6378_v10 = vmul.f32 %v6286_v39, %v3089_v23  ;;  %v6396_v23 = vld [vmem:[%s6757_s10] ss:$0 sm:$0xff] }
 0x455   : > { %v4654_v19 = vpop.eup %4653  ;;  %v3789_v8 = vrot.slane %v4652_v41, %v6241_v30  ;;  %4669 = vpow2.f32 %v4333_v16  ;;  %v3532_v55 = vadd.f32 %v6345_v34, %v3319_v45  ;;  %v3340_v31 = vadd.f32 %v3339_v48, %v3338_v1 }
 0x456   : > { %v4656_v24 = vpop.eup %4655  ;;  %v3891_v6 = vmul.f32 %v3793_v5, %v6097_v7  ;;  %v3673_v52 = vadd.f32 1.0, %v4654_v19  ;;  %v3330_v27 = vrot.slane %v3329_v40, 2  ;;  %v3350_v54 = vadd.f32 %v3349_v3, %v3348_v25 }
 0x457   : > { %v4658_v28 = vpop.eup %4657  ;;  %v3890_v18 = vmul.f32 %v3789_v8, %v6103_v36  ;;  %v3672_v11 = vadd.f32 1.0, %v4656_v24  ;;  %v4332_v33 = vmul.f32 -1.442695, %v3532_v55  ;;  %v3535_v35 = vadd.f32 %v6345_v34, %v3340_v31 }
 0x458   : > { %v4660_v43 = vpop.eup %4659  ;;  %v3923_v7 = vadd.f32 %v3891_v6, %v6314_v42  ;;  %v3801_v62 = vrot.slane %v4658_v28, %v6241_v30  ;;  %4671 = vrcp.f32 %v3673_v52  ;;  %v3331_v1 = vadd.f32 %v3330_v27, %v3329_v40 }
 0x459   : > { %v3922_v16 = vadd.f32 %v3890_v18, %v6304_v32  ;;  %v3797_v36 = vrot.slane %v4660_v43, %v6241_v30  ;;  %4673 = vrcp.f32 %v3672_v11  ;;  %v4335_v21 = vmul.f32 -1.442695, %v3535_v35 }
 0x45a   : > { %v4662_v25 = vpop.eup %4661  ;;  %v3962_v42 = vmul.f32 %v6386_v53, %v3923_v7  ;;  %v3893_v61 = vmul.f32 %v3801_v62, %v6107_v15  ;;  %4675 = vpow2.f32 %v4332_v33  ;;  %v3332_v45 = vrot.slane %v3331_v1, 1 }
 0x45b   : > { %v3961_v48 = vmul.f32 %v6386_v53, %v3922_v16  ;;  %v3892_v3 = vmul.f32 %v3797_v36, %v6100_v4  ;;  %v3659_v41 = vadd.f32 1.0, %v4662_v25  ;;  %4677 = vpow2.f32 %v4335_v21 }
 0x45c   : > { %v4664_v32 = vpop.eup %4663  ;;  %v4001_v5 = vadd.f32 %v6396_v23, %v3962_v42  ;;  %v3925_v40 = vadd.f32 %v3893_v61, %v6324_v26  ;;  %v3333_v19 = vadd.f32 %v3332_v45, %v3331_v1  ;;  %v3351_v8 = vrot.slane %v3350_v54, 2 }
 0x45d   : > { %v4666_v55 = vpop.eup %4665  ;;  %v4000_v31 = vadd.f32 %v6396_v23, %v3961_v48  ;;  %v3924_v15 = vadd.f32 %v3892_v3, %v6318_v17  ;;  %v3809_v24 = vrot.slane %v4664_v32, %v6241_v30  ;;  %4679 = vrcp.f32 %v3659_v41 }
 0x45e   : > { %v4668_v6 = vpop.eup %4667  ;;  %v4033_v52 = vmax.f32 %v4001_v5, 0.0  ;;  %v3964_v4 = vmul.f32 %v6386_v53, %v3925_v40  ;;  %v3805_v27 = vrot.slane %v4666_v55, %v6241_v30  ;;  %v3534_v28 = vadd.f32 %v6345_v34, %v3333_v19 }
 0x45f   : > { %v4670_v18 = vpop.eup %4669  ;;  %v4032_v26 = vmax.f32 %v4000_v31, 0.0  ;;  %v3963_v11 = vmul.f32 %v6386_v53, %v3924_v15  ;;  %v3895_v33 = vmul.f32 %v3809_v24, %v6121_v20  ;;  %v3658_v35 = vadd.f32 1.0, %v4668_v6 }
 0x460   : > { %4065 = vst [vmem:[%s6416_s25 + $0x48] sm:$0xff] %v4033_v52  ;;  %v4003_v17 = vadd.f32 %v6396_v23, %v3964_v4  ;;  %v3894_v43 = vmul.f32 %v3805_v27, %v6116_v13  ;;  %v3661_v7 = vadd.f32 1.0, %v4670_v18  ;;  %v4334_v62 = vmul.f32 -1.442695, %v3534_v28 }
 0x461   : > { %4064 = vst [vmem:[%s6416_s25 + $0x40] sm:$0xff] %v4032_v26  ;;  %v4002_v1 = vadd.f32 %v6396_v23, %v3963_v11  ;;  %v3927_v16 = vadd.f32 %v3895_v33, %v6334_v14  ;;  %4681 = vrcp.f32 %v3658_v35  ;;  %v3352_v20 = vadd.f32 %v3351_v8, %v3350_v54 }
 0x462   : > { %v4672_v36 = vpop.eup %4671  ;;  %v4035_v21 = vmax.f32 %v4003_v17, 0.0  ;;  %v3926_v25 = vadd.f32 %v3894_v43, %v6328_v50  ;;  %4683 = vrcp.f32 %v3661_v7  ;;  %v3341_v42 = vsel %vm3298_vm2, %v6378_v10, 0.0 }
 0x463   : > { %v4674_v13 = vpop.eup %4673  ;;  %v4034_v61 = vmax.f32 %v4002_v1, 0.0  ;;  %v3966_v45 = vmul.f32 %v6386_v53, %v3927_v16  ;;  %v3817_v48 = vrot.slane %v4672_v36, %v6241_v30  ;;  %4685 = vpow2.f32 %v4334_v62 }
 0x464   : > { %v4676_v3 = vpop.eup %4675  ;;  %4067 = vst [vmem:[%s6416_s25 + $0x58] sm:$0xff] %v4035_v21  ;;  %v3965_v14 = vmul.f32 %v6386_v53, %v3926_v25  ;;  %v3813_v54 = vrot.slane %v4674_v13, %v6241_v30  ;;  %v3353_v41 = vrot.slane %v3352_v20, 1  ;;  %v3342_v50 = vrot.slane %v3341_v42, 4 }
 0x465   : > { %v4678_v32 = vpop.eup %4677  ;;  %v734_v5 = vadd.f32 %v5467_v60, %v6298_v12  ;;  %4066 = vst [vmem:[%s6416_s25 + $0x50] sm:$0xff] %v4034_v61  ;;  %v4005_v10 = vadd.f32 %v6396_v23, %v3966_v45  ;;  %v3897_v40 = vmul.f32 %v3817_v48, %v6131_v2  ;;  %v3660_v19 = vadd.f32 1.0, %v4676_v3 }
 0x466   : > { %v4004_v8 = vadd.f32 %v6396_v23, %v3965_v14  ;;  %v3896_v55 = vmul.f32 %v3813_v54, %v6127_v47  ;;  %v3663_v31 = vadd.f32 1.0, %v4678_v32  ;;  %v3354_v15 = vadd.f32 %v3353_v41, %v3352_v20 }
 0x467   : > { %v4680_v24 = vpop.eup %4679  ;;  %v4037_v6 = vmax.f32 %v4005_v10, 0.0  ;;  %v3929_v52 = vadd.f32 %v3897_v40, %v734_v5  ;;  %4687 = vrcp.f32 %v3660_v19  ;;  %v3343_v4 = vadd.f32 %v3342_v50, %v3341_v42 }
 0x468   : > { %v4036_v60 = vmax.f32 %v4004_v8, 0.0  ;;  %v3928_v27 = vadd.f32 %v3896_v55, %v6338_v57  ;;  %v3761_v28 = vrot.slane %v4680_v24, %v6241_v30  ;;  %4689 = vrcp.f32 %v3663_v31 }
 0x469   : > { %4069 = vst [vmem:[%s6416_s25 + $0x68] sm:$0xff] %v4037_v6  ;;  %v3968_v2 = vmul.f32 %v6386_v53, %v3929_v52  ;;  %v3537_v18 = vadd.f32 %v6345_v34, %v3354_v15  ;;  %v3344_v47 = vrot.slane %v3343_v4, 2  ;;  %v664_v26 = vadd.f32 %v5278_v49, %v6298_v12 }
 0x46a   : > { %4068 = vst [vmem:[%s6416_s25 + $0x60] sm:$0xff] %v4036_v60  ;;  %v3967_v11 = vmul.f32 %v6386_v53, %v3928_v27  ;;  %v3883_v33 = vmul.f32 %v3761_v28, %v6050_v44  ;;  %v660_v62 = vadd.f32 %v5274_v46, %v6298_v12  ;;  %v674_v46 = vadd.f32 %v5293_v0, %v6298_v12 }
 0x46b   : > { %v4682_v35 = vpop.eup %4681  ;;  %v4007_v57 = vadd.f32 %v6396_v23, %v3968_v2  ;;  %v4337_v17 = vmul.f32 -1.442695, %v3537_v18  ;;  %v3345_v43 = vadd.f32 %v3344_v47, %v3343_v4  ;;  %v670_v19 = vadd.f32 %v5288_v58, %v6298_v12 }
 0x46c   : > { %v4684_v7 = vpop.eup %4683  ;;  %v4006_v1 = vadd.f32 %v6396_v23, %v3967_v11  ;;  %v3915_v16 = vadd.f32 %v3883_v33, %v664_v26  ;;  %v3757_v49 = vrot.slane %v4682_v35, %v6241_v30  ;;  %v684_v31 = vadd.f32 %v5320_v29, %v6298_v12 }
 0x46d   : > { %v4686_v20 = vpop.eup %4685  ;;  %v4039_v36 = vmax.f32 %v4007_v57, 0.0  ;;  %v3769_v44 = vrot.slane %v4684_v7, %v6241_v30  ;;  %4691 = vpow2.f32 %v4337_v17  ;;  %v3346_v21 = vrot.slane %v3345_v43, 1 }
 0x46e   : > { %v4038_v25 = vmax.f32 %v4006_v1, 0.0  ;;  %v3954_v42 = vmul.f32 %v6386_v53, %v3915_v16  ;;  %v3882_v13 = vmul.f32 %v3757_v49, %v6056_v38  ;;  %v3662_v61 = vadd.f32 1.0, %v4686_v20 }
 0x46f   : > { %4071 = vst [vmem:[%s6416_s25 + $0x78] sm:$0xff] %v4039_v36  ;;  %v3885_v45 = vmul.f32 %v3769_v44, %v6060_v9  ;;  %v3347_v48 = vadd.f32 %v3346_v21, %v3345_v43  ;;  %v680_v26 = vadd.f32 %v5309_v22, %v6298_v12  ;;  %v694_v20 = vadd.f32 %v5352_v63, %v6298_v12  ;;  %v6823_v21 = vld [vmem:[#allocation8_spill] sm:$0xff]  ;;  %v6825_v63 = vld [vmem:[#allocation17_spill] sm:$0xff] }
 0x470   : > { %4070 = vst [vmem:[%s6416_s25 + $0x70] sm:$0xff] %v4038_v25  ;;  %v3993_v3 = vadd.f32 %v6396_v23, %v3954_v42  ;;  %v3914_v14 = vadd.f32 %v3882_v13, %v660_v62  ;;  %4693 = vrcp.f32 %v3662_v61  ;;  %v690_v25 = vadd.f32 %v6823_v21, %v6298_v12  ;;  %v6824_v42 = vld [vmem:[#allocation10_spill] sm:$0xff] }
 0x471   : > { %v4688_v54 = vpop.eup %4687  ;;  %v3917_v41 = vadd.f32 %v3885_v45, %v674_v46  ;;  %v3536_v50 = vadd.f32 %v6345_v34, %v3347_v48  ;;  %v6502_v13 = vadd.f32 %v6824_v42, %v6298_v12  ;;  %v6508_v48 = vadd.f32 %v6825_v63, %v6298_v12 }
 0x472   : > { %v4690_v32 = vpop.eup %4689  ;;  %v4025_v38 = vmax.f32 %v3993_v3, 0.0  ;;  %v3953_v5 = vmul.f32 %v6386_v53, %v3914_v14  ;;  %v3765_v0 = vrot.slane %v4688_v54, %v6241_v30 }
 0x473   : > { %v3956_v10 = vmul.f32 %v6386_v53, %v3917_v41  ;;  %v3777_v9 = vrot.slane %v4690_v32, %v6241_v30  ;;  %v4336_v40 = vmul.f32 -1.442695, %v3536_v50  ;;  %v6827_v32 = vld [vmem:[#allocation19_spill] sm:$0xff] }
 0x474   : > { %4057 = vst [vmem:[%s6416_s25 + $0x8] sm:$0xff] %v4025_v38  ;;  %v3992_v8 = vadd.f32 %v6396_v23, %v3953_v5  ;;  %v3884_v55 = vmul.f32 %v3765_v0, %v6053_v51  ;;  %v6516_v38 = vadd.f32 %v6827_v32, %v6298_v12 }
 0x475   : > { %v3995_v15 = vadd.f32 %v6396_v23, %v3956_v10  ;;  %v3887_v24 = vmul.f32 %v3777_v9, %v6074_v59  ;;  %4695 = vpow2.f32 %v4336_v40  ;;  %v6828_v40 = vld [vmem:[#allocation20_spill] sm:$0xff] }
 0x476   : > { %v4024_v6 = vmax.f32 %v3992_v8, 0.0  ;;  %v3916_v52 = vadd.f32 %v3884_v55, %v670_v19  ;;  %v6523_v19 = vadd.f32 %v6828_v40, %v6298_v12  ;;  %v6829_v8 = vld [vmem:[#allocation21_spill] sm:$0xff] }
 0x477   : > { %v4692_v4 = vpop.eup %4691  ;;  %v4027_v60 = vmax.f32 %v3995_v15, 0.0  ;;  %v3919_v58 = vadd.f32 %v3887_v24, %v684_v31  ;;  %v6527_v55 = vadd.f32 %v6829_v8, %v6298_v12 }
 0x478   : > { %4056 = vst [vmem:[%s6416_s25] sm:$0xff] %v4024_v6  ;;  %v3955_v27 = vmul.f32 %v6386_v53, %v3916_v52  ;;  %v3665_v28 = vadd.f32 1.0, %v4692_v4 }
 0x479   : > { %4059 = vst [vmem:[%s6416_s25 + $0x18] sm:$0xff] %v4027_v60  ;;  %v3958_v51 = vmul.f32 %v6386_v53, %v3919_v58 }
 0x47a   : > { %v4694_v29 = vpop.eup %4693  ;;  %v3994_v2 = vadd.f32 %v6396_v23, %v3955_v27  ;;  %4697 = vrcp.f32 %v3665_v28 }
 0x47b   : > { %v3997_v59 = vadd.f32 %v6396_v23, %v3958_v51  ;;  %v3773_v18 = vrot.slane %v4694_v29, %v6241_v30 }
 0x47c   : > { %v4026_v47 = vmax.f32 %v3994_v2, 0.0 }
 0x47d   : > { %v4029_v11 = vmax.f32 %v3997_v59, 0.0  ;;  %v3886_v33 = vmul.f32 %v3773_v18, %v6069_v37  ;;  %v6830_v59 = vld [vmem:[#allocation25_spill] sm:$0xff] }
 0x47e   : > { %4058 = vst [vmem:[%s6416_s25 + $0x10] sm:$0xff] %v4026_v47 }
 0x47f   : > { %v4696_v35 = vpop.eup %4695  ;;  %4061 = vst [vmem:[%s6416_s25 + $0x28] sm:$0xff] %v4029_v11  ;;  %v3918_v57 = vadd.f32 %v3886_v33, %v680_v26 }
 0x480   : > { %v3664_v17 = vadd.f32 1.0, %v4696_v35 }
 0x481   : > { %v3957_v43 = vmul.f32 %v6386_v53, %v3918_v57 }
 0x482   : > { %4699 = vrcp.f32 %v3664_v17  ;;  %v6831_v17 = vld [vmem:[#allocation22_spill] sm:$0xff] }
 0x483   : > { %v3996_v7 = vadd.f32 %v6396_v23, %v3957_v43  ;;  %v6538_v43 = vadd.f32 %v6831_v17, %v6298_v12 }
 0x484   : > { %v4698_v62 = vpop.eup %4697 }
 0x485   : > { %v4028_v1 = vmax.f32 %v3996_v7, 0.0  ;;  %v3785_v16 = vrot.slane %v4698_v62, %v6241_v30 }
 0x486   : > { %v3222_v49 = vpop.permute.xlu1 %3221  ;;  %v3215_v22 = vpop.permute.xlu0 %3214 }
 0x487   : > { %4060 = vst [vmem:[%s6416_s25 + $0x20] sm:$0xff] %v4028_v1  ;;  %v3889_v37 = vmul.f32 %v3785_v16, %v6084_v56  ;;  %v3291_v36 = vmul.f32 %v6286_v39, %v3222_v49  ;;  %v3290_v44 = vmul.f32 %v6286_v39, %v3215_v22  ;;  %v6826_v56 = vld [vmem:[#allocation18_spill] sm:$0xff] }
 0x488   : > { %v6512_v3 = vadd.f32 %v6826_v56, %v6298_v12 }
 0x489   : > { %v3921_v61 = vadd.f32 %v3889_v37, %v694_v20  ;;  %v3474_v46 = vsel %vm3298_vm2, %v3291_v36, 0.0  ;;  %v3467_v45 = vsel %vm3298_vm2, %v3290_v44, 0.0 }
 0x48a   : > { %v3475_v14 = vrot.slane %v3474_v46, 4  ;;  %v3468_v54 = vrot.slane %v3467_v45, 4  ;;  %v3236_v41 = vpop.permute.xlu1 %3235  ;;  %v3229_v50 = vpop.permute.xlu0 %3228 }
 0x48b   : > { %v3960_v5 = vmul.f32 %v6386_v53, %v3921_v61  ;;  %v3293_v0 = vmul.f32 %v6286_v39, %v3236_v41  ;;  %v3292_v10 = vmul.f32 %v6286_v39, %v3229_v50 }
 0x48c   : > { %v4700_v9 = vpop.eup %4699  ;;  %v3476_v31 = vadd.f32 %v3475_v14, %v3474_v46  ;;  %v3469_v15 = vadd.f32 %v3468_v54, %v3467_v45 }
 0x48d   : > { %v3999_v24 = vadd.f32 %v6396_v23, %v3960_v5  ;;  %v3781_v6 = vrot.slane %v4700_v9, %v6241_v30  ;;  %v3488_v52 = vsel %vm3298_vm2, %v3293_v0, 0.0  ;;  %v3481_v4 = vsel %vm3298_vm2, %v3292_v10, 0.0 }
 0x48e   : > { %v3477_v60 = vrot.slane %v3476_v31, 2  ;;  %v3470_v58 = vrot.slane %v3469_v15, 2  ;;  %v3489_v27 = vrot.slane %v3488_v52, 4  ;;  %v3482_v28 = vrot.slane %v3481_v4, 4  ;;  %v3250_v51 = vpop.permute.xlu1 %3249  ;;  %v3243_v29 = vpop.permute.xlu0 %3242 }
 0x48f   : > { %v4031_v2 = vmax.f32 %v3999_v24, 0.0  ;;  %v3888_v18 = vmul.f32 %v3781_v6, %v6830_v59  ;;  %v3295_v47 = vmul.f32 %v6286_v39, %v3250_v51  ;;  %v3294_v26 = vmul.f32 %v6286_v39, %v3243_v29 }
 0x490   : > { %v3478_v11 = vadd.f32 %v3477_v60, %v3476_v31  ;;  %v3471_v33 = vadd.f32 %v3470_v58, %v3469_v15  ;;  %v3490_v35 = vadd.f32 %v3489_v27, %v3488_v52  ;;  %v3483_v57 = vadd.f32 %v3482_v28, %v3481_v4 }
 0x491   : > { %4063 = vst [vmem:[%s6416_s25 + $0x38] sm:$0xff] %v4031_v2  ;;  %v3920_v7 = vadd.f32 %v3888_v18, %v690_v25  ;;  %v3502_v62 = vsel %vm3298_vm2, %v3295_v47, 0.0  ;;  %v3495_v1 = vsel %vm3298_vm2, %v3294_v26, 0.0 }
 0x492   : > { %v3479_v16 = vrot.slane %v3478_v11, 1  ;;  %v3472_v49 = vrot.slane %v3471_v33, 1  ;;  %v3491_v22 = vrot.slane %v3490_v35, 2  ;;  %v3484_v20 = vrot.slane %v3483_v57, 2  ;;  %v3166_v37 = vpop.permute.xlu1 %3165  ;;  %v3159_v61 = vpop.permute.xlu0 %3158 }
 0x493   : > { %v3959_v36 = vmul.f32 %v6386_v53, %v3920_v7  ;;  %v3503_v44 = vrot.slane %v3502_v62, 4  ;;  %v3496_v21 = vrot.slane %v3495_v1, 4  ;;  %v3283_v42 = vmul.f32 %v6286_v39, %v3166_v37 }
 0x494   : > { %v3480_v46 = vadd.f32 %v3479_v16, %v3478_v11  ;;  %v3473_v45 = vadd.f32 %v3472_v49, %v3471_v33  ;;  %v3492_v63 = vadd.f32 %v3491_v22, %v3490_v35  ;;  %v3485_v25 = vadd.f32 %v3484_v20, %v3483_v57 }
 0x495   : > { %v3998_v56 = vadd.f32 %v6396_v23, %v3959_v36  ;;  %v3504_v14 = vadd.f32 %v3503_v44, %v3502_v62  ;;  %v3497_v54 = vadd.f32 %v3496_v21, %v3495_v1  ;;  %v3418_v41 = vsel %vm3298_vm2, %v3283_v42, 0.0 }
 0x496   : > { %v3555_v50 = vadd.f32 %v6345_v34, %v3480_v46  ;;  %v3554_v32 = vadd.f32 %v6345_v34, %v3473_v45  ;;  %v3493_v5 = vrot.slane %v3492_v63, 1  ;;  %v3486_v0 = vrot.slane %v3485_v25, 1  ;;  %v3180_v10 = vpop.permute.xlu1 %3179  ;;  %v3173_v28 = vpop.permute.xlu0 %3172 }
 0x497   : > { %v4030_v9 = vmax.f32 %v3998_v56, 0.0  ;;  %v3505_v40 = vrot.slane %v3504_v14, 2  ;;  %v3498_v8 = vrot.slane %v3497_v54, 2  ;;  %v3419_v31 = vrot.slane %v3418_v41, 4 }
 0x498   : > { %v4355_v15 = vmul.f32 -1.442695, %v3555_v50  ;;  %v4354_v24 = vmul.f32 -1.442695, %v3554_v32  ;;  %v3494_v6 = vadd.f32 %v3493_v5, %v3492_v63  ;;  %v3487_v52 = vadd.f32 %v3486_v0, %v3485_v25  ;;  %v6565_v50 = vld [vmem:[%s6754_s7] sm:$0x3] }
 0x499   : > { %4062 = vst [vmem:[%s6416_s25 + $0x30] sm:$0xff] %v4030_v9  ;;  %v3506_v4 = vadd.f32 %v3505_v40, %v3504_v14  ;;  %v3499_v60 = vadd.f32 %v3498_v8, %v3497_v54  ;;  %v3420_v58 = vadd.f32 %v3419_v31, %v3418_v41  ;;  %v3282_v27 = vmul.f32 %v6286_v39, %v3159_v61 }
 0x49a   : > { %4701 = vpow2.f32 %v4355_v15  ;;  %v3557_v51 = vadd.f32 %v6345_v34, %v3494_v6  ;;  %v3556_v29 = vadd.f32 %v6345_v34, %v3487_v52  ;;  %v3285_v2 = vmul.f32 %v6286_v39, %v3180_v10  ;;  %v3194_v59 = vpop.permute.xlu1 %3193  ;;  %v3187_v44 = vpop.permute.xlu0 %3186 }
 0x49b   : > { %4703 = vpow2.f32 %v4354_v24  ;;  %v3507_v18 = vrot.slane %v3506_v4, 1  ;;  %v3500_v47 = vrot.slane %v3499_v60, 1  ;;  %v3421_v26 = vrot.slane %v3420_v58, 2 }
 0x49c   : > { %v4357_v11 = vmul.f32 -1.442695, %v3557_v51  ;;  %v4356_v33 = vmul.f32 -1.442695, %v3556_v29  ;;  %v3411_v35 = vsel %vm3298_vm2, %v3282_v27, 0.0  ;;  %v3432_v57 = vsel %vm3298_vm2, %v3285_v2, 0.0 }
 0x49d   : > { %v3508_v17 = vadd.f32 %v3507_v18, %v3506_v4  ;;  %v3501_v7 = vadd.f32 %v3500_v47, %v3499_v60  ;;  %v3422_v62 = vadd.f32 %v3421_v26, %v3420_v58  ;;  %v3412_v1 = vrot.slane %v3411_v35, 4 }
 0x49e   : > { %4705 = vpow2.f32 %v4357_v11  ;;  %v3433_v16 = vrot.slane %v3432_v57, 4  ;;  %v3284_v49 = vmul.f32 %v6286_v39, %v3173_v28  ;;  %v3287_v22 = vmul.f32 %v6286_v39, %v3194_v59  ;;  %v3208_v45 = vpop.permute.xlu1 %3207 }
 0x49f   : > { %4707 = vpow2.f32 %v4356_v33  ;;  %v3559_v20 = vadd.f32 %v6345_v34, %v3508_v17  ;;  %v3558_v37 = vadd.f32 %v6345_v34, %v3501_v7  ;;  %v3423_v36 = vrot.slane %v3422_v62, 1 }
 0x4a0   : > { %v3413_v21 = vadd.f32 %v3412_v1, %v3411_v35  ;;  %v3434_v42 = vadd.f32 %v3433_v16, %v3432_v57  ;;  %v3425_v61 = vsel %vm3298_vm2, %v3284_v49, 0.0  ;;  %v3446_v46 = vsel %vm3298_vm2, %v3287_v22, 0.0  ;;  %v3201_v16 = vpop.permute.xlu0 %3200 }
 0x4a1   : > { %v4359_v63 = vmul.f32 -1.442695, %v3559_v20  ;;  %v4358_v25 = vmul.f32 -1.442695, %v3558_v37  ;;  %v3424_v56 = vadd.f32 %v3423_v36, %v3422_v62  ;;  %v3426_v14 = vrot.slane %v3425_v61, 4 }
 0x4a2   : > { %v3414_v54 = vrot.slane %v3413_v21, 2  ;;  %v3435_v39 = vrot.slane %v3434_v42, 2  ;;  %v3447_v41 = vrot.slane %v3446_v46, 4  ;;  %v3286_v32 = vmul.f32 %v6565_v50, %v3187_v44  ;;  %v3264_v37 = vpop.permute.xlu1 %3263 }
 0x4a3   : > { %4709 = vpow2.f32 %v4359_v63  ;;  %v3547_v5 = vadd.f32 %v6345_v34, %v3424_v56  ;;  %v3427_v0 = vadd.f32 %v3426_v14, %v3425_v61  ;;  %v3289_v10 = vmul.f32 %v6565_v50, %v3208_v45 }
 0x4a4   : > { %v4702_v9 = vpop.eup %4701  ;;  %4711 = vpow2.f32 %v4358_v25  ;;  %v3415_v40 = vadd.f32 %v3414_v54, %v3413_v21  ;;  %v3436_v8 = vadd.f32 %v3435_v39, %v3434_v42  ;;  %v3448_v31 = vadd.f32 %v3447_v41, %v3446_v46 }
 0x4a5   : > { %v4704_v15 = vpop.eup %4703  ;;  %v3683_v24 = vadd.f32 1.0, %v4702_v9  ;;  %v4347_v6 = vmul.f32 -1.442695, %v3547_v5  ;;  %v3428_v52 = vrot.slane %v3427_v0, 2  ;;  %v3439_v4 = vsel %vm3298_vm2, %v3286_v32, 0.0 }
 0x4a6   : > { %v3682_v60 = vadd.f32 1.0, %v4704_v15  ;;  %v3416_v58 = vrot.slane %v3415_v40, 1  ;;  %v3437_v27 = vrot.slane %v3436_v8, 1  ;;  %v3449_v28 = vrot.slane %v3448_v31, 2 }
 0x4a7   : > { %4713 = vrcp.f32 %v3683_v24  ;;  %v3429_v51 = vadd.f32 %v3428_v52, %v3427_v0  ;;  %v3440_v29 = vrot.slane %v3439_v4, 4  ;;  %v3460_v2 = vsel %vm3298_vm2, %v3289_v10, 0.0  ;;  %v3257_v52 = vpop.permute.xlu0 %3256 }
 0x4a8   : > { %v4706_v59 = vpop.eup %4705  ;;  %4715 = vrcp.f32 %v3682_v60  ;;  %v3417_v18 = vadd.f32 %v3416_v58, %v3415_v40  ;;  %v3438_v47 = vadd.f32 %v3437_v27, %v3436_v8  ;;  %v3450_v26 = vadd.f32 %v3449_v28, %v3448_v31  ;;  %v6585_v58 = vld [vmem:[%s6755_s8] ss:$0 sm:$0xff] }
 0x4a9   : > { %v4708_v11 = vpop.eup %4707  ;;  %v3685_v33 = vadd.f32 1.0, %v4706_v59  ;;  %4717 = vpow2.f32 %v4347_v6  ;;  %v3430_v35 = vrot.slane %v3429_v51, 1  ;;  %v3441_v57 = vadd.f32 %v3440_v29, %v3439_v4 }
 0x4aa   : > { %v3684_v17 = vadd.f32 1.0, %v4708_v11  ;;  %v3546_v7 = vadd.f32 %v6345_v34, %v3417_v18  ;;  %v3549_v62 = vadd.f32 %v6345_v34, %v3438_v47  ;;  %v3451_v1 = vrot.slane %v3450_v26, 1 }
 0x4ab   : > { %4719 = vrcp.f32 %v3685_v33  ;;  %v3431_v49 = vadd.f32 %v3430_v35, %v3429_v51  ;;  %v3442_v22 = vrot.slane %v3441_v57, 2  ;;  %v3461_v20 = vrot.slane %v3460_v2, 4  ;;  %v6832_v51 = vld [vmem:[#allocation34_spill] sm:$0xff] }
 0x4ac   : > { %4721 = vrcp.f32 %v3684_v17  ;;  %v4346_v36 = vmul.f32 -1.442695, %v3546_v7  ;;  %v4349_v44 = vmul.f32 -1.442695, %v3549_v62  ;;  %v3452_v21 = vadd.f32 %v3451_v1, %v3450_v26  ;;  %v6833_v26 = vld [vmem:[#allocation36_spill] sm:$0xff] }
 0x4ad   : > { %v4710_v42 = vpop.eup %4709  ;;  %v3548_v61 = vadd.f32 %v6345_v34, %v3431_v49  ;;  %v3443_v46 = vadd.f32 %v3442_v22, %v3441_v57  ;;  %v3462_v45 = vadd.f32 %v3461_v20, %v3460_v2  ;;  %v3288_v63 = vmul.f32 %v6565_v50, %v3201_v16 }
 0x4ae   : > { %v4712_v25 = vpop.eup %4711  ;;  %v3687_v56 = vadd.f32 1.0, %v4710_v42  ;;  %4723 = vpow2.f32 %v4346_v36  ;;  %v3551_v14 = vadd.f32 %v6345_v34, %v3452_v21  ;;  %v3297_v54 = vmul.f32 %v6565_v50, %v3264_v37  ;;  %v6834_v36 = vld [vmem:[#allocation37_spill] sm:$0xff] }
 0x4af   : > { %v3686_v39 = vadd.f32 1.0, %v4712_v25  ;;  %4725 = vpow2.f32 %v4349_v44  ;;  %v4348_v41 = vmul.f32 -1.442695, %v3548_v61  ;;  %v3444_v32 = vrot.slane %v3443_v46, 1  ;;  %v6835_v61 = vld [vmem:[#allocation35_spill] sm:$0xff] }
 0x4b0   : > { %4727 = vrcp.f32 %v3687_v56  ;;  %v4351_v5 = vmul.f32 -1.442695, %v3551_v14  ;;  %v3463_v0 = vrot.slane %v3462_v45, 2  ;;  %v3453_v10 = vsel %vm3298_vm2, %v3288_v63, 0.0 }
 0x4b1   : > { %v4714_v9 = vpop.eup %4713  ;;  %4729 = vrcp.f32 %v3686_v39  ;;  %v3445_v40 = vadd.f32 %v3444_v32, %v3443_v46  ;;  %v3454_v8 = vrot.slane %v3453_v10, 4  ;;  %v3516_v31 = vsel %vm3298_vm2, %v3297_v54, 0.0 }
 0x4b2   : > { %v4716_v15 = vpop.eup %4715  ;;  %v3857_v34 = vrot.slane %v4714_v9, %v6241_v30  ;;  %4731 = vpow2.f32 %v4348_v41  ;;  %v3464_v24 = vadd.f32 %v3463_v0, %v3462_v45  ;;  %v3517_v6 = vrot.slane %v3516_v31, 4 }
 0x4b3   : > { %v4718_v4 = vpop.eup %4717  ;;  %v3853_v60 = vrot.slane %v4716_v15, %v6241_v30  ;;  %4733 = vpow2.f32 %v4351_v5  ;;  %v3550_v27 = vadd.f32 %v6585_v58, %v3445_v40  ;;  %v3455_v28 = vadd.f32 %v3454_v8, %v3453_v10  ;;  %v6836_v15 = vld [vmem:[#allocation39_spill] sm:$0xff] }
 0x4b4   : > { %v3907_v29 = vmul.f32 %v3857_v34, %v6832_v51  ;;  %v3675_v2 = vadd.f32 1.0, %v4718_v4  ;;  %v3465_v59 = vrot.slane %v3464_v24, 1  ;;  %v3518_v18 = vadd.f32 %v3517_v6, %v3516_v31  ;;  %v6837_v6 = vld [vmem:[#allocation38_spill] sm:$0xff] }
 0x4b5   : > { %v4720_v47 = vpop.eup %4719  ;;  %v3906_v11 = vmul.f32 %v3853_v60, %v6833_v26  ;;  %v4350_v33 = vmul.f32 -1.442695, %v3550_v27  ;;  %v3456_v35 = vrot.slane %v3455_v28, 2  ;;  %v6591_v57 = vmul.f32 %v6565_v50, %v3257_v52 }
 0x4b6   : > { %v4722_v17 = vpop.eup %4721  ;;  %v3939_v7 = vadd.f32 %v3907_v29, %v6512_v3  ;;  %v3865_v62 = vrot.slane %v4720_v47, %v6241_v30  ;;  %4735 = vrcp.f32 %v3675_v2  ;;  %v3466_v1 = vadd.f32 %v3465_v59, %v3464_v24 }
 0x4b7   : > { %v3938_v16 = vadd.f32 %v3906_v11, %v6508_v48  ;;  %v3861_v49 = vrot.slane %v4722_v17, %v6241_v30  ;;  %4737 = vpow2.f32 %v4350_v33  ;;  %v3457_v22 = vadd.f32 %v3456_v35, %v3455_v28 }
 0x4b8   : > { %v4724_v20 = vpop.eup %4723  ;;  %v3978_v37 = vmul.f32 %v6386_v53, %v3939_v7  ;;  %v3909_v44 = vmul.f32 %v3865_v62, %v6834_v36  ;;  %v3553_v50 = vadd.f32 %v6585_v58, %v3466_v1  ;;  %v3519_v21 = vrot.slane %v3518_v18, 2 }
 0x4b9   : > { %v4726_v42 = vpop.eup %4725  ;;  %v3977_v3 = vmul.f32 %v6386_v53, %v3938_v16  ;;  %v3908_v46 = vmul.f32 %v3861_v49, %v6835_v61  ;;  %v3674_v45 = vadd.f32 1.0, %v4724_v20  ;;  %v3458_v63 = vrot.slane %v3457_v22, 1 }
 0x4ba   : > { %v4728_v48 = vpop.eup %4727  ;;  %v4017_v25 = vadd.f32 %v6396_v23, %v3978_v37  ;;  %v3941_v56 = vadd.f32 %v3909_v44, %v6523_v19  ;;  %v3677_v14 = vadd.f32 1.0, %v4726_v42  ;;  %v4353_v54 = vmul.f32 -1.442695, %v3553_v50 }
 0x4bb   : > { %v4730_v39 = vpop.eup %4729  ;;  %v4016_v41 = vadd.f32 %v6396_v23, %v3977_v3  ;;  %v3940_v32 = vadd.f32 %v3908_v46, %v6516_v38  ;;  %v3873_v5 = vrot.slane %v4728_v48, %v6241_v30  ;;  %4739 = vrcp.f32 %v3674_v45  ;;  %v6839_v48 = vld [vmem:[#allocation9_spill] sm:$0xff] }
 0x4bc   : > { %v4732_v0 = vpop.eup %4731  ;;  %v4049_v10 = vmax.f32 %v4017_v25, 0.0  ;;  %v3980_v9 = vmul.f32 %v6386_v53, %v3941_v56  ;;  %v3869_v40 = vrot.slane %v4730_v39, %v6241_v30  ;;  %4741 = vrcp.f32 %v3677_v14  ;;  %v6841_v14 = vld [vmem:[#allocation28_spill] sm:$0xff] }
 0x4bd   : > { %v4734_v19 = vpop.eup %4733  ;;  %v4048_v8 = vmax.f32 %v4016_v41, 0.0  ;;  %v3979_v31 = vmul.f32 %v6386_v53, %v3940_v32  ;;  %v3911_v34 = vmul.f32 %v3873_v5, %v6836_v15  ;;  %v3676_v24 = vadd.f32 1.0, %v4732_v0  ;;  %v6842_v5 = vld [vmem:[#allocation29_spill] sm:$0xff] }
 0x4be   : > { %4081 = vst [vmem:[%s6416_s25 + $0xc8] sm:$0xff] %v4049_v10  ;;  %v4019_v38 = vadd.f32 %v6396_v23, %v3980_v9  ;;  %v3910_v52 = vmul.f32 %v3869_v40, %v6837_v6  ;;  %v3679_v4 = vadd.f32 1.0, %v4734_v19  ;;  %4743 = vpow2.f32 %v4353_v54 }
 0x4bf   : > { %4080 = vst [vmem:[%s6416_s25 + $0xc0] sm:$0xff] %v4048_v8  ;;  %v4018_v60 = vadd.f32 %v6396_v23, %v3979_v31  ;;  %v3943_v27 = vadd.f32 %v3911_v34, %v6538_v43  ;;  %4745 = vrcp.f32 %v3676_v24  ;;  %v3459_v28 = vadd.f32 %v3458_v63, %v3457_v22  ;;  %v6843_v24 = vld [vmem:[#allocation11_spill] sm:$0xff] }
 0x4c0   : > { %v4736_v51 = vpop.eup %4735  ;;  %v4051_v29 = vmax.f32 %v4019_v38, 0.0  ;;  %v3942_v2 = vadd.f32 %v3910_v52, %v6527_v55  ;;  %4747 = vrcp.f32 %v3679_v4  ;;  %v3520_v59 = vadd.f32 %v3519_v21, %v3518_v18  ;;  %v6838_v18 = vld [vmem:[#allocation26_spill] sm:$0xff]  ;;  %v6844_v52 = vld [vmem:[#allocation27_spill] sm:$0xff] }
 0x4c1   : > { %v4738_v47 = vpop.eup %4737  ;;  %v4050_v26 = vmax.f32 %v4018_v60, 0.0  ;;  %v3982_v11 = vmul.f32 %v6386_v53, %v3943_v27  ;;  %v3825_v33 = vrot.slane %v4736_v51, %v6241_v30  ;;  %v3552_v35 = vadd.f32 %v6585_v58, %v3459_v28  ;;  %v6845_v27 = vld [vmem:[#allocation14_spill] sm:$0xff] }
 0x4c2   : > { %4083 = vst [vmem:[%s6416_s25 + $0xd8] sm:$0xff] %v4051_v29  ;;  %v3981_v43 = vmul.f32 %v6386_v53, %v3942_v2  ;;  %v3678_v17 = vadd.f32 1.0, %v4738_v47  ;;  %v3521_v7 = vrot.slane %v3520_v59, 1  ;;  %v3509_v62 = vsel %vm3298_vm2, %v6591_v57, 0.0  ;;  %v6846_v29 = vld [vmem:[#allocation31_spill] sm:$0xff] }
 0x4c3   : > { %4082 = vst [vmem:[%s6416_s25 + $0xd0] sm:$0xff] %v4050_v26  ;;  %v4021_v55 = vadd.f32 %v6396_v23, %v3982_v11  ;;  %v3899_v1 = vmul.f32 %v3825_v33, %v6838_v18  ;;  %v4352_v16 = vmul.f32 -1.442695, %v3552_v35  ;;  %v3510_v49 = vrot.slane %v3509_v62, 4 }
 0x4c4   : > { %v4020_v22 = vadd.f32 %v6396_v23, %v3981_v43  ;;  %4749 = vrcp.f32 %v3678_v17  ;;  %v3522_v20 = vadd.f32 %v3521_v7, %v3520_v59  ;;  %v740_v25 = vadd.f32 %v6839_v48, %v6298_v12 }
 0x4c5   : > { %v4740_v37 = vpop.eup %4739  ;;  %v4053_v36 = vmax.f32 %v4021_v55, 0.0  ;;  %v3931_v44 = vadd.f32 %v3899_v1, %v6502_v13  ;;  %4751 = vpow2.f32 %v4352_v16  ;;  %v3511_v50 = vadd.f32 %v3510_v49, %v3509_v62  ;;  %v6840_v13 = vld [vmem:[#allocation12_spill] sm:$0xff]  ;;  %v6847_v1 = vld [vmem:[#allocation13_spill] sm:$0xff] }
 0x4c6   : > { %v4742_v57 = vpop.eup %4741  ;;  %v4052_v21 = vmax.f32 %v4020_v22, 0.0  ;;  %v3821_v42 = vrot.slane %v4740_v37, %v6241_v30  ;;  %v3561_v3 = vadd.f32 %v6585_v58, %v3522_v20  ;;  %v754_v56 = vadd.f32 %v6840_v13, %v6298_v12  ;;  %v4768_v22 = vld [vmem:[%s6756_s9] ss:$0 sm:$0xff]  ;;  %v6848_v37 = vld [vmem:[#allocation30_spill] sm:$0xff]  ;;  %v6850_v13 = vld [vmem:[#allocation33_spill] sm:$0xff] }
 0x4c7   : > { %4085 = vst [vmem:[%s6416_s25 + $0xe8] sm:$0xff] %v4053_v36  ;;  %v3970_v61 = vmul.f32 %v6386_v53, %v3931_v44  ;;  %v3833_v46 = vrot.slane %v4742_v57, %v6241_v30  ;;  %v3512_v45 = vrot.slane %v3511_v50, 2  ;;  %v750_v38 = vadd.f32 %v6843_v24, %v6298_v12 }
 0x4c8   : > { %v4744_v63 = vpop.eup %4743  ;;  %4084 = vst [vmem:[%s6416_s25 + $0xe0] sm:$0xff] %v4052_v21  ;;  %v3898_v54 = vmul.f32 %v3821_v42, %v6841_v14  ;;  %v4361_v39 = vmul.f32 -1.442695, %v3561_v3  ;;  %v764_v28 = vadd.f32 %v6845_v27, %v6298_v12  ;;  %v760_v16 = vadd.f32 %v6847_v1, %v6298_v12 }
 0x4c9   : > { %v4746_v41 = vpop.eup %4745  ;;  %v4009_v32 = vadd.f32 %v6396_v23, %v3970_v61  ;;  %v3901_v0 = vmul.f32 %v3833_v46, %v6842_v5  ;;  %v3681_v10 = vadd.f32 1.0, %v4744_v63  ;;  %v3513_v9 = vadd.f32 %v3512_v45, %v3511_v50  ;;  %v4769_v63 = vld [vmem:[%s6757_s10] ss:$0 sm:$0xff] }
 0x4ca   : > { %v4748_v40 = vpop.eup %4747  ;;  %v3930_v19 = vadd.f32 %v3898_v54, %v740_v25  ;;  %v3829_v8 = vrot.slane %v4746_v41, %v6241_v30  ;;  %4753 = vpow2.f32 %v4361_v39 }
 0x4cb   : > { %v4041_v31 = vmax.f32 %v4009_v32, 0.0  ;;  %v3933_v15 = vadd.f32 %v3901_v0, %v754_v56  ;;  %v3841_v34 = vrot.slane %v4748_v40, %v6241_v30  ;;  %4755 = vrcp.f32 %v3681_v10  ;;  %v6851_v10 = vld [vmem:[#allocation15_spill] sm:$0xff]  ;;  %v6852_v40 = vld [vmem:[#allocation32_spill] sm:$0xff] }
 0x4cc   : > { %v3969_v6 = vmul.f32 %v6386_v53, %v3930_v19  ;;  %v3900_v4 = vmul.f32 %v3829_v8, %v6844_v52  ;;  %v3514_v60 = vrot.slane %v3513_v9, 1 }
 0x4cd   : > { %4073 = vst [vmem:[%s6416_s25 + $0x88] sm:$0xff] %v4041_v31  ;;  %v3972_v51 = vmul.f32 %v6386_v53, %v3933_v15  ;;  %v3903_v2 = vmul.f32 %v3841_v34, %v6846_v29 }
 0x4ce   : > { %v4750_v59 = vpop.eup %4749  ;;  %v4008_v47 = vadd.f32 %v6396_v23, %v3969_v6  ;;  %v3932_v26 = vadd.f32 %v3900_v4, %v750_v38  ;;  %v3515_v11 = vadd.f32 %v3514_v60, %v3513_v9  ;;  %v770_v9 = vadd.f32 %v6851_v10, %v6298_v12  ;;  %v6853_v6 = vld [vmem:[#allocation24_spill] sm:$0xff]  ;;  %v6854_v4 = vld [vmem:[#allocation41_spill] sm:$0xff] }
 0x4cf   : > { %v4752_v33 = vpop.eup %4751  ;;  %v4011_v35 = vadd.f32 %v6396_v23, %v3972_v51  ;;  %v3935_v43 = vadd.f32 %v3903_v2, %v764_v28  ;;  %v3837_v17 = vrot.slane %v4750_v59, %v6241_v30  ;;  %v814_v52 = vadd.f32 %v6853_v6, %v6298_v12 }
 0x4d0   : > { %v4040_v7 = vmax.f32 %v4008_v47, 0.0  ;;  %v3971_v62 = vmul.f32 %v6386_v53, %v3932_v26  ;;  %v3680_v55 = vadd.f32 1.0, %v4752_v33  ;;  %v3560_v18 = vadd.f32 %v6585_v58, %v3515_v11  ;;  %v6855_v11 = vld [vmem:[#allocation23_spill] sm:$0xff] }
 0x4d1   : > { %v4043_v49 = vmax.f32 %v4011_v35, 0.0  ;;  %v3974_v20 = vmul.f32 %v4768_v22, %v3935_v43  ;;  %v3902_v36 = vmul.f32 %v3837_v17, %v6848_v37  ;;  %v810_v33 = vadd.f32 %v6855_v11, %v6298_v12  ;;  %v6856_v35 = vld [vmem:[#allocation40_spill] sm:$0xff] }
 0x4d2   : > { %4072 = vst [vmem:[%s6416_s25 + $0x80] sm:$0xff] %v4040_v7  ;;  %v4010_v44 = vadd.f32 %v6396_v23, %v3971_v62  ;;  %4757 = vrcp.f32 %v3680_v55  ;;  %v4360_v53 = vmul.f32 -1.442695, %v3560_v18 }
 0x4d3   : > { %4075 = vst [vmem:[%s6416_s25 + $0x98] sm:$0xff] %v4043_v49  ;;  %v4013_v58 = vadd.f32 %v6396_v23, %v3974_v20  ;;  %v3934_v50 = vadd.f32 %v3902_v36, %v760_v16  ;;  %v6849_v23 = vld [vmem:[#allocation16_spill] sm:$0xff] }
 0x4d4   : > { %v4754_v57 = vpop.eup %4753  ;;  %v4042_v21 = vmax.f32 %v4010_v44, 0.0  ;;  %4759 = vpow2.f32 %v4360_v53  ;;  %v774_v25 = vadd.f32 %v6849_v23, %v6298_v12 }
 0x4d5   : > { %v4756_v42 = vpop.eup %4755  ;;  %v4045_v3 = vmax.f32 %v4013_v58, 0.0  ;;  %v3973_v61 = vmul.f32 %v4768_v22, %v3934_v50  ;;  %v3689_v46 = vadd.f32 1.0, %v4754_v57 }
 0x4d6   : > { %4074 = vst [vmem:[%s6416_s25 + $0x90] sm:$0xff] %v4042_v21  ;;  %v3849_v45 = vrot.slane %v4756_v42, %v6241_v30 }
 0x4d7   : > { %4077 = vst [vmem:[%s6416_s25 + $0xa8] sm:$0xff] %v4045_v3  ;;  %v4012_v48 = vadd.f32 %v4769_v63, %v3973_v61  ;;  %4761 = vrcp.f32 %v3689_v46 }
 0x4d8   : > { %v3905_v56 = vmul.f32 %v3849_v45, %v6850_v13 }
 0x4d9   : > { %v4044_v14 = vmax.f32 %v4012_v48, 0.0 }
 0x4da   : > { %v3937_v54 = vadd.f32 %v3905_v56, %v774_v25 }
 0x4db   : > { %4076 = vst [vmem:[%s6416_s25 + $0xa0] sm:$0xff] %v4044_v14 }
 0x4dc   : > { %v4758_v39 = vpop.eup %4757  ;;  %v3976_v41 = vmul.f32 %v4768_v22, %v3937_v54 }
 0x4dd   : > { %v3845_v32 = vrot.slane %v4758_v39, %v6241_v30 }
 0x4de   : > { %v4760_v5 = vpop.eup %4759  ;;  %v4015_v0 = vadd.f32 %v4769_v63, %v3976_v41 }
 0x4df   : > { %v3904_v19 = vmul.f32 %v3845_v32, %v6852_v40  ;;  %v3688_v8 = vadd.f32 1.0, %v4760_v5 }
 0x4e0   : > { %v4047_v31 = vmax.f32 %v4015_v0, 0.0 }
 0x4e1   : > { %v4762_v15 = vpop.eup %4761  ;;  %v3936_v34 = vadd.f32 %v3904_v19, %v770_v9  ;;  %4763 = vrcp.f32 %v3688_v8 }
 0x4e2   : > { %4079 = vst [vmem:[%s6416_s25 + $0xb8] sm:$0xff] %v4047_v31  ;;  %v3881_v24 = vrot.slane %v4762_v15, %v6241_v30 }
 0x4e3   : > { %v3975_v38 = vmul.f32 %v4768_v22, %v3936_v34 }
 0x4e4   : > { %v3913_v60 = vmul.f32 %v3881_v24, %v6854_v4 }
 0x4e5   : > { %v4014_v27 = vadd.f32 %v4769_v63, %v3975_v38 }
 0x4e6   : > { %v3945_v28 = vadd.f32 %v3913_v60, %v814_v52 }
 0x4e7   : > { %v4046_v51 = vmax.f32 %v4014_v27, 0.0 }
 0x4e8   : > { %v3984_v29 = vmul.f32 %v4768_v22, %v3945_v28 }
 0x4e9   : > { %4078 = vst [vmem:[%s6416_s25 + $0xb0] sm:$0xff] %v4046_v51 }
 0x4ea   : > { %v4023_v2 = vadd.f32 %v4769_v63, %v3984_v29 }
 0x4eb   : > { %v4764_v59 = vpop.eup %4763 }
 0x4ec   : > { %v4055_v47 = vmax.f32 %v4023_v2, 0.0  ;;  %v3877_v26 = vrot.slane %v4764_v59, %v6241_v30 }
 0x4ee   : > { %4087 = vst [vmem:[%s6416_s25 + $0xf8] sm:$0xff] %v4055_v47  ;;  %v3912_v43 = vmul.f32 %v3877_v26, %v6856_v35 }
 0x4f0   : > { %v3944_v17 = vadd.f32 %v3912_v43, %v810_v33 }
 0x4f2   : > { %v3983_v7 = vmul.f32 %v4768_v22, %v3944_v17 }
 0x4f4   : > { %v4022_v62 = vadd.f32 %v4769_v63, %v3983_v7 }
 0x4f6   : > { %v4054_v30 = vmax.f32 %v4022_v62, 0.0 }
 0x4f8   : > { %4086 = vst [vmem:[%s6416_s25 + $0xf0] sm:$0xff] %v4054_v30 }
 0x4f9   : > { %4783 = shalt.err (!%p4780_p3)
}
 0x4fa   : > { %s4784_s19 = scalar_lea.hbm %s6699_s29, 4096  ;;  %s4788_s16 = scalar_lea.hbm %s6758_s11, 8192 }
 0x4fb   : > { %p4785_p4 = scmp.ne.s32.totalorder %s6699_s29, %s4784_s19  ;;  %p4789_p9 = scmp.lt.u32.totalorder %s6699_s29, %s6758_s11 }
 0x4fc   : > { %p4790_p10 = scmp.lt.u32.totalorder %s4788_s16, %s4784_s19  ;;  %p4792_p12 = scmp.lt.u32.totalorder %s4784_s19, %s6699_s29 }
 0x4fd   : > { %p4786_p7 = pnand %p4785_p4, %p4939_p5 }
 0x4fe   : > { %p4791_p11 = por %p4790_p10, %p4789_p9 }
 0x4ff   : > { %p4787_p8 = pneg %p4786_p7 }
 0x500   : > { %p4793_p13 = por %p4792_p12, %p4791_p11 }
 0x502   : > { %p4794_p0 = pnand %p4793_p13, %p4787_p8 }
 0x504   : > { %4797 = shalt.err (!%p4794_p0)
}
 0x505   : > { %s4839_s14 = smov 128   ;;  %s4840_s21 = smov 8  }
 0x506   : > { %4492 = dma.vmem_to_hbm [thread:$0]  (%p4939_p5), %s6701_s22, 4096, %s6699_s29, %s6706_s13, %s4839_s14, %s4839_s14, %s4840_s21  }
 0x507 PF: > { %p4498_p1 = scmp.ge.s32.totalorder %s4832_s20, 2  ;;  %s4117_s26 = sand.u32 1, %s4820_s17  }
 0x508   : > { %s4118_s30 = scalar_lea.sflag [#allocation4], %s4117_s26 }
 0x509   : > { %p4495_p2 = pnand %p4498_p1, %p4943_p6 }
 0x50b   : > { %4815 = dma.done.wait (!%p4495_p2), %s4118_s30, 4096  }
 0x50c   : > { %4817 = vsyncadd (!%p4495_p2), %s4118_s30, 4294963200  ;;  %s6857_s19 = sld [smem:[#allocation6_spill]]  ;;  %s6858_s25 = sld [smem:[#allocation7_spill]] }
 0x50d   : > { %p21_p3 = scmp.ge.s32.totalorder %s4926_s23, 4   ;;  %s6859_s17 = smov %s4824_s18 }
 0x50e   : > { %s6862_s20 = smov %s4926_s23 }
 0x50f   :  { %23 = sbr.rel (!%p21_p3) target bundleno = 3 (0x3), region = 99 }
 0x512   : > { %s6860_s18 = smov %s6857_s19  ;;  %s6861_s19 = smov %s6858_s25 }
 0x516   :  { %4123 = vsyncpa [#allocation4], 1 }
 0x517   :  { %4125 = vsyncpa [#allocation4 + $0x1], 1 }

</bundles_post_ra>
